<compile_context>
chip_gen: v7x
topology: tpu7x:2x2x1
jax: 0.10.0
libtpu: 0.0.40
codegen_flags: <defaults>
</compile_context>

<pallas_src>
import math
import numpy as np
import jax
import jax.numpy as jnp
from jax import lax
from jax.experimental import pallas as pl
from jax.experimental.pallas import tpu as pltpu

B_DEFAULT = 2
H_IN, W_IN = 64, 32           # implied by fc1 input size 20*28*12
C1, K1 = 10, 5                # conv1: 1 -> 10, 5x5
C2, K2 = 20, 3                # conv2: 10 -> 20, 3x3
H1P, W1P = 30, 14             # conv1 output after 2x2 pool
S1 = H1P * W1P                # 420
SP1 = 512                     # S1 padded to a lane-aligned width (4 vregs)
H2, W2 = 28, 12               # conv2 output spatial
S2 = H2 * W2                  # 336
FC1_IN, FC1_OUT = C2 * S2, 500
FC2_OUT = 9
CPC = 10                      # conv2 channels of fc1 weight per grid step
NCHUNK = C2 // CPC            # 2 reduction steps in the head kernel


# ---------------------------------------------------------------------------
# Kernel 1: conv1 (one merged matmul over the whole batch and all 4 pool
#           parities) + 2x2 max-pool + bias + ReLU, channels-first output.
#           Single invocation (no grid) -- everything fits VMEM (~450 KB).
# ---------------------------------------------------------------------------
def _conv1_relu_pool_kernel(p_ref, w_ref, b_ref, o_ref):
    # p_ref: (25, B*4*SP1) im2col patches, tap-major rows; lane axis is
    #        (batch, pool-parity, zero-padded downsampled spatial) flattened.
    # w_ref: (10, 25)   b_ref: (10, 1)   o_ref: (B, 10, SP1)
    B = o_ref.shape[0]
    r = jnp.dot(w_ref[...], p_ref[...], preferred_element_type=jnp.float32)
    for b in range(B):                                   # static, B is tiny
        s = r[:, b * 4 * SP1:(b + 1) * 4 * SP1]
        m = jnp.maximum(
            jnp.maximum(s[:, 0 * SP1:1 * SP1], s[:, 1 * SP1:2 * SP1]),
            jnp.maximum(s[:, 2 * SP1:3 * SP1], s[:, 3 * SP1:4 * SP1]))
        # bias is shared across parities and ReLU is monotone, so both commute
        # with the pool max.
        o_ref[b] = jnp.maximum(m + b_ref[...], 0.0)


def conv1_relu_pool(p1t, w1t, b1c, B):
    return pl.pallas_call(
        _conv1_relu_pool_kernel,
        out_shape=jax.ShapeDtypeStruct((B, C1, SP1), jnp.float32),
    )(p1t, w1t, b1c)


# ---------------------------------------------------------------------------
# Kernel 2 (head): conv2 (as matmul) + ReLU, fc1 accumulated over chunks of
#           CPC conv2 channels (grid reduction axis), ReLU, fc2, log_softmax.
#           Whole batch in one block -> fc1 weight streamed once per forward,
#           in NCHUNK=2 large bf16 chunks (3.36 MB each).
# ---------------------------------------------------------------------------
def _head_kernel(p2_ref, w2m_ref, b2_ref, w1fc_ref, b1fc_ref, w2fc_ref,
                 b2fc_ref, o_ref, h2_s, y_s):
    c = pl.program_id(0)          # fc1 reduction chunk index
    B = p2_ref.shape[0]

    @pl.when(c == 0)
    def _():
        # conv2 as (20,90) x (90,336) matmuls + bias + ReLU, channels-first
        for b in range(B):
            v = jnp.dot(w2m_ref[...], p2_ref[b],
                        preferred_element_type=jnp.float32)
            h2_s[:, b, :] = jnp.maximum(v + b2_ref[...], 0.0)
        y_s[...] = jnp.broadcast_to(b1fc_ref[...], y_s.shape)   # fc1 bias init

    # fc1 partial sums for this chunk of CPC conv2 channels.
    # Weights stream as bf16 (halves the dominant HBM traffic); accumulation
    # stays float32.  Compute is negligible -- the kernel is HBM-bound.
    acc = y_s[...]
    for j in range(CPC):
        a = h2_s[c * CPC + j]                                    # (B, 336)
        acc = acc + jnp.dot(a.astype(jnp.bfloat16), w1fc_ref[j],
                            preferred_element_type=jnp.float32)
    y_s[...] = acc

    @pl.when(c == NCHUNK - 1)
    def _():
        y = jnp.maximum(y_s[...], 0.0)                                   # ReLU
        z = jnp.dot(y, w2fc_ref[...],
                    preferred_element_type=jnp.float32) + b2fc_ref[...]  # fc2
        m = jnp.max(z, axis=-1, keepdims=True)
        lse = jnp.log(jnp.sum(jnp.exp(z - m), axis=-1, keepdims=True)) + m
        o_ref[...] = z - lse                                             # log_softmax


def head(p2, w2m, b2c, w1fc, b1fc, w2fc, b2fc):
    B = p2.shape[0]
    return pl.pallas_call(
        _head_kernel,
        out_shape=jax.ShapeDtypeStruct((B, FC2_OUT), jnp.float32),
        grid_spec=pltpu.PrefetchScalarGridSpec(
            num_scalar_prefetch=0,
            grid=(NCHUNK,),
            in_specs=[
                pl.BlockSpec((B, C1 * K2 * K2, S2), lambda c: (0, 0, 0)),
                pl.BlockSpec((C2, C1 * K2 * K2), lambda c: (0, 0)),
                pl.BlockSpec((C2, 1), lambda c: (0, 0)),
                # only the fc1 weight varies with the grid -> streamed in
                # NCHUNK big chunks, each (CPC, 336, 500) bf16 = 3.36 MB
                pl.BlockSpec((CPC, S2, FC1_OUT), lambda c: (c, 0, 0)),
                pl.BlockSpec((1, FC1_OUT), lambda c: (0, 0)),
                pl.BlockSpec((FC1_OUT, FC2_OUT), lambda c: (0, 0)),
                pl.BlockSpec((1, FC2_OUT), lambda c: (0, 0)),
            ],
            out_specs=pl.BlockSpec((B, FC2_OUT), lambda c: (0, 0)),
            scratch_shapes=[
                pltpu.VMEM((C2, B, S2), jnp.float32),   # relu(conv2) activations
                pltpu.VMEM((B, FC1_OUT), jnp.float32),  # fc1 accumulator
            ],
        ),
        compiler_params=pltpu.CompilerParams(
            dimension_semantics=("arbitrary",)),
    )(p2, w2m, b2c, w1fc, b1fc, w2fc, b2fc)


# ---------------------------------------------------------------------------
# One-time weight layout prep (offline; NOT part of the jitted hot path).
# ---------------------------------------------------------------------------
def prepare_params(params):
    w1, b1, w2, b2, fc1w, fc1b, fc2w, fc2b = params
    w1t = w1.reshape(C1, K1 * K1)                                # (10, 25)
    b1c = b1.reshape(C1, 1)
    w2m = w2.reshape(C2, C1 * K2 * K2)                           # (20, 90)
    b2c = b2.reshape(C2, 1)
    # fc1 weight transposed to (in_features, out) and split by conv2 channel so
    # the contraction matches PyTorch's NCHW .view(B, -1) flatten order; cast
    # to bf16 for the HBM stream (f32 accumulation in-kernel).
    w1fc = jnp.asarray(fc1w).T.reshape(C2, S2, FC1_OUT).astype(jnp.bfloat16)
    b1fc = fc1b.reshape(1, FC1_OUT)
    w2fc = jnp.asarray(fc2w).T                                   # (500, 9)
    b2fc = fc2b.reshape(1, FC2_OUT)
    return (w1t, b1c, w2m, b2c, w1fc, b1fc, w2fc, b2fc)


# ---------------------------------------------------------------------------
# Wrapper: hot-path glue (im2col patch extraction only).
# ---------------------------------------------------------------------------
def digit_forward(x, prep):
    w1t, b1c, w2m, b2c, w1fc, b1fc, w2fc, b2fc = prep
    B = x.shape[0]
    xs = x[:, 0]  # (B, 64, 32) -- single input channel

    # glue: im2col for conv1, fused with the 2x2 max-pool parity decomposition.
    # Tap-major rows (25); lane axis is (batch, parity, spatial padded 420->512).
    parities = []
    for p in range(2):
        for q in range(2):
            # NOTE: the slice stops (p+kh+2*H1P up to 65, q+kw+2*W1P up to 33)
            # intentionally overshoot the 64x32 input; jnp slicing clamps and
            # the stride-2 slices still yield exactly H1P x W1P taps.
            taps = jnp.stack(
                [xs[:, p + kh: p + kh + 2 * H1P: 2, q + kw: q + kw + 2 * W1P: 2]
                 for kh in range(K1) for kw in range(K1)], axis=1)   # (B,25,30,14)
            t = taps.reshape(B, K1 * K1, S1)                         # (B,25,420)
            parities.append(jnp.pad(t, ((0, 0), (0, 0), (0, SP1 - S1))))
    par = jnp.stack(parities, axis=2)                                # (B,25,4,512)
    p1t = par.transpose(1, 0, 2, 3).reshape(K1 * K1, B * 4 * SP1)    # (25,B*2048)

    h1 = conv1_relu_pool(p1t, w1t, b1c, B)                           # (B,10,512)

    # glue: im2col for conv2 (channels-first already, no transpose needed;
    # rows ordered (ic, kh, kw) to match torch's w2.reshape(20, 90)).
    # Lanes [420:512] of h1 hold relu(bias) garbage from the zero padding;
    # the :S1 slice below drops them before the im2col.
    h1r = h1[:, :, :S1].reshape(B, C1, H1P, W1P)                     # (B,10,30,14)
    cols = jnp.stack([h1r[:, :, kh:kh + H2, kw:kw + W2]
                      for kh in range(K2) for kw in range(K2)], axis=2)  # (B,10,9,28,12)
    p2 = cols.reshape(B, C1 * K2 * K2, S2)                           # (B,90,336)

    return head(p2, w2m, b2c, w1fc, b1fc, w2fc, b2fc)                # (B, 9)


# ---------------------------------------------------------------------------
# Pure-JAX reference (matches the PyTorch forward semantics)
# ---------------------------------------------------------------------------
def reference_forward(x, params):
    w1, b1, w2, b2, fc1w, fc1b, fc2w, fc2b = params
    hp = lax.Precision.HIGHEST
    y = lax.conv_general_dilated(x, w1, (1, 1), "VALID",
                                 dimension_numbers=("NCHW", "OIHW", "NCHW"),
                                 precision=hp)
    y = jnp.maximum(y + b1[None, :, None, None], 0.0)
    y = lax.reduce_window(y, -jnp.inf, lax.max, (1, 1, 2, 2), (1, 1, 2, 2), "VALID")
    y = lax.conv_general_dilated(y, w2, (1, 1), "VALID",
                                 dimension_numbers=("NCHW", "OIHW", "NCHW"),
                                 precision=hp)
    y = jnp.maximum(y + b2[None, :, None, None], 0.0)
    y = y.reshape(x.shape[0], -1)
    y = jnp.maximum(jnp.dot(y, fc1w.T, precision=hp) + fc1b, 0.0)
    y = jnp.dot(y, fc2w.T, precision=hp) + fc2b
    return jax.nn.log_softmax(y, axis=1)


if __name__ == "__main__":
    key = jax.random.PRNGKey(0)
    ks = jax.random.split(key, 9)

    def uinit(k, shape, fan_in):
        bound = 1.0 / math.sqrt(fan_in)
        return jax.random.uniform(k, shape, jnp.float32, -bound, bound)

    params = (
        uinit(ks[0], (C1, 1, K1, K1), 1 * K1 * K1),     # conv1.weight
        uinit(ks[1], (C1,), 1 * K1 * K1),               # conv1.bias
        uinit(ks[2], (C2, C1, K2, K2), C1 * K2 * K2),   # conv2.weight
        uinit(ks[3], (C2,), C1 * K2 * K2),              # conv2.bias
        uinit(ks[4], (FC1_OUT, FC1_IN), FC1_IN),        # fc1.weight
        uinit(ks[5], (FC1_OUT,), FC1_IN),               # fc1.bias
        uinit(ks[6], (FC2_OUT, FC1_OUT), FC1_OUT),      # fc2.weight
        uinit(ks[7], (FC2_OUT,), FC1_OUT),              # fc2.bias
    )
    x = jax.random.normal(ks[8], (B_DEFAULT, 1, H_IN, W_IN), jnp.float32)

    prep = prepare_params(params)                       # offline weight layout
    fwd = jax.jit(digit_forward)
    out = jax.block_until_ready(fwd(x, prep))
    assert out.shape == (B_DEFAULT, FC2_OUT) and out.dtype == jnp.float32

    ref = reference_forward(x, params)
    np.testing.assert_allclose(np.asarray(out), np.asarray(ref), rtol=5e-2, atol=5e-2)
    print("KERNEL_OK")
</pallas_src>

<mosaic_0001>
module attributes {stable_mosaic.version = 11 : i64} {
  func.func @_conv1_relu_pool_kernel(%arg0: memref<25x4096xf32, #tpu.memory_space<vmem>>, %arg1: memref<10x25xf32, #tpu.memory_space<vmem>>, %arg2: memref<10x1xf32, #tpu.memory_space<vmem>>, %arg3: memref<2x10x512xf32, #tpu.memory_space<vmem>>) attributes {dimension_semantics = [], scalar_prefetch = 0 : i64, scratch_operands = 0 : i64, tpu.core_type = #tpu.core_type<tc>} {
    %c0 = arith.constant 0 : index
    %c0_0 = arith.constant 0 : index
    %0 = vector.load %arg1[%c0, %c0_0] : memref<10x25xf32, #tpu.memory_space<vmem>>, vector<10x25xf32>
    %c0_1 = arith.constant 0 : index
    %c0_2 = arith.constant 0 : index
    %1 = vector.load %arg0[%c0_1, %c0_2] : memref<25x4096xf32, #tpu.memory_space<vmem>>, vector<25x4096xf32>
    %cst = arith.constant dense<0.000000e+00> : vector<10x4096xf32>
    %2 = tpu.matmul %0, %1, %cst {dimension_numbers = #tpu.dot_dimension_numbers<[1], [0], [0], [1], [0, 0, 1, 1], [], []>} : vector<10x25xf32>, vector<25x4096xf32>, vector<10x4096xf32> -> vector<10x4096xf32>
    %3 = vector.extract_strided_slice %2 {offsets = [0, 0], sizes = [10, 2048], strides = [1, 1]} : vector<10x4096xf32> to vector<10x2048xf32>
    %4 = vector.extract_strided_slice %3 {offsets = [0, 0], sizes = [10, 512], strides = [1, 1]} : vector<10x2048xf32> to vector<10x512xf32>
    %5 = vector.extract_strided_slice %3 {offsets = [0, 512], sizes = [10, 512], strides = [1, 1]} : vector<10x2048xf32> to vector<10x512xf32>
    %6 = arith.maximumf %4, %5 : vector<10x512xf32>
    %7 = vector.extract_strided_slice %3 {offsets = [0, 1024], sizes = [10, 512], strides = [1, 1]} : vector<10x2048xf32> to vector<10x512xf32>
    %8 = vector.extract_strided_slice %3 {offsets = [0, 1536], sizes = [10, 512], strides = [1, 1]} : vector<10x2048xf32> to vector<10x512xf32>
    %9 = arith.maximumf %7, %8 : vector<10x512xf32>
    %10 = arith.maximumf %6, %9 : vector<10x512xf32>
    %c0_3 = arith.constant 0 : index
    %c0_4 = arith.constant 0 : index
    %11 = vector.load %arg2[%c0_3, %c0_4] : memref<10x1xf32, #tpu.memory_space<vmem>>, vector<10x1xf32>
    %12 = vector.broadcast %11 : vector<10x1xf32> to vector<10x512xf32>
    %13 = arith.addf %10, %12 : vector<10x512xf32>
    %cst_5 = arith.constant 0.000000e+00 : f32
    %14 = vector.broadcast %cst_5 : f32 to vector<10x512xf32>
    %15 = arith.maximumf %13, %14 : vector<10x512xf32>
    %c0_6 = arith.constant 0 : index
    %c0_7 = arith.constant 0 : index
    %c0_8 = arith.constant 0 : index
    %16 = vector.load %arg3[%c0_6, %c0_7, %c0_8] : memref<2x10x512xf32, #tpu.memory_space<vmem>>, vector<1x10x512xf32>
    %17 = vector.shape_cast %16 : vector<1x10x512xf32> to vector<10x512xf32>
    %18 = vector.shape_cast %15 : vector<10x512xf32> to vector<1x10x512xf32>
    tpu.vector_store %arg3[%c0_6, %c0_7, %c0_8], %18 {strides = array<i32>} : memref<2x10x512xf32, #tpu.memory_space<vmem>>, vector<1x10x512xf32>,
    %19 = vector.extract_strided_slice %2 {offsets = [0, 2048], sizes = [10, 2048], strides = [1, 1]} : vector<10x4096xf32> to vector<10x2048xf32>
    %20 = vector.extract_strided_slice %19 {offsets = [0, 0], sizes = [10, 512], strides = [1, 1]} : vector<10x2048xf32> to vector<10x512xf32>
    %21 = vector.extract_strided_slice %19 {offsets = [0, 512], sizes = [10, 512], strides = [1, 1]} : vector<10x2048xf32> to vector<10x512xf32>
    %22 = arith.maximumf %20, %21 : vector<10x512xf32>
    %23 = vector.extract_strided_slice %19 {offsets = [0, 1024], sizes = [10, 512], strides = [1, 1]} : vector<10x2048xf32> to vector<10x512xf32>
    %24 = vector.extract_strided_slice %19 {offsets = [0, 1536], sizes = [10, 512], strides = [1, 1]} : vector<10x2048xf32> to vector<10x512xf32>
    %25 = arith.maximumf %23, %24 : vector<10x512xf32>
    %26 = arith.maximumf %22, %25 : vector<10x512xf32>
    %c0_9 = arith.constant 0 : index
    %c0_10 = arith.constant 0 : index
    %27 = vector.load %arg2[%c0_9, %c0_10] : memref<10x1xf32, #tpu.memory_space<vmem>>, vector<10x1xf32>
    %28 = vector.broadcast %27 : vector<10x1xf32> to vector<10x512xf32>
    %29 = arith.addf %26, %28 : vector<10x512xf32>
    %cst_11 = arith.constant 0.000000e+00 : f32
    %30 = vector.broadcast %cst_11 : f32 to vector<10x512xf32>
    %31 = arith.maximumf %29, %30 : vector<10x512xf32>
    %c1 = arith.constant 1 : index
    %c0_12 = arith.constant 0 : index
    %c0_13 = arith.constant 0 : index
    %32 = vector.load %arg3[%c1, %c0_12, %c0_13] : memref<2x10x512xf32, #tpu.memory_space<vmem>>, vector<1x10x512xf32>
    %33 = vector.shape_cast %32 : vector<1x10x512xf32> to vector<10x512xf32>
    %34 = vector.shape_cast %31 : vector<10x512xf32> to vector<1x10x512xf32>
    tpu.vector_store %arg3[%c1, %c0_12, %c0_13], %34 {strides = array<i32>} : memref<2x10x512xf32, #tpu.memory_space<vmem>>, vector<1x10x512xf32>,
    return
  }
}

module attributes {stable_mosaic.version = 11 : i64} {
  func.func @_head_kernel(%arg0: i32, %arg1: memref<2x90x336xf32, #tpu.memory_space<vmem>>, %arg2: memref<20x90xf32, #tpu.memory_space<vmem>>, %arg3: memref<20x1xf32, #tpu.memory_space<vmem>>, %arg4: memref<10x336x500xbf16, #tpu.memory_space<vmem>>, %arg5: memref<1x500xf32, #tpu.memory_space<vmem>>, %arg6: memref<500x9xf32, #tpu.memory_space<vmem>>, %arg7: memref<1x9xf32, #tpu.memory_space<vmem>>, %arg8: memref<2x9xf32, #tpu.memory_space<vmem>>, %arg9: memref<20x2x336xf32, #tpu.memory_space<vmem>>, %arg10: memref<2x500xf32, #tpu.memory_space<vmem>>) attributes {dimension_semantics = [#tpu.dimension_semantics<arbitrary>], iteration_bounds = array<i64: 2>, scalar_prefetch = 0 : i64, scratch_operands = 2 : i64, tpu.core_type = #tpu.core_type<tc>, window_params = [{pipeline_mode = #tpu.pipeline_mode<synchronous>, transform_indices = @transform_0, window_bounds = array<i64: 2, 90, 336>}, {pipeline_mode = #tpu.pipeline_mode<synchronous>, transform_indices = @transform_1, window_bounds = array<i64: 20, 90>}, {pipeline_mode = #tpu.pipeline_mode<synchronous>, transform_indices = @transform_2, window_bounds = array<i64: 20, 1>}, {transform_indices = @transform_3, window_bounds = array<i64: 10, 336, 500>}, {pipeline_mode = #tpu.pipeline_mode<synchronous>, transform_indices = @transform_4, window_bounds = array<i64: 1, 500>}, {pipeline_mode = #tpu.pipeline_mode<synchronous>, transform_indices = @transform_5, window_bounds = array<i64: 500, 9>}, {pipeline_mode = #tpu.pipeline_mode<synchronous>, transform_indices = @transform_6, window_bounds = array<i64: 1, 9>}, {pipeline_mode = #tpu.pipeline_mode<synchronous>, transform_indices = @transform_7, window_bounds = array<i64: 2, 9>}]} {
    %c0_i32 = arith.constant 0 : i32
    %0 = arith.cmpi eq, %arg0, %c0_i32 : i32
    %1 = arith.extui %0 : i1 to i32
    %c0_i32_0 = arith.constant 0 : i32
    %2 = arith.cmpi ne, %1, %c0_i32_0 : i32
    scf.if %2 {
      %c0_66 = arith.constant 0 : index
      %c0_67 = arith.constant 0 : index
      %108 = vector.load %arg2[%c0_66, %c0_67] : memref<20x90xf32, #tpu.memory_space<vmem>>, vector<20x90xf32>
      %c0_68 = arith.constant 0 : index
      %c0_69 = arith.constant 0 : index
      %c0_70 = arith.constant 0 : index
      %109 = vector.load %arg1[%c0_68, %c0_69, %c0_70] : memref<2x90x336xf32, #tpu.memory_space<vmem>>, vector<1x90x336xf32>
      %110 = vector.shape_cast %109 : vector<1x90x336xf32> to vector<90x336xf32>
      %cst_71 = arith.constant dense<0.000000e+00> : vector<20x336xf32>
      %111 = tpu.matmul %108, %110, %cst_71 {dimension_numbers = #tpu.dot_dimension_numbers<[1], [0], [0], [1], [0, 0, 1, 1], [], []>} : vector<20x90xf32>, vector<90x336xf32>, vector<20x336xf32> -> vector<20x336xf32>
      %c0_72 = arith.constant 0 : index
      %c0_73 = arith.constant 0 : index
      %112 = vector.load %arg3[%c0_72, %c0_73] : memref<20x1xf32, #tpu.memory_space<vmem>>, vector<20x1xf32>
      %113 = vector.broadcast %112 : vector<20x1xf32> to vector<20x336xf32>
      %114 = arith.addf %111, %113 : vector<20x336xf32>
      %cst_74 = arith.constant 0.000000e+00 : f32
      %115 = vector.broadcast %cst_74 : f32 to vector<20x336xf32>
      %116 = arith.maximumf %114, %115 : vector<20x336xf32>
      %c0_75 = arith.constant 0 : index
      %c0_76 = arith.constant 0 : index
      %c0_77 = arith.constant 0 : index
      %117 = vector.load %arg9[%c0_75, %c0_76, %c0_77] : memref<20x2x336xf32, #tpu.memory_space<vmem>>, vector<20x1x336xf32>
      %118 = vector.shape_cast %117 : vector<20x1x336xf32> to vector<20x336xf32>
      %119 = vector.shape_cast %116 : vector<20x336xf32> to vector<20x1x336xf32>
      tpu.vector_store %arg9[%c0_75, %c0_76, %c0_77], %119 {strides = array<i32>} : memref<20x2x336xf32, #tpu.memory_space<vmem>>, vector<20x1x336xf32>,
      %c0_78 = arith.constant 0 : index
      %c0_79 = arith.constant 0 : index
      %120 = vector.load %arg2[%c0_78, %c0_79] : memref<20x90xf32, #tpu.memory_space<vmem>>, vector<20x90xf32>
      %c1_80 = arith.constant 1 : index
      %c0_81 = arith.constant 0 : index
      %c0_82 = arith.constant 0 : index
      %121 = vector.load %arg1[%c1_80, %c0_81, %c0_82] : memref<2x90x336xf32, #tpu.memory_space<vmem>>, vector<1x90x336xf32>
      %122 = vector.shape_cast %121 : vector<1x90x336xf32> to vector<90x336xf32>
      %cst_83 = arith.constant dense<0.000000e+00> : vector<20x336xf32>
      %123 = tpu.matmul %120, %122, %cst_83 {dimension_numbers = #tpu.dot_dimension_numbers<[1], [0], [0], [1], [0, 0, 1, 1], [], []>} : vector<20x90xf32>, vector<90x336xf32>, vector<20x336xf32> -> vector<20x336xf32>
      %c0_84 = arith.constant 0 : index
      %c0_85 = arith.constant 0 : index
      %124 = vector.load %arg3[%c0_84, %c0_85] : memref<20x1xf32, #tpu.memory_space<vmem>>, vector<20x1xf32>
      %125 = vector.broadcast %124 : vector<20x1xf32> to vector<20x336xf32>
      %126 = arith.addf %123, %125 : vector<20x336xf32>
      %cst_86 = arith.constant 0.000000e+00 : f32
      %127 = vector.broadcast %cst_86 : f32 to vector<20x336xf32>
      %128 = arith.maximumf %126, %127 : vector<20x336xf32>
      %c0_87 = arith.constant 0 : index
      %c1_88 = arith.constant 1 : index
      %c0_89 = arith.constant 0 : index
      %129 = vector.load %arg9[%c0_87, %c1_88, %c0_89] : memref<20x2x336xf32, #tpu.memory_space<vmem>>, vector<20x1x336xf32>
      %130 = vector.shape_cast %129 : vector<20x1x336xf32> to vector<20x336xf32>
      %131 = vector.shape_cast %128 : vector<20x336xf32> to vector<20x1x336xf32>
      tpu.vector_store %arg9[%c0_87, %c1_88, %c0_89], %131 {strides = array<i32>} : memref<20x2x336xf32, #tpu.memory_space<vmem>>, vector<20x1x336xf32>,
      %c0_90 = arith.constant 0 : index
      %c0_91 = arith.constant 0 : index
      %132 = vector.load %arg5[%c0_90, %c0_91] : memref<1x500xf32, #tpu.memory_space<vmem>>, vector<1x500xf32>
      %133 = vector.shape_cast %132 : vector<1x500xf32> to vector<1x500xf32>
      %134 = vector.broadcast %133 : vector<1x500xf32> to vector<2x500xf32>
      %c0_92 = arith.constant 0 : index
      %c0_93 = arith.constant 0 : index
      %135 = vector.load %arg10[%c0_92, %c0_93] : memref<2x500xf32, #tpu.memory_space<vmem>>, vector<2x500xf32>
      tpu.vector_store %arg10[%c0_92, %c0_93], %134 {strides = array<i32>} : memref<2x500xf32, #tpu.memory_space<vmem>>, vector<2x500xf32>,
    } else {
    }
    %c0 = arith.constant 0 : index
    %c0_1 = arith.constant 0 : index
    %3 = vector.load %arg10[%c0, %c0_1] : memref<2x500xf32, #tpu.memory_space<vmem>>, vector<2x500xf32>
    %c10_i32 = arith.constant 10 : i32
    %4 = arith.muli %arg0, %c10_i32 : i32
    %c0_i32_2 = arith.constant 0 : i32
    %5 = arith.addi %4, %c0_i32_2 : i32
    %6 = arith.index_cast %5 : i32 to index
    %c0_3 = arith.constant 0 : index
    %c0_4 = arith.constant 0 : index
    %7 = vector.load %arg9[%6, %c0_3, %c0_4] : memref<20x2x336xf32, #tpu.memory_space<vmem>>, vector<1x2x336xf32>
    %8 = vector.shape_cast %7 : vector<1x2x336xf32> to vector<2x336xf32>
    %9 = arith.truncf %8 : vector<2x336xf32> to vector<2x336xbf16>
    %c0_5 = arith.constant 0 : index
    %c0_6 = arith.constant 0 : index
    %c0_7 = arith.constant 0 : index
    %10 = vector.load %arg4[%c0_5, %c0_6, %c0_7] : memref<10x336x500xbf16, #tpu.memory_space<vmem>>, vector<1x336x500xbf16>
    %11 = vector.shape_cast %10 : vector<1x336x500xbf16> to vector<336x500xbf16>
    %cst = arith.constant dense<0.000000e+00> : vector<2x500xf32>
    %12 = tpu.matmul %9, %11, %cst {dimension_numbers = #tpu.dot_dimension_numbers<[1], [0], [0], [1], [0, 0, 1, 1], [], []>} : vector<2x336xbf16>, vector<336x500xbf16>, vector<2x500xf32> -> vector<2x500xf32>
    %13 = arith.addf %3, %12 : vector<2x500xf32>
    %c10_i32_8 = arith.constant 10 : i32
    %14 = arith.muli %arg0, %c10_i32_8 : i32
    %c1_i32 = arith.constant 1 : i32
    %15 = arith.addi %14, %c1_i32 : i32
    %16 = arith.index_cast %15 : i32 to index
    %c0_9 = arith.constant 0 : index
    %c0_10 = arith.constant 0 : index
    %17 = vector.load %arg9[%16, %c0_9, %c0_10] : memref<20x2x336xf32, #tpu.memory_space<vmem>>, vector<1x2x336xf32>
    %18 = vector.shape_cast %17 : vector<1x2x336xf32> to vector<2x336xf32>
    %19 = arith.truncf %18 : vector<2x336xf32> to vector<2x336xbf16>
    %c1 = arith.constant 1 : index
    %c0_11 = arith.constant 0 : index
    %c0_12 = arith.constant 0 : index
    %20 = vector.load %arg4[%c1, %c0_11, %c0_12] : memref<10x336x500xbf16, #tpu.memory_space<vmem>>, vector<1x336x500xbf16>
    %21 = vector.shape_cast %20 : vector<1x336x500xbf16> to vector<336x500xbf16>
    %cst_13 = arith.constant dense<0.000000e+00> : vector<2x500xf32>
    %22 = tpu.matmul %19, %21, %cst_13 {dimension_numbers = #tpu.dot_dimension_numbers<[1], [0], [0], [1], [0, 0, 1, 1], [], []>} : vector<2x336xbf16>, vector<336x500xbf16>, vector<2x500xf32> -> vector<2x500xf32>
    %23 = arith.addf %13, %22 : vector<2x500xf32>
    %c10_i32_14 = arith.constant 10 : i32
    %24 = arith.muli %arg0, %c10_i32_14 : i32
    %c2_i32 = arith.constant 2 : i32
    %25 = arith.addi %24, %c2_i32 : i32
    %26 = arith.index_cast %25 : i32 to index
    %c0_15 = arith.constant 0 : index
    %c0_16 = arith.constant 0 : index
    %27 = vector.load %arg9[%26, %c0_15, %c0_16] : memref<20x2x336xf32, #tpu.memory_space<vmem>>, vector<1x2x336xf32>
    %28 = vector.shape_cast %27 : vector<1x2x336xf32> to vector<2x336xf32>
    %29 = arith.truncf %28 : vector<2x336xf32> to vector<2x336xbf16>
    %c2 = arith.constant 2 : index
    %c0_17 = arith.constant 0 : index
    %c0_18 = arith.constant 0 : index
    %30 = vector.load %arg4[%c2, %c0_17, %c0_18] : memref<10x336x500xbf16, #tpu.memory_space<vmem>>, vector<1x336x500xbf16>
    %31 = vector.shape_cast %30 : vector<1x336x500xbf16> to vector<336x500xbf16>
    %cst_19 = arith.constant dense<0.000000e+00> : vector<2x500xf32>
    %32 = tpu.matmul %29, %31, %cst_19 {dimension_numbers = #tpu.dot_dimension_numbers<[1], [0], [0], [1], [0, 0, 1, 1], [], []>} : vector<2x336xbf16>, vector<336x500xbf16>, vector<2x500xf32> -> vector<2x500xf32>
    %33 = arith.addf %23, %32 : vector<2x500xf32>
    %c10_i32_20 = arith.constant 10 : i32
    %34 = arith.muli %arg0, %c10_i32_20 : i32
    %c3_i32 = arith.constant 3 : i32
    %35 = arith.addi %34, %c3_i32 : i32
    %36 = arith.index_cast %35 : i32 to index
    %c0_21 = arith.constant 0 : index
    %c0_22 = arith.constant 0 : index
    %37 = vector.load %arg9[%36, %c0_21, %c0_22] : memref<20x2x336xf32, #tpu.memory_space<vmem>>, vector<1x2x336xf32>
    %38 = vector.shape_cast %37 : vector<1x2x336xf32> to vector<2x336xf32>
    %39 = arith.truncf %38 : vector<2x336xf32> to vector<2x336xbf16>
    %c3 = arith.constant 3 : index
    %c0_23 = arith.constant 0 : index
    %c0_24 = arith.constant 0 : index
    %40 = vector.load %arg4[%c3, %c0_23, %c0_24] : memref<10x336x500xbf16, #tpu.memory_space<vmem>>, vector<1x336x500xbf16>
    %41 = vector.shape_cast %40 : vector<1x336x500xbf16> to vector<336x500xbf16>
    %cst_25 = arith.constant dense<0.000000e+00> : vector<2x500xf32>
    %42 = tpu.matmul %39, %41, %cst_25 {dimension_numbers = #tpu.dot_dimension_numbers<[1], [0], [0], [1], [0, 0, 1, 1], [], []>} : vector<2x336xbf16>, vector<336x500xbf16>, vector<2x500xf32> -> vector<2x500xf32>
    %43 = arith.addf %33, %42 : vector<2x500xf32>
    %c10_i32_26 = arith.constant 10 : i32
    %44 = arith.muli %arg0, %c10_i32_26 : i32
    %c4_i32 = arith.constant 4 : i32
    %45 = arith.addi %44, %c4_i32 : i32
    %46 = arith.index_cast %45 : i32 to index
    %c0_27 = arith.constant 0 : index
    %c0_28 = arith.constant 0 : index
    %47 = vector.load %arg9[%46, %c0_27, %c0_28] : memref<20x2x336xf32, #tpu.memory_space<vmem>>, vector<1x2x336xf32>
    %48 = vector.shape_cast %47 : vector<1x2x336xf32> to vector<2x336xf32>
    %49 = arith.truncf %48 : vector<2x336xf32> to vector<2x336xbf16>
    %c4 = arith.constant 4 : index
    %c0_29 = arith.constant 0 : index
    %c0_30 = arith.constant 0 : index
    %50 = vector.load %arg4[%c4, %c0_29, %c0_30] : memref<10x336x500xbf16, #tpu.memory_space<vmem>>, vector<1x336x500xbf16>
    %51 = vector.shape_cast %50 : vector<1x336x500xbf16> to vector<336x500xbf16>
    %cst_31 = arith.constant dense<0.000000e+00> : vector<2x500xf32>
    %52 = tpu.matmul %49, %51, %cst_31 {dimension_numbers = #tpu.dot_dimension_numbers<[1], [0], [0], [1], [0, 0, 1, 1], [], []>} : vector<2x336xbf16>, vector<336x500xbf16>, vector<2x500xf32> -> vector<2x500xf32>
    %53 = arith.addf %43, %52 : vector<2x500xf32>
    %c10_i32_32 = arith.constant 10 : i32
    %54 = arith.muli %arg0, %c10_i32_32 : i32
    %c5_i32 = arith.constant 5 : i32
    %55 = arith.addi %54, %c5_i32 : i32
    %56 = arith.index_cast %55 : i32 to index
    %c0_33 = arith.constant 0 : index
    %c0_34 = arith.constant 0 : index
    %57 = vector.load %arg9[%56, %c0_33, %c0_34] : memref<20x2x336xf32, #tpu.memory_space<vmem>>, vector<1x2x336xf32>
    %58 = vector.shape_cast %57 : vector<1x2x336xf32> to vector<2x336xf32>
    %59 = arith.truncf %58 : vector<2x336xf32> to vector<2x336xbf16>
    %c5 = arith.constant 5 : index
    %c0_35 = arith.constant 0 : index
    %c0_36 = arith.constant 0 : index
    %60 = vector.load %arg4[%c5, %c0_35, %c0_36] : memref<10x336x500xbf16, #tpu.memory_space<vmem>>, vector<1x336x500xbf16>
    %61 = vector.shape_cast %60 : vector<1x336x500xbf16> to vector<336x500xbf16>
    %cst_37 = arith.constant dense<0.000000e+00> : vector<2x500xf32>
    %62 = tpu.matmul %59, %61, %cst_37 {dimension_numbers = #tpu.dot_dimension_numbers<[1], [0], [0], [1], [0, 0, 1, 1], [], []>} : vector<2x336xbf16>, vector<336x500xbf16>, vector<2x500xf32> -> vector<2x500xf32>
    %63 = arith.addf %53, %62 : vector<2x500xf32>
    %c10_i32_38 = arith.constant 10 : i32
    %64 = arith.muli %arg0, %c10_i32_38 : i32
    %c6_i32 = arith.constant 6 : i32
    %65 = arith.addi %64, %c6_i32 : i32
    %66 = arith.index_cast %65 : i32 to index
    %c0_39 = arith.constant 0 : index
    %c0_40 = arith.constant 0 : index
    %67 = vector.load %arg9[%66, %c0_39, %c0_40] : memref<20x2x336xf32, #tpu.memory_space<vmem>>, vector<1x2x336xf32>
    %68 = vector.shape_cast %67 : vector<1x2x336xf32> to vector<2x336xf32>
    %69 = arith.truncf %68 : vector<2x336xf32> to vector<2x336xbf16>
    %c6 = arith.constant 6 : index
    %c0_41 = arith.constant 0 : index
    %c0_42 = arith.constant 0 : index
    %70 = vector.load %arg4[%c6, %c0_41, %c0_42] : memref<10x336x500xbf16, #tpu.memory_space<vmem>>, vector<1x336x500xbf16>
    %71 = vector.shape_cast %70 : vector<1x336x500xbf16> to vector<336x500xbf16>
    %cst_43 = arith.constant dense<0.000000e+00> : vector<2x500xf32>
    %72 = tpu.matmul %69, %71, %cst_43 {dimension_numbers = #tpu.dot_dimension_numbers<[1], [0], [0], [1], [0, 0, 1, 1], [], []>} : vector<2x336xbf16>, vector<336x500xbf16>, vector<2x500xf32> -> vector<2x500xf32>
    %73 = arith.addf %63, %72 : vector<2x500xf32>
    %c10_i32_44 = arith.constant 10 : i32
    %74 = arith.muli %arg0, %c10_i32_44 : i32
    %c7_i32 = arith.constant 7 : i32
    %75 = arith.addi %74, %c7_i32 : i32
    %76 = arith.index_cast %75 : i32 to index
    %c0_45 = arith.constant 0 : index
    %c0_46 = arith.constant 0 : index
    %77 = vector.load %arg9[%76, %c0_45, %c0_46] : memref<20x2x336xf32, #tpu.memory_space<vmem>>, vector<1x2x336xf32>
    %78 = vector.shape_cast %77 : vector<1x2x336xf32> to vector<2x336xf32>
    %79 = arith.truncf %78 : vector<2x336xf32> to vector<2x336xbf16>
    %c7 = arith.constant 7 : index
    %c0_47 = arith.constant 0 : index
    %c0_48 = arith.constant 0 : index
    %80 = vector.load %arg4[%c7, %c0_47, %c0_48] : memref<10x336x500xbf16, #tpu.memory_space<vmem>>, vector<1x336x500xbf16>
    %81 = vector.shape_cast %80 : vector<1x336x500xbf16> to vector<336x500xbf16>
    %cst_49 = arith.constant dense<0.000000e+00> : vector<2x500xf32>
    %82 = tpu.matmul %79, %81, %cst_49 {dimension_numbers = #tpu.dot_dimension_numbers<[1], [0], [0], [1], [0, 0, 1, 1], [], []>} : vector<2x336xbf16>, vector<336x500xbf16>, vector<2x500xf32> -> vector<2x500xf32>
    %83 = arith.addf %73, %82 : vector<2x500xf32>
    %c10_i32_50 = arith.constant 10 : i32
    %84 = arith.muli %arg0, %c10_i32_50 : i32
    %c8_i32 = arith.constant 8 : i32
    %85 = arith.addi %84, %c8_i32 : i32
    %86 = arith.index_cast %85 : i32 to index
    %c0_51 = arith.constant 0 : index
    %c0_52 = arith.constant 0 : index
    %87 = vector.load %arg9[%86, %c0_51, %c0_52] : memref<20x2x336xf32, #tpu.memory_space<vmem>>, vector<1x2x336xf32>
    %88 = vector.shape_cast %87 : vector<1x2x336xf32> to vector<2x336xf32>
    %89 = arith.truncf %88 : vector<2x336xf32> to vector<2x336xbf16>
    %c8 = arith.constant 8 : index
    %c0_53 = arith.constant 0 : index
    %c0_54 = arith.constant 0 : index
    %90 = vector.load %arg4[%c8, %c0_53, %c0_54] : memref<10x336x500xbf16, #tpu.memory_space<vmem>>, vector<1x336x500xbf16>
    %91 = vector.shape_cast %90 : vector<1x336x500xbf16> to vector<336x500xbf16>
    %cst_55 = arith.constant dense<0.000000e+00> : vector<2x500xf32>
    %92 = tpu.matmul %89, %91, %cst_55 {dimension_numbers = #tpu.dot_dimension_numbers<[1], [0], [0], [1], [0, 0, 1, 1], [], []>} : vector<2x336xbf16>, vector<336x500xbf16>, vector<2x500xf32> -> vector<2x500xf32>
    %93 = arith.addf %83, %92 : vector<2x500xf32>
    %c10_i32_56 = arith.constant 10 : i32
    %94 = arith.muli %arg0, %c10_i32_56 : i32
    %c9_i32 = arith.constant 9 : i32
    %95 = arith.addi %94, %c9_i32 : i32
    %96 = arith.index_cast %95 : i32 to index
    %c0_57 = arith.constant 0 : index
    %c0_58 = arith.constant 0 : index
    %97 = vector.load %arg9[%96, %c0_57, %c0_58] : memref<20x2x336xf32, #tpu.memory_space<vmem>>, vector<1x2x336xf32>
    %98 = vector.shape_cast %97 : vector<1x2x336xf32> to vector<2x336xf32>
    %99 = arith.truncf %98 : vector<2x336xf32> to vector<2x336xbf16>
    %c9 = arith.constant 9 : index
    %c0_59 = arith.constant 0 : index
    %c0_60 = arith.constant 0 : index
    %100 = vector.load %arg4[%c9, %c0_59, %c0_60] : memref<10x336x500xbf16, #tpu.memory_space<vmem>>, vector<1x336x500xbf16>
    %101 = vector.shape_cast %100 : vector<1x336x500xbf16> to vector<336x500xbf16>
    %cst_61 = arith.constant dense<0.000000e+00> : vector<2x500xf32>
    %102 = tpu.matmul %99, %101, %cst_61 {dimension_numbers = #tpu.dot_dimension_numbers<[1], [0], [0], [1], [0, 0, 1, 1], [], []>} : vector<2x336xbf16>, vector<336x500xbf16>, vector<2x500xf32> -> vector<2x500xf32>
    %103 = arith.addf %93, %102 : vector<2x500xf32>
    %c0_62 = arith.constant 0 : index
    %c0_63 = arith.constant 0 : index
    %104 = vector.load %arg10[%c0_62, %c0_63] : memref<2x500xf32, #tpu.memory_space<vmem>>, vector<2x500xf32>
    tpu.vector_store %arg10[%c0_62, %c0_63], %103 {strides = array<i32>} : memref<2x500xf32, #tpu.memory_space<vmem>>, vector<2x500xf32>,
    %c1_i32_64 = arith.constant 1 : i32
    %105 = arith.cmpi eq, %arg0, %c1_i32_64 : i32
    %106 = arith.extui %105 : i1 to i32
    %c0_i32_65 = arith.constant 0 : i32
    %107 = arith.cmpi ne, %106, %c0_i32_65 : i32
    scf.if %107 {
      %c0_66 = arith.constant 0 : index
      %c0_67 = arith.constant 0 : index
      %108 = vector.load %arg10[%c0_66, %c0_67] : memref<2x500xf32, #tpu.memory_space<vmem>>, vector<2x500xf32>
      %cst_68 = arith.constant 0.000000e+00 : f32
      %109 = vector.broadcast %cst_68 : f32 to vector<2x500xf32>
      %110 = arith.maximumf %108, %109 : vector<2x500xf32>
      %c0_69 = arith.constant 0 : index
      %c0_70 = arith.constant 0 : index
      %111 = vector.load %arg6[%c0_69, %c0_70] : memref<500x9xf32, #tpu.memory_space<vmem>>, vector<500x9xf32>
      %cst_71 = arith.constant dense<0.000000e+00> : vector<2x9xf32>
      %112 = tpu.matmul %110, %111, %cst_71 {dimension_numbers = #tpu.dot_dimension_numbers<[1], [0], [0], [1], [0, 0, 1, 1], [], []>} : vector<2x500xf32>, vector<500x9xf32>, vector<2x9xf32> -> vector<2x9xf32>
      %c0_72 = arith.constant 0 : index
      %c0_73 = arith.constant 0 : index
      %113 = vector.load %arg7[%c0_72, %c0_73] : memref<1x9xf32, #tpu.memory_space<vmem>>, vector<1x9xf32>
      %114 = vector.broadcast %113 : vector<1x9xf32> to vector<2x9xf32>
      %115 = arith.addf %112, %114 : vector<2x9xf32>
      %cst_74 = arith.constant dense<0xFF800000> : vector<2xf32>
      %116 = vector.multi_reduction <maximumf>, %115, %cst_74 [1] : vector<2x9xf32> to vector<2xf32>
      %117 = vector.shape_cast %116 : vector<2xf32> to vector<2x1xf32>
      %118 = vector.broadcast %117 : vector<2x1xf32> to vector<2x9xf32>
      %119 = arith.subf %115, %118 : vector<2x9xf32>
      %120 = math.exp %119 : vector<2x9xf32>
      %cst_75 = arith.constant dense<0.000000e+00> : vector<2xf32>
      %121 = vector.multi_reduction <add>, %120, %cst_75 [1] : vector<2x9xf32> to vector<2xf32>
      %122 = vector.shape_cast %121 : vector<2xf32> to vector<2x1xf32>
      %123 = math.log %122 : vector<2x1xf32>
      %124 = arith.addf %123, %117 : vector<2x1xf32>
      %125 = vector.broadcast %124 : vector<2x1xf32> to vector<2x9xf32>
      %126 = arith.subf %115, %125 : vector<2x9xf32>
      %c0_76 = arith.constant 0 : index
      %c0_77 = arith.constant 0 : index
      %127 = vector.load %arg8[%c0_76, %c0_77] : memref<2x9xf32, #tpu.memory_space<vmem>>, vector<2x9xf32>
      tpu.vector_store %arg8[%c0_76, %c0_77], %126 {strides = array<i32>} : memref<2x9xf32, #tpu.memory_space<vmem>>, vector<2x9xf32>,
    } else {
    }
    return
  }
  func.func @transform_0(%arg0: i32) -> (i32, i32, i32) {
    %c0_i32 = arith.constant 0 : i32
    %c0_i32_0 = arith.constant 0 : i32
    %c0_i32_1 = arith.constant 0 : i32
    %c0_i32_2 = arith.constant 0 : i32
    return %c0_i32, %c0_i32_0, %c0_i32_1 : i32, i32, i32
  }
  func.func @transform_1(%arg0: i32) -> (i32, i32) {
    %c0_i32 = arith.constant 0 : i32
    %c0_i32_0 = arith.constant 0 : i32
    %c0_i32_1 = arith.constant 0 : i32
    return %c0_i32, %c0_i32_0 : i32, i32
  }
  func.func @transform_2(%arg0: i32) -> (i32, i32) {
    %c0_i32 = arith.constant 0 : i32
    %c0_i32_0 = arith.constant 0 : i32
    %c0_i32_1 = arith.constant 0 : i32
    return %c0_i32, %c0_i32_0 : i32, i32
  }
  func.func @transform_3(%arg0: i32) -> (i32, i32, i32) {
    %c0_i32 = arith.constant 0 : i32
    %c0_i32_0 = arith.constant 0 : i32
    %c0_i32_1 = arith.constant 0 : i32
    return %arg0, %c0_i32, %c0_i32_0 : i32, i32, i32
  }
  func.func @transform_4(%arg0: i32) -> (i32, i32) {
    %c0_i32 = arith.constant 0 : i32
    %c0_i32_0 = arith.constant 0 : i32
    %c0_i32_1 = arith.constant 0 : i32
    return %c0_i32, %c0_i32_0 : i32, i32
  }
  func.func @transform_5(%arg0: i32) -> (i32, i32) {
    %c0_i32 = arith.constant 0 : i32
    %c0_i32_0 = arith.constant 0 : i32
    %c0_i32_1 = arith.constant 0 : i32
    return %c0_i32, %c0_i32_0 : i32, i32
  }
  func.func @transform_6(%arg0: i32) -> (i32, i32) {
    %c0_i32 = arith.constant 0 : i32
    %c0_i32_0 = arith.constant 0 : i32
    %c0_i32_1 = arith.constant 0 : i32
    return %c0_i32, %c0_i32_0 : i32, i32
  }
  func.func @transform_7(%arg0: i32) -> (i32, i32) {
    %c0_i32 = arith.constant 0 : i32
    %c0_i32_0 = arith.constant 0 : i32
    %c0_i32_1 = arith.constant 0 : i32
    return %c0_i32, %c0_i32_0 : i32, i32
  }
}

</mosaic_0001>

<bundles_post_ra>
// kernel: digit_forward.2
= control target key start
LH: loop header
LB: loop body
LE: loop exit
PB: predicated region body
PF: predicated region fallthrough
CT: control target
= control target key end

     0   :  { %vm151_vm0 = vcmask 1040384   ;;  %v1842_v3 = vmov 0.0   ;;  %v1843_v8 = vmov 0   ;;  %vm1844_vm1 = vmmov 1   ;;  %s2481_s0 = inlined_call_operand.vmem [shape: f32[25,4096], index: 0, kind: input, shape index: {}]   ;;  %s2482_s1 = inlined_call_operand.vmem [shape: f32[10,25], index: 1, kind: input, shape index: {}]   ;;  %s2483_s2 = inlined_call_operand.vmem [shape: f32[10,1], index: 2, kind: input, shape index: {}]   ;;  %s2484_s3 = inlined_call_operand.vmem [shape: f32[2,10,512], index: 3, kind: output, shape index: {}]  }
   0x1   :  { %v17_v0 = vld [vmem:[%s2481_s0 + $0x8] sm:$0xff]  ;;  %v19_v2 = vld [vmem:[%s2481_s0 + $0x18] sm:$0xff]  ;;  %312 = vmatprep.mubr.f32.mxu0 %v1842_v3  ;;  %389 = vmatprep.mubr.f32.mxu1 %v1842_v3  ;;  %v16_v6 = vld [vmem:[%s2481_s0] sm:$0xff]  ;;  %vm144_vm3 = vcmask 203776  }
   0x2   :  { %v49_v1 = vld [vmem:[%s2481_s0 + $0x108] sm:$0xff]  ;;  %v51_v5 = vld [vmem:[%s2481_s0 + $0x118] sm:$0xff]  ;;  %v48_v7 = vld [vmem:[%s2481_s0 + $0x100] sm:$0xff]  ;;  %1840 = vset.pattern.permute.xlu0 %v1843_v8  ;;  %1841 = vset.pattern.permute.xlu1 %v1843_v8 }
   0x3   :  { %v1677_v4 = vpack.c.bf16 %v49_v1, %v17_v0  ;;  %v1687_v9 = vpack.c.bf16 %v51_v5, %v19_v2  ;;  %v1679_v10 = vpack.c.bf16 %v48_v7, %v16_v6  ;;  %v18_v11 = vld [vmem:[%s2481_s0 + $0x10] sm:$0xff]  ;;  %v81_v13 = vld [vmem:[%s2481_s0 + $0x208] sm:$0xff]  ;;  %vm1898_vm2 = vmpackc.low %vm151_vm0, %vm1844_vm1 }
   0x4   :  { %v50_v12 = vld [vmem:[%s2481_s0 + $0x110] sm:$0xff]  ;;  %v113_v15 = vld [vmem:[%s2481_s0 + $0x308] sm:$0x1]  ;;  %v83_v17 = vld [vmem:[%s2481_s0 + $0x218] sm:$0xff] }
   0x5   :  { %1678 = vmatprep.subr.bf16.mxu0 %v1677_v4  ;;  %v1689_v14 = vpack.c.bf16 %v50_v12, %v18_v11  ;;  %1688 = vmatprep.subr.bf16.mxu1 %v1687_v9  ;;  %v1681_v18 = vpack.c.bf16 %v113_v15, %v81_v13  ;;  %v115_v19 = vld [vmem:[%s2481_s0 + $0x318] sm:$0x1]  ;;  %v80_v20 = vld [vmem:[%s2481_s0 + $0x200] sm:$0xff]  ;;  %v82_v24 = vld [vmem:[%s2481_s0 + $0x210] sm:$0xff] }
   0x6   :  { %1680 = vmatpush1.bf16.msra.mxu0 %v1679_v10  ;;  %v112_v21 = vld [vmem:[%s2481_s0 + $0x300] sm:$0x1]  ;;  %v1691_v22 = vpack.c.bf16 %v115_v19, %v83_v17  ;;  %v114_v25 = vld [vmem:[%s2481_s0 + $0x310] sm:$0x1]  ;;  %v21_v27 = vld [vmem:[%s2481_s0 + $0x28] sm:$0xff] }
   0x7   :  { %1690 = vmatpush1.bf16.msra.mxu1 %v1689_v14  ;;  %v1684_v23 = vpack.c.bf16 %v112_v21, %v80_v20  ;;  %1683 = vmatprep.subr.msk.bf16.mxu0 %vm1898_vm2, %v1681_v18  ;;  %v1694_v26 = vpack.c.bf16 %v114_v25, %v82_v24  ;;  %v53_v28 = vld [vmem:[%s2481_s0 + $0x128] sm:$0xff]  ;;  %v23_v29 = vld [vmem:[%s2481_s0 + $0x38] sm:$0xff]  ;;  %v20_v32 = vld [vmem:[%s2481_s0 + $0x20] sm:$0xff] }
   0x8   :  { %1693 = vmatprep.subr.msk.bf16.mxu1 %vm1898_vm2, %v1691_v22  ;;  %v1697_v30 = vpack.c.bf16 %v53_v28, %v21_v27  ;;  %v55_v31 = vld [vmem:[%s2481_s0 + $0x138] sm:$0xff]  ;;  %v52_v33 = vld [vmem:[%s2481_s0 + $0x120] sm:$0xff]  ;;  %v22_v37 = vld [vmem:[%s2481_s0 + $0x30] sm:$0xff] }
   0x9   :  { %v1947_v34 = vld [vmem:[%s2482_s1] sm:$0xff]  ;;  %v1707_v35 = vpack.c.bf16 %v55_v31, %v23_v29  ;;  %v1699_v36 = vpack.c.bf16 %v52_v33, %v20_v32  ;;  %v54_v38 = vld [vmem:[%s2481_s0 + $0x130] sm:$0xff]  ;;  %v85_v40 = vld [vmem:[%s2481_s0 + $0x228] sm:$0xff] }
   0xa   :  { %1686 = vmatpush1.bf16.msk.msra.mxu0 %vm1898_vm2, %v1684_v23  ;;  %v1709_v39 = vpack.c.bf16 %v54_v38, %v22_v37  ;;  %v117_v41 = vld [vmem:[%s2481_s0 + $0x328] sm:$0x1]  ;;  %v87_v42 = vld [vmem:[%s2481_s0 + $0x238] sm:$0xff]  ;;  %v84_v46 = vld [vmem:[%s2481_s0 + $0x220] sm:$0xff] }
   0xb   :  { %1696 = vmatpush1.bf16.msk.msra.mxu1 %vm1898_vm2, %v1694_v26  ;;  %1698 = vmatprep.subr.bf16.mxu0 %v1697_v30  ;;  %v1969_v43 = vld [vmem:[%s2482_s1 + $0x8] sm:$0x3]  ;;  %v1701_v44 = vpack.c.bf16 %v117_v41, %v85_v40  ;;  %v119_v45 = vld [vmem:[%s2481_s0 + $0x338] sm:$0x1]  ;;  %v116_v47 = vld [vmem:[%s2481_s0 + $0x320] sm:$0x1] }
   0xc   :  { %1708 = vmatprep.subr.bf16.mxu1 %v1707_v35  ;;  %v1711_v48 = vpack.c.bf16 %v119_v45, %v87_v42  ;;  %v86_v49 = vld [vmem:[%s2481_s0 + $0x230] sm:$0xff]  ;;  %v25_v51 = vld [vmem:[%s2481_s0 + $0x48] sm:$0xff]  ;;  %v1704_v52 = vpack.c.bf16 %v116_v47, %v84_v46  ;;  %v27_v54 = vld [vmem:[%s2481_s0 + $0x58] sm:$0xff] }
   0xd   :  { %1607 = vmatmul.mubr.msk.f32.vlgmr.msra.gmra.mrb[0].mxu0 %vm144_vm3, %v1947_v34  ;;  %v118_v50 = vld [vmem:[%s2481_s0 + $0x330] sm:$0x1]  ;;  %v57_v53 = vld [vmem:[%s2481_s0 + $0x148] sm:$0xff]  ;;  %v59_v55 = vld [vmem:[%s2481_s0 + $0x158] sm:$0xff] }
   0xe   :  { %1611 = vmatmul.mubr.msk.f32.vlgmr.msra.gmra.mrb[0].mxu1 %vm144_vm3, %v1947_v34  ;;  %1700 = vmatpush1.bf16.msra.mxu0 %v1699_v36  ;;  %v1714_v56 = vpack.c.bf16 %v118_v50, %v86_v49  ;;  %v24_v57 = vld [vmem:[%s2481_s0 + $0x40] sm:$0xff]  ;;  %v1717_v59 = vpack.c.bf16 %v57_v53, %v25_v51  ;;  %v26_v60 = vld [vmem:[%s2481_s0 + $0x50] sm:$0xff]  ;;  %v1727_v62 = vpack.c.bf16 %v59_v55, %v27_v54  ;;  %v89_v63 = vld [vmem:[%s2481_s0 + $0x248] sm:$0xff] }
   0xf   :  { %1710 = vmatpush1.bf16.msra.mxu1 %v1709_v39  ;;  %318 = vmatprep.mubr.f32.mxu0 %v1842_v3  ;;  %v56_v58 = vld [vmem:[%s2481_s0 + $0x140] sm:$0xff]  ;;  %v58_v61 = vld [vmem:[%s2481_s0 + $0x150] sm:$0xff]  ;;  %v121_v0 = vld [vmem:[%s2481_s0 + $0x348] sm:$0x1] }
  0x10   :  { %395 = vmatprep.mubr.f32.mxu1 %v1842_v3  ;;  %1703 = vmatprep.subr.msk.bf16.mxu0 %vm1898_vm2, %v1701_v44  ;;  %v1719_v1 = vpack.c.bf16 %v56_v58, %v24_v57  ;;  %v91_v2 = vld [vmem:[%s2481_s0 + $0x258] sm:$0xff]  ;;  %v1729_v5 = vpack.c.bf16 %v58_v61, %v26_v60  ;;  %v88_v6 = vld [vmem:[%s2481_s0 + $0x240] sm:$0xff]  ;;  %v1721_v8 = vpack.c.bf16 %v121_v0, %v89_v63  ;;  %v90_v9 = vld [vmem:[%s2481_s0 + $0x250] sm:$0xff] }
  0x11   :  { %1608 = vmatmul.mubr.msk.f32.gmra.mrb[2].mxu0 %vm144_vm3, %v1969_v43  ;;  %1713 = vmatprep.subr.msk.bf16.mxu1 %vm1898_vm2, %v1711_v48  ;;  %v123_v4 = vld [vmem:[%s2481_s0 + $0x358] sm:$0x1]  ;;  %v120_v7 = vld [vmem:[%s2481_s0 + $0x340] sm:$0x1]  ;;  %v122_v10 = vld [vmem:[%s2481_s0 + $0x350] sm:$0x1] }
  0x12   :  { %1612 = vmatmul.mubr.msk.f32.gmra.mrb[2].mxu1 %vm144_vm3, %v1969_v43  ;;  %1706 = vmatpush1.bf16.msk.msra.mxu0 %vm1898_vm2, %v1704_v52  ;;  %v1731_v11 = vpack.c.bf16 %v123_v4, %v91_v2  ;;  %v29_v12 = vld [vmem:[%s2481_s0 + $0x68] sm:$0xff]  ;;  %v1724_v14 = vpack.c.bf16 %v120_v7, %v88_v6  ;;  %v31_v15 = vld [vmem:[%s2481_s0 + $0x78] sm:$0xff]  ;;  %v1734_v18 = vpack.c.bf16 %v122_v10, %v90_v9  ;;  %v28_v19 = vld [vmem:[%s2481_s0 + $0x60] sm:$0xff] }
  0x13   :  { %1716 = vmatpush1.bf16.msk.msra.mxu1 %vm1898_vm2, %v1714_v56  ;;  %466 = vmatprep.mubr.f32.mxu0 %v1842_v3  ;;  %v61_v13 = vld [vmem:[%s2481_s0 + $0x168] sm:$0xff]  ;;  %v63_v17 = vld [vmem:[%s2481_s0 + $0x178] sm:$0xff]  ;;  %v60_v20 = vld [vmem:[%s2481_s0 + $0x160] sm:$0xff] }
  0x14   :  { %543 = vmatprep.mubr.f32.mxu1 %v1842_v3  ;;  %1718 = vmatprep.subr.bf16.mxu0 %v1717_v59  ;;  %v1737_v21 = vpack.c.bf16 %v61_v13, %v29_v12  ;;  %v30_v22 = vld [vmem:[%s2481_s0 + $0x70] sm:$0xff]  ;;  %v1747_v24 = vpack.c.bf16 %v63_v17, %v31_v15  ;;  %v93_v25 = vld [vmem:[%s2481_s0 + $0x268] sm:$0xff]  ;;  %v1739_v27 = vpack.c.bf16 %v60_v20, %v28_v19  ;;  %v95_v28 = vld [vmem:[%s2481_s0 + $0x278] sm:$0xff] }
  0x15   :  { %1615 = vmatmul.mubr.msk.f32.vlgmr.msra.gmra.mrb[4].mxu0 %vm144_vm3, %v1947_v34  ;;  %1728 = vmatprep.subr.bf16.mxu1 %v1727_v62  ;;  %v62_v23 = vld [vmem:[%s2481_s0 + $0x170] sm:$0xff]  ;;  %v125_v26 = vld [vmem:[%s2481_s0 + $0x368] sm:$0x1]  ;;  %v127_v29 = vld [vmem:[%s2481_s0 + $0x378] sm:$0x1] }
  0x16   :  { %1619 = vmatmul.mubr.msk.f32.vlgmr.msra.gmra.mrb[4].mxu1 %vm144_vm3, %v1947_v34  ;;  %1720 = vmatpush1.bf16.msra.mxu0 %v1719_v1  ;;  %v1749_v30 = vpack.c.bf16 %v62_v23, %v30_v22  ;;  %v92_v31 = vld [vmem:[%s2481_s0 + $0x260] sm:$0xff]  ;;  %v1741_v33 = vpack.c.bf16 %v125_v26, %v93_v25  ;;  %v94_v35 = vld [vmem:[%s2481_s0 + $0x270] sm:$0xff]  ;;  %v1751_v37 = vpack.c.bf16 %v127_v29, %v95_v28  ;;  %v33_v38 = vld [vmem:[%s2481_s0 + $0x88] sm:$0xff] }
  0x17   :  { %1730 = vmatpush1.bf16.msra.mxu1 %v1729_v5  ;;  %472 = vmatprep.mubr.f32.mxu0 %v1842_v3  ;;  %v124_v32 = vld [vmem:[%s2481_s0 + $0x360] sm:$0x1]  ;;  %v126_v36 = vld [vmem:[%s2481_s0 + $0x370] sm:$0x1]  ;;  %v65_v39 = vld [vmem:[%s2481_s0 + $0x188] sm:$0xff] }
  0x18   :  { %549 = vmatprep.mubr.f32.mxu1 %v1842_v3  ;;  %1723 = vmatprep.subr.msk.bf16.mxu0 %vm1898_vm2, %v1721_v8  ;;  %v1744_v40 = vpack.c.bf16 %v124_v32, %v92_v31  ;;  %v35_v41 = vld [vmem:[%s2481_s0 + $0x98] sm:$0xff]  ;;  %v1754_v44 = vpack.c.bf16 %v126_v36, %v94_v35  ;;  %v32_v45 = vld [vmem:[%s2481_s0 + $0x80] sm:$0xff]  ;;  %v1757_v47 = vpack.c.bf16 %v65_v39, %v33_v38  ;;  %v34_v48 = vld [vmem:[%s2481_s0 + $0x90] sm:$0xff] }
  0x19   :  { %1616 = vmatmul.mubr.msk.f32.gmra.mrb[6].mxu0 %vm144_vm3, %v1969_v43  ;;  %1733 = vmatprep.subr.msk.bf16.mxu1 %vm1898_vm2, %v1731_v11  ;;  %v67_v42 = vld [vmem:[%s2481_s0 + $0x198] sm:$0xff]  ;;  %v64_v46 = vld [vmem:[%s2481_s0 + $0x180] sm:$0xff]  ;;  %v66_v49 = vld [vmem:[%s2481_s0 + $0x190] sm:$0xff] }
  0x1a   :  { %1620 = vmatmul.mubr.msk.f32.gmra.mrb[6].mxu1 %vm144_vm3, %v1969_v43  ;;  %1726 = vmatpush1.bf16.msk.msra.mxu0 %vm1898_vm2, %v1724_v14  ;;  %v1767_v50 = vpack.c.bf16 %v67_v42, %v35_v41  ;;  %v97_v51 = vld [vmem:[%s2481_s0 + $0x288] sm:$0xff]  ;;  %v1759_v53 = vpack.c.bf16 %v64_v46, %v32_v45  ;;  %v99_v54 = vld [vmem:[%s2481_s0 + $0x298] sm:$0xff]  ;;  %v1769_v56 = vpack.c.bf16 %v66_v49, %v34_v48  ;;  %v96_v57 = vld [vmem:[%s2481_s0 + $0x280] sm:$0xff] }
  0x1b   :  { %1736 = vmatpush1.bf16.msk.msra.mxu1 %vm1898_vm2, %v1734_v18  ;;  %620 = vmatprep.mubr.f32.mxu0 %v1842_v3  ;;  %v129_v52 = vld [vmem:[%s2481_s0 + $0x388] sm:$0x1]  ;;  %v131_v55 = vld [vmem:[%s2481_s0 + $0x398] sm:$0x1]  ;;  %v128_v58 = vld [vmem:[%s2481_s0 + $0x380] sm:$0x1] }
  0x1c   :  { %697 = vmatprep.mubr.f32.mxu1 %v1842_v3  ;;  %1738 = vmatprep.subr.bf16.mxu0 %v1737_v21  ;;  %v1761_v59 = vpack.c.bf16 %v129_v52, %v97_v51  ;;  %v98_v60 = vld [vmem:[%s2481_s0 + $0x290] sm:$0xff]  ;;  %v1771_v62 = vpack.c.bf16 %v131_v55, %v99_v54  ;;  %v37_v63 = vld [vmem:[%s2481_s0 + $0xa8] sm:$0xff]  ;;  %v1764_v1 = vpack.c.bf16 %v128_v58, %v96_v57  ;;  %v39_v2 = vld [vmem:[%s2481_s0 + $0xb8] sm:$0xff] }
  0x1d   :  { %1623 = vmatmul.mubr.msk.f32.vlgmr.msra.gmra.mrb[8].mxu0 %vm144_vm3, %v1947_v34  ;;  %1748 = vmatprep.subr.bf16.mxu1 %v1747_v24  ;;  %v130_v61 = vld [vmem:[%s2481_s0 + $0x390] sm:$0x1]  ;;  %v69_v0 = vld [vmem:[%s2481_s0 + $0x1a8] sm:$0xff]  ;;  %v71_v4 = vld [vmem:[%s2481_s0 + $0x1b8] sm:$0xff] }
  0x1e   :  { %1627 = vmatmul.mubr.msk.f32.vlgmr.msra.gmra.mrb[8].mxu1 %vm144_vm3, %v1947_v34  ;;  %1740 = vmatpush1.bf16.msra.mxu0 %v1739_v27  ;;  %v1774_v5 = vpack.c.bf16 %v130_v61, %v98_v60  ;;  %v36_v6 = vld [vmem:[%s2481_s0 + $0xa0] sm:$0xff]  ;;  %v1777_v8 = vpack.c.bf16 %v69_v0, %v37_v63  ;;  %v38_v9 = vld [vmem:[%s2481_s0 + $0xb0] sm:$0xff]  ;;  %v1787_v11 = vpack.c.bf16 %v71_v4, %v39_v2  ;;  %v101_v12 = vld [vmem:[%s2481_s0 + $0x2a8] sm:$0xff] }
  0x1f   :  { %1750 = vmatpush1.bf16.msra.mxu1 %v1749_v30  ;;  %626 = vmatprep.mubr.f32.mxu0 %v1842_v3  ;;  %v68_v7 = vld [vmem:[%s2481_s0 + $0x1a0] sm:$0xff]  ;;  %v70_v10 = vld [vmem:[%s2481_s0 + $0x1b0] sm:$0xff]  ;;  %v133_v13 = vld [vmem:[%s2481_s0 + $0x3a8] sm:$0x1] }
  0x20   :  { %703 = vmatprep.mubr.f32.mxu1 %v1842_v3  ;;  %1743 = vmatprep.subr.msk.bf16.mxu0 %vm1898_vm2, %v1741_v33  ;;  %v1779_v14 = vpack.c.bf16 %v68_v7, %v36_v6  ;;  %v103_v15 = vld [vmem:[%s2481_s0 + $0x2b8] sm:$0xff]  ;;  %v1789_v18 = vpack.c.bf16 %v70_v10, %v38_v9  ;;  %v100_v19 = vld [vmem:[%s2481_s0 + $0x2a0] sm:$0xff]  ;;  %v1781_v21 = vpack.c.bf16 %v133_v13, %v101_v12  ;;  %v102_v22 = vld [vmem:[%s2481_s0 + $0x2b0] sm:$0xff] }
  0x21   :  { %1624 = vmatmul.mubr.msk.f32.gmra.mrb[10].mxu0 %vm144_vm3, %v1969_v43  ;;  %1753 = vmatprep.subr.msk.bf16.mxu1 %vm1898_vm2, %v1751_v37  ;;  %v135_v17 = vld [vmem:[%s2481_s0 + $0x3b8] sm:$0x1]  ;;  %v132_v20 = vld [vmem:[%s2481_s0 + $0x3a0] sm:$0x1]  ;;  %v134_v23 = vld [vmem:[%s2481_s0 + $0x3b0] sm:$0x1] }
  0x22   :  { %1628 = vmatmul.mubr.msk.f32.gmra.mrb[10].mxu1 %vm144_vm3, %v1969_v43  ;;  %1746 = vmatpush1.bf16.msk.msra.mxu0 %vm1898_vm2, %v1744_v40  ;;  %v1791_v24 = vpack.c.bf16 %v135_v17, %v103_v15  ;;  %v41_v25 = vld [vmem:[%s2481_s0 + $0xc8] sm:$0xff]  ;;  %v1784_v27 = vpack.c.bf16 %v132_v20, %v100_v19  ;;  %v43_v28 = vld [vmem:[%s2481_s0 + $0xd8] sm:$0xff]  ;;  %v1794_v30 = vpack.c.bf16 %v134_v23, %v102_v22  ;;  %v40_v31 = vld [vmem:[%s2481_s0 + $0xc0] sm:$0xff] }
  0x23   :  { %1756 = vmatpush1.bf16.msk.msra.mxu1 %vm1898_vm2, %v1754_v44  ;;  %774 = vmatprep.mubr.f32.mxu0 %v1842_v3  ;;  %v73_v26 = vld [vmem:[%s2481_s0 + $0x1c8] sm:$0xff]  ;;  %v75_v29 = vld [vmem:[%s2481_s0 + $0x1d8] sm:$0xff]  ;;  %v72_v32 = vld [vmem:[%s2481_s0 + $0x1c0] sm:$0xff] }
  0x24   :  { %851 = vmatprep.mubr.f32.mxu1 %v1842_v3  ;;  %1758 = vmatprep.subr.bf16.mxu0 %v1757_v47  ;;  %v1797_v33 = vpack.c.bf16 %v73_v26, %v41_v25  ;;  %v42_v35 = vld [vmem:[%s2481_s0 + $0xd0] sm:$0xff]  ;;  %v1807_v37 = vpack.c.bf16 %v75_v29, %v43_v28  ;;  %v105_v38 = vld [vmem:[%s2481_s0 + $0x2c8] sm:$0xff]  ;;  %v1799_v40 = vpack.c.bf16 %v72_v32, %v40_v31  ;;  %v107_v41 = vld [vmem:[%s2481_s0 + $0x2d8] sm:$0xff] }
  0x25   :  { %1631 = vmatmul.mubr.msk.f32.vlgmr.msra.gmra.mrb[12].mxu0 %vm144_vm3, %v1947_v34  ;;  %1768 = vmatprep.subr.bf16.mxu1 %v1767_v50  ;;  %v74_v36 = vld [vmem:[%s2481_s0 + $0x1d0] sm:$0xff]  ;;  %v137_v39 = vld [vmem:[%s2481_s0 + $0x3c8] sm:$0x1]  ;;  %v139_v42 = vld [vmem:[%s2481_s0 + $0x3d8] sm:$0x1] }
  0x26   :  { %1635 = vmatmul.mubr.msk.f32.vlgmr.msra.gmra.mrb[12].mxu1 %vm144_vm3, %v1947_v34  ;;  %1760 = vmatpush1.bf16.msra.mxu0 %v1759_v53  ;;  %v1809_v44 = vpack.c.bf16 %v74_v36, %v42_v35  ;;  %v104_v45 = vld [vmem:[%s2481_s0 + $0x2c0] sm:$0xff]  ;;  %v1801_v47 = vpack.c.bf16 %v137_v39, %v105_v38  ;;  %v106_v48 = vld [vmem:[%s2481_s0 + $0x2d0] sm:$0xff]  ;;  %v1811_v50 = vpack.c.bf16 %v139_v42, %v107_v41  ;;  %v45_v51 = vld [vmem:[%s2481_s0 + $0xe8] sm:$0xff] }
  0x27   :  { %1770 = vmatpush1.bf16.msra.mxu1 %v1769_v56  ;;  %780 = vmatprep.mubr.f32.mxu0 %v1842_v3  ;;  %v136_v46 = vld [vmem:[%s2481_s0 + $0x3c0] sm:$0x1]  ;;  %v138_v49 = vld [vmem:[%s2481_s0 + $0x3d0] sm:$0x1]  ;;  %v77_v52 = vld [vmem:[%s2481_s0 + $0x1e8] sm:$0xff] }
  0x28   :  { %857 = vmatprep.mubr.f32.mxu1 %v1842_v3  ;;  %1763 = vmatprep.subr.msk.bf16.mxu0 %vm1898_vm2, %v1761_v59  ;;  %v1804_v53 = vpack.c.bf16 %v136_v46, %v104_v45  ;;  %v47_v54 = vld [vmem:[%s2481_s0 + $0xf8] sm:$0xff]  ;;  %v1814_v56 = vpack.c.bf16 %v138_v49, %v106_v48  ;;  %v44_v57 = vld [vmem:[%s2481_s0 + $0xe0] sm:$0xff]  ;;  %v1817_v59 = vpack.c.bf16 %v77_v52, %v45_v51  ;;  %v46_v60 = vld [vmem:[%s2481_s0 + $0xf0] sm:$0xff] }
  0x29   :  { %1632 = vmatmul.mubr.msk.f32.gmra.mrb[14].mxu0 %vm144_vm3, %v1969_v43  ;;  %1773 = vmatprep.subr.msk.bf16.mxu1 %vm1898_vm2, %v1771_v62  ;;  %v79_v55 = vld [vmem:[%s2481_s0 + $0x1f8] sm:$0xff]  ;;  %v76_v58 = vld [vmem:[%s2481_s0 + $0x1e0] sm:$0xff]  ;;  %v78_v61 = vld [vmem:[%s2481_s0 + $0x1f0] sm:$0xff] }
  0x2a   :  { %1636 = vmatmul.mubr.msk.f32.gmra.mrb[14].mxu1 %vm144_vm3, %v1969_v43  ;;  %1766 = vmatpush1.bf16.msk.msra.mxu0 %vm1898_vm2, %v1764_v1  ;;  %v1827_v62 = vpack.c.bf16 %v79_v55, %v47_v54  ;;  %v109_v63 = vld [vmem:[%s2481_s0 + $0x2e8] sm:$0xff]  ;;  %v1819_v1 = vpack.c.bf16 %v76_v58, %v44_v57  ;;  %v111_v2 = vld [vmem:[%s2481_s0 + $0x2f8] sm:$0xff]  ;;  %v108_v6 = vld [vmem:[%s2481_s0 + $0x2e0] sm:$0xff] }
  0x2b   :  { %1776 = vmatpush1.bf16.msk.msra.mxu1 %vm1898_vm2, %v1774_v5  ;;  %928 = vmatprep.mubr.f32.mxu0 %v1842_v3  ;;  %v141_v0 = vld [vmem:[%s2481_s0 + $0x3e8] sm:$0x1]  ;;  %v143_v4 = vld [vmem:[%s2481_s0 + $0x3f8] sm:$0x1]  ;;  %v1829_v5 = vpack.c.bf16 %v78_v61, %v46_v60  ;;  %v140_v7 = vld [vmem:[%s2481_s0 + $0x3e0] sm:$0x1] }
  0x2c   :  { %1005 = vmatprep.mubr.f32.mxu1 %v1842_v3  ;;  %1778 = vmatprep.subr.bf16.mxu0 %v1777_v8  ;;  %v1821_v8 = vpack.c.bf16 %v141_v0, %v109_v63  ;;  %v110_v9 = vld [vmem:[%s2481_s0 + $0x2f0] sm:$0xff]  ;;  %v1824_v12 = vpack.c.bf16 %v140_v7, %v108_v6  ;;  %v1505_v15 = vld [vmem:[%s2483_s2 + $0x8] sm:$0x3] }
  0x2d   :  { %1639 = vmatmul.mubr.msk.f32.vlgmr.msra.gmra.mrb[16].mxu0 %vm144_vm3, %v1947_v34  ;;  %1788 = vmatprep.subr.bf16.mxu1 %v1787_v11  ;;  %v142_v10 = vld [vmem:[%s2481_s0 + $0x3f0] sm:$0x1]  ;;  %v1831_v11 = vpack.c.bf16 %v143_v4, %v111_v2  ;;  %v1565_v16 = vld [vmem:[%s2483_s2 + $0x8] sm:$0x3] }
  0x2e   :  { %1643 = vmatmul.mubr.msk.f32.vlgmr.msra.gmra.mrb[16].mxu1 %vm144_vm3, %v1947_v34  ;;  %1780 = vmatpush1.bf16.msra.mxu0 %v1779_v14  ;;  %v1834_v13 = vpack.c.bf16 %v142_v10, %v110_v9  ;;  %v1504_v14 = vld [vmem:[%s2483_s2] sm:$0xff] }
  0x2f   :  { %1790 = vmatpush1.bf16.msra.mxu1 %v1789_v18  ;;  %934 = vmatprep.mubr.f32.mxu0 %v1842_v3 }
  0x30   :  { %1011 = vmatprep.mubr.f32.mxu1 %v1842_v3  ;;  %1783 = vmatprep.subr.msk.bf16.mxu0 %vm1898_vm2, %v1781_v21 }
  0x31   :  { %1640 = vmatmul.mubr.msk.f32.gmra.mrb[18].mxu0 %vm144_vm3, %v1969_v43  ;;  %1793 = vmatprep.subr.msk.bf16.mxu1 %vm1898_vm2, %v1791_v24 }
  0x32   :  { %1644 = vmatmul.mubr.msk.f32.gmra.mrb[18].mxu1 %vm144_vm3, %v1969_v43  ;;  %1786 = vmatpush1.bf16.msk.msra.mxu0 %vm1898_vm2, %v1784_v27 }
  0x33   :  { %1796 = vmatpush1.bf16.msk.msra.mxu1 %vm1898_vm2, %v1794_v30  ;;  %1082 = vmatprep.mubr.f32.mxu0 %v1842_v3 }
  0x34   :  { %1159 = vmatprep.mubr.f32.mxu1 %v1842_v3  ;;  %1798 = vmatprep.subr.bf16.mxu0 %v1797_v33 }
  0x35   :  { %1647 = vmatmul.mubr.msk.f32.vlgmr.msra.gmra.mrb[20].mxu0 %vm144_vm3, %v1947_v34  ;;  %1808 = vmatprep.subr.bf16.mxu1 %v1807_v37 }
  0x36   :  { %1651 = vmatmul.mubr.msk.f32.vlgmr.msra.gmra.mrb[20].mxu1 %vm144_vm3, %v1947_v34  ;;  %1800 = vmatpush1.bf16.msra.mxu0 %v1799_v40 }
  0x37   :  { %1810 = vmatpush1.bf16.msra.mxu1 %v1809_v44  ;;  %1088 = vmatprep.mubr.f32.mxu0 %v1842_v3 }
  0x38   :  { %1165 = vmatprep.mubr.f32.mxu1 %v1842_v3  ;;  %1803 = vmatprep.subr.msk.bf16.mxu0 %vm1898_vm2, %v1801_v47 }
  0x39   :  { %1648 = vmatmul.mubr.msk.f32.gmra.mrb[22].mxu0 %vm144_vm3, %v1969_v43  ;;  %1813 = vmatprep.subr.msk.bf16.mxu1 %vm1898_vm2, %v1811_v50 }
  0x3a   :  { %1652 = vmatmul.mubr.msk.f32.gmra.mrb[22].mxu1 %vm144_vm3, %v1969_v43  ;;  %1806 = vmatpush1.bf16.msk.msra.mxu0 %vm1898_vm2, %v1804_v53 }
  0x3b   :  { %1816 = vmatpush1.bf16.msk.msra.mxu1 %vm1898_vm2, %v1814_v56  ;;  %1236 = vmatprep.mubr.f32.mxu0 %v1842_v3 }
  0x3c   :  { %1313 = vmatprep.mubr.f32.mxu1 %v1842_v3  ;;  %1818 = vmatprep.subr.bf16.mxu0 %v1817_v59 }
  0x3d   :  { %1655 = vmatmul.mubr.msk.f32.vlgmr.msra.gmra.mrb[24].mxu0 %vm144_vm3, %v1947_v34  ;;  %1828 = vmatprep.subr.bf16.mxu1 %v1827_v62 }
  0x3e   :  { %1659 = vmatmul.mubr.msk.f32.vlgmr.msra.gmra.mrb[24].mxu1 %vm144_vm3, %v1947_v34  ;;  %1820 = vmatpush1.bf16.msra.mxu0 %v1819_v1 }
  0x3f   :  { %1830 = vmatpush1.bf16.msra.mxu1 %v1829_v5  ;;  %1242 = vmatprep.mubr.f32.mxu0 %v1842_v3 }
  0x40   :  { %1319 = vmatprep.mubr.f32.mxu1 %v1842_v3  ;;  %1823 = vmatprep.subr.msk.bf16.mxu0 %vm1898_vm2, %v1821_v8 }
  0x41   :  { %1656 = vmatmul.mubr.msk.f32.gmra.mrb[26].mxu0 %vm144_vm3, %v1969_v43  ;;  %1833 = vmatprep.subr.msk.bf16.mxu1 %vm1898_vm2, %v1831_v11 }
  0x42   :  { %1660 = vmatmul.mubr.msk.f32.gmra.mrb[26].mxu1 %vm144_vm3, %v1969_v43  ;;  %1826 = vmatpush1.bf16.msk.msra.mxu0 %vm1898_vm2, %v1824_v12 }
  0x43   :  { %1836 = vmatpush1.bf16.msk.msra.mxu1 %vm1898_vm2, %v1834_v13  ;;  %1390 = vmatprep.mubr.f32.mxu0 %v1842_v3 }
  0x44   :  { %1467 = vmatprep.mubr.f32.mxu1 %v1842_v3  ;;  %1508 = vperm.xlu0 %1840, %v1504_v14  }
  0x45   :  { %1663 = vmatmul.mubr.msk.f32.vlgmr.msra.gmra.mrb[28].mxu0 %vm144_vm3, %v1947_v34  ;;  %1568 = vperm.xlu1 %1841, %v1504_v14  }
  0x46   :  { %1667 = vmatmul.mubr.msk.f32.vlgmr.msra.gmra.mrb[28].mxu1 %vm144_vm3, %v1947_v34  ;;  %1396 = vmatprep.mubr.f32.mxu0 %v1842_v3 }
  0x47   :  { %1473 = vmatprep.mubr.f32.mxu1 %v1842_v3 }
  0x48   :  { %1513 = vperm.xlu0 %1840, %v1505_v15  }
  0x49   :  { %1664 = vmatmul.mubr.msk.f32.gmra.mrb[30].mxu0 %vm144_vm3, %v1969_v43  ;;  %1573 = vperm.xlu1 %1841, %v1565_v16  }
  0x4a   :  { %1668 = vmatmul.mubr.msk.f32.gmra.mrb[30].mxu1 %vm144_vm3, %v1969_v43 }
  0xc3   :  { %v1509_v49 = vpop.permute.xlu0 %1508 }
  0xc7   :  { %v1514_v8 = vpop.permute.xlu0 %1513 }
  0xe0   :  { %v314_v17 = vpop.f32.mrb[0].mxu0 }
  0xe1   :  { %v391_v18 = vpop.f32.mrb[0].mxu1  ;;  %v316_v19 = vpop.f32.mrb[1].mxu0 }
  0xe2   :  { %v393_v34 = vpop.f32.mrb[1].mxu1 }
  0xe4   :  { %v320_v20 = vpop.f32.mrb[2].mxu0 }
  0xe5   :  { %v397_v21 = vpop.f32.mrb[2].mxu1  ;;  %v322_v22 = vpop.f32.mrb[3].mxu0 }
  0xe6   :  { %v399_v23 = vpop.f32.mrb[3].mxu1 }
  0xe8   :  { %v468_v24 = vpop.f32.mrb[4].mxu0 }
  0xe9   :  { %v1480_v25 = vmax.f32 %v314_v17, %v468_v24  ;;  %v545_v26 = vpop.f32.mrb[4].mxu1  ;;  %v470_v3 = vpop.f32.mrb[5].mxu0 }
  0xea   :  { %v1482_v27 = vmax.f32 %v391_v18, %v545_v26  ;;  %v1481_v28 = vmax.f32 %v316_v19, %v470_v3  ;;  %v547_v29 = vpop.f32.mrb[5].mxu1 }
  0xeb   :  { %v1483_v30 = vmax.f32 %v393_v34, %v547_v29 }
  0xec   :  { %v474_v31 = vpop.f32.mrb[6].mxu0 }
  0xed   :  { %v1484_v32 = vmax.f32 %v320_v20, %v474_v31  ;;  %v551_v33 = vpop.f32.mrb[6].mxu1  ;;  %v476_v43 = vpop.f32.mrb[7].mxu0 }
  0xee   :  { %v1486_v35 = vmax.f32 %v397_v21, %v551_v33  ;;  %v1485_v36 = vmax.f32 %v322_v22, %v476_v43  ;;  %v553_v37 = vpop.f32.mrb[7].mxu1 }
  0xef   :  { %v1487_v38 = vmax.f32 %v399_v23, %v553_v37 }
  0xf0   :  { %v622_v39 = vpop.f32.mrb[8].mxu0 }
  0xf1   :  { %v699_v40 = vpop.f32.mrb[8].mxu1  ;;  %v624_v41 = vpop.f32.mrb[9].mxu0 }
  0xf2   :  { %v701_v42 = vpop.f32.mrb[9].mxu1 }
  0xf4   :  { %v628_v44 = vpop.f32.mrb[10].mxu0 }
  0xf5   :  { %v705_v45 = vpop.f32.mrb[10].mxu1  ;;  %v630_v46 = vpop.f32.mrb[11].mxu0 }
  0xf6   :  { %v707_v47 = vpop.f32.mrb[11].mxu1 }
  0xf8   :  { %v776_v48 = vpop.f32.mrb[12].mxu0 }
  0xf9   :  { %v1488_v50 = vmax.f32 %v622_v39, %v776_v48  ;;  %v853_v51 = vpop.f32.mrb[12].mxu1  ;;  %v778_v52 = vpop.f32.mrb[13].mxu0 }
  0xfa   :  { %v1490_v53 = vmax.f32 %v699_v40, %v853_v51  ;;  %v1489_v54 = vmax.f32 %v624_v41, %v778_v52  ;;  %v855_v55 = vpop.f32.mrb[13].mxu1 }
  0xfb   :  { %v1496_v56 = vmax.f32 %v1480_v25, %v1488_v50  ;;  %v1491_v57 = vmax.f32 %v701_v42, %v855_v55 }
  0xfc   :  { %v1498_v58 = vmax.f32 %v1482_v27, %v1490_v53  ;;  %v1497_v59 = vmax.f32 %v1481_v28, %v1489_v54  ;;  %v782_v60 = vpop.f32.mrb[14].mxu0 }
  0xfd   :  { %v1499_v61 = vmax.f32 %v1483_v30, %v1491_v57  ;;  %v1516_v62 = vadd.f32 %v1509_v49, %v1496_v56  ;;  %v1492_v63 = vmax.f32 %v628_v44, %v782_v60  ;;  %v859_v0 = vpop.f32.mrb[14].mxu1  ;;  %v784_v1 = vpop.f32.mrb[15].mxu0 }
  0xfe   :  { %v1517_v2 = vadd.f32 %v1509_v49, %v1497_v59  ;;  %v1518_v4 = vadd.f32 %v1509_v49, %v1498_v58  ;;  %v1494_v5 = vmax.f32 %v705_v45, %v859_v0  ;;  %v1493_v6 = vmax.f32 %v630_v46, %v784_v1  ;;  %v861_v7 = vpop.f32.mrb[15].mxu1  ;;  %v1569_v1 = vpop.permute.xlu1 %1568 }
  0xff   :  { %v1519_v9 = vadd.f32 %v1509_v49, %v1499_v61  ;;  %v1524_v10 = vmax.f32 %v1516_v62, 0.0  ;;  %v1500_v11 = vmax.f32 %v1484_v32, %v1492_v63  ;;  %v1495_v12 = vmax.f32 %v707_v47, %v861_v7 }
 0x100   :  { %v1525_v13 = vmax.f32 %v1517_v2, 0.0  ;;  %v1526_v14 = vmax.f32 %v1518_v4, 0.0  ;;  %v1502_v15 = vmax.f32 %v1486_v35, %v1494_v5  ;;  %v1501_v16 = vmax.f32 %v1485_v36, %v1493_v6  ;;  %v930_v17 = vpop.f32.mrb[16].mxu0 }
 0x101   :  { %v1527_v18 = vmax.f32 %v1519_v9, 0.0  ;;  %1532 = vst [vmem:[%s2484_s3] sm:$0xff] %v1524_v10  ;;  %v1503_v19 = vmax.f32 %v1487_v38, %v1495_v12  ;;  %v1520_v34 = vadd.f32 %v1514_v8, %v1500_v11  ;;  %v1007_v20 = vpop.f32.mrb[16].mxu1  ;;  %v932_v21 = vpop.f32.mrb[17].mxu0 }
 0x102   :  { %1533 = vst [vmem:[%s2484_s3 + $0x8] sm:$0xff] %v1525_v13  ;;  %1534 = vst [vmem:[%s2484_s3 + $0x10] sm:$0xff] %v1526_v14  ;;  %v1521_v22 = vadd.f32 %v1514_v8, %v1501_v16  ;;  %v1522_v23 = vadd.f32 %v1514_v8, %v1502_v15  ;;  %v1009_v24 = vpop.f32.mrb[17].mxu1 }
 0x103   :  { %1535 = vst [vmem:[%s2484_s3 + $0x18] sm:$0xff] %v1527_v18  ;;  %v1523_v25 = vadd.f32 %v1514_v8, %v1503_v19  ;;  %v1528_v26 = vmax.f32 %v1520_v34, 0.0 }
 0x104   :  { %v1529_v3 = vmax.f32 %v1521_v22, 0.0  ;;  %v1530_v27 = vmax.f32 %v1522_v23, 0.0  ;;  %v936_v28 = vpop.f32.mrb[18].mxu0 }
 0x105   :  { %v1531_v29 = vmax.f32 %v1523_v25, 0.0  ;;  %1536 = vst [vmem:[%s2484_s3 + $0x20] sm:$0x3] %v1528_v26  ;;  %v1013_v30 = vpop.f32.mrb[18].mxu1  ;;  %v938_v31 = vpop.f32.mrb[19].mxu0 }
 0x106   :  { %1537 = vst [vmem:[%s2484_s3 + $0x28] sm:$0x3] %v1529_v3  ;;  %1538 = vst [vmem:[%s2484_s3 + $0x30] sm:$0x3] %v1530_v27  ;;  %v1015_v32 = vpop.f32.mrb[19].mxu1  ;;  %v1574_v25 = vpop.permute.xlu1 %1573 }
 0x107   :  { %1539 = vst [vmem:[%s2484_s3 + $0x38] sm:$0x3] %v1531_v29 }
 0x108   :  { %v1084_v33 = vpop.f32.mrb[20].mxu0 }
 0x109   :  { %v1540_v43 = vmax.f32 %v930_v17, %v1084_v33  ;;  %v1161_v35 = vpop.f32.mrb[20].mxu1  ;;  %v1086_v36 = vpop.f32.mrb[21].mxu0 }
 0x10a   :  { %v1542_v37 = vmax.f32 %v1007_v20, %v1161_v35  ;;  %v1541_v38 = vmax.f32 %v932_v21, %v1086_v36  ;;  %v1163_v39 = vpop.f32.mrb[21].mxu1 }
 0x10b   :  { %v1543_v40 = vmax.f32 %v1009_v24, %v1163_v39 }
 0x10c   :  { %v1090_v41 = vpop.f32.mrb[22].mxu0 }
 0x10d   :  { %v1544_v42 = vmax.f32 %v936_v28, %v1090_v41  ;;  %v1167_v44 = vpop.f32.mrb[22].mxu1  ;;  %v1092_v45 = vpop.f32.mrb[23].mxu0 }
 0x10e   :  { %v1546_v46 = vmax.f32 %v1013_v30, %v1167_v44  ;;  %v1545_v47 = vmax.f32 %v938_v31, %v1092_v45  ;;  %v1169_v48 = vpop.f32.mrb[23].mxu1 }
 0x10f   :  { %v1547_v49 = vmax.f32 %v1015_v32, %v1169_v48 }
 0x110   :  { %v1238_v50 = vpop.f32.mrb[24].mxu0 }
 0x111   :  { %v1315_v51 = vpop.f32.mrb[24].mxu1  ;;  %v1240_v52 = vpop.f32.mrb[25].mxu0 }
 0x112   :  { %v1317_v53 = vpop.f32.mrb[25].mxu1 }
 0x114   :  { %v1244_v54 = vpop.f32.mrb[26].mxu0 }
 0x115   :  { %v1321_v55 = vpop.f32.mrb[26].mxu1  ;;  %v1246_v56 = vpop.f32.mrb[27].mxu0 }
 0x116   :  { %v1323_v57 = vpop.f32.mrb[27].mxu1 }
 0x118   :  { %v1392_v58 = vpop.f32.mrb[28].mxu0 }
 0x119   :  { %v1548_v59 = vmax.f32 %v1238_v50, %v1392_v58  ;;  %v1469_v60 = vpop.f32.mrb[28].mxu1  ;;  %v1394_v61 = vpop.f32.mrb[29].mxu0 }
 0x11a   :  { %v1550_v62 = vmax.f32 %v1315_v51, %v1469_v60  ;;  %v1549_v63 = vmax.f32 %v1240_v52, %v1394_v61  ;;  %v1471_v0 = vpop.f32.mrb[29].mxu1 }
 0x11b   :  { %v1556_v2 = vmax.f32 %v1540_v43, %v1548_v59  ;;  %v1551_v4 = vmax.f32 %v1317_v53, %v1471_v0 }
 0x11c   :  { %v1558_v5 = vmax.f32 %v1542_v37, %v1550_v62  ;;  %v1557_v6 = vmax.f32 %v1541_v38, %v1549_v63  ;;  %v1398_v7 = vpop.f32.mrb[30].mxu0 }
 0x11d   :  { %v1559_v8 = vmax.f32 %v1543_v40, %v1551_v4  ;;  %v1576_v9 = vadd.f32 %v1569_v1, %v1556_v2  ;;  %v1552_v10 = vmax.f32 %v1244_v54, %v1398_v7  ;;  %v1475_v11 = vpop.f32.mrb[30].mxu1  ;;  %v1400_v12 = vpop.f32.mrb[31].mxu0 }
 0x11e   :  { %v1577_v13 = vadd.f32 %v1569_v1, %v1557_v6  ;;  %v1578_v14 = vadd.f32 %v1569_v1, %v1558_v5  ;;  %v1554_v15 = vmax.f32 %v1321_v55, %v1475_v11  ;;  %v1553_v16 = vmax.f32 %v1246_v56, %v1400_v12  ;;  %v1477_v17 = vpop.f32.mrb[31].mxu1 }
 0x11f   :  { %v1579_v18 = vadd.f32 %v1569_v1, %v1559_v8  ;;  %v1584_v19 = vmax.f32 %v1576_v9, 0.0  ;;  %v1560_v34 = vmax.f32 %v1544_v42, %v1552_v10  ;;  %v1555_v20 = vmax.f32 %v1323_v57, %v1477_v17 }
 0x120   :  { %v1585_v21 = vmax.f32 %v1577_v13, 0.0  ;;  %v1586_v22 = vmax.f32 %v1578_v14, 0.0  ;;  %v1562_v23 = vmax.f32 %v1546_v46, %v1554_v15  ;;  %v1561_v24 = vmax.f32 %v1545_v47, %v1553_v16 }
 0x121   :  { %v1587_v26 = vmax.f32 %v1579_v18, 0.0  ;;  %1669 = vst [vmem:[%s2484_s3 + $0x40] sm:$0xff] %v1584_v19  ;;  %v1563_v3 = vmax.f32 %v1547_v49, %v1555_v20  ;;  %v1580_v27 = vadd.f32 %v1574_v25, %v1560_v34 }
 0x122   :  { %1670 = vst [vmem:[%s2484_s3 + $0x48] sm:$0xff] %v1585_v21  ;;  %1671 = vst [vmem:[%s2484_s3 + $0x50] sm:$0xff] %v1586_v22  ;;  %v1581_v28 = vadd.f32 %v1574_v25, %v1561_v24  ;;  %v1582_v29 = vadd.f32 %v1574_v25, %v1562_v23 }
 0x123   :  { %1672 = vst [vmem:[%s2484_s3 + $0x58] sm:$0xff] %v1587_v26  ;;  %v1583_v30 = vadd.f32 %v1574_v25, %v1563_v3  ;;  %v1588_v31 = vmax.f32 %v1580_v27, 0.0 }
 0x124   :  { %v1589_v32 = vmax.f32 %v1581_v28, 0.0  ;;  %v1590_v33 = vmax.f32 %v1582_v29, 0.0 }
 0x125   :  { %v1591_v43 = vmax.f32 %v1583_v30, 0.0  ;;  %1673 = vst [vmem:[%s2484_s3 + $0x60] sm:$0x3] %v1588_v31 }
 0x126   :  { %1674 = vst [vmem:[%s2484_s3 + $0x68] sm:$0x3] %v1589_v32  ;;  %1675 = vst [vmem:[%s2484_s3 + $0x70] sm:$0x3] %v1590_v33 }
 0x127   :  { %1676 = vst [vmem:[%s2484_s3 + $0x78] sm:$0x3] %v1591_v43 }

// kernel: digit_forward.3
= control target key start
LH: loop header
LB: loop body
LE: loop exit
PB: predicated region body
PF: predicated region fallthrough
CT: control target
= control target key end

     0   :  { %12 = vsyncpa [#allocation5], 0  ;;  %s12348_s24 = smov 0   ;;  %s14129_s0 = inlined_call_operand.vmem [shape: f32[2,90,336], index: 0, kind: input, shape index: {}]   ;;  %s14130_s1 = inlined_call_operand.vmem [shape: f32[20,90], index: 1, kind: input, shape index: {}]   ;;  %s14131_s2 = inlined_call_operand.vmem [shape: f32[20,1], index: 2, kind: input, shape index: {}]   ;;  %s14132_s3 = inlined_call_operand.vmem [shape: bf16[20,336,500], index: 3, kind: input, shape index: {}]   ;;  %s14133_s4 = inlined_call_operand.vmem [shape: f32[1,500], index: 4, kind: input, shape index: {}]   ;;  %s14134_s5 = inlined_call_operand.vmem [shape: f32[500,9], index: 5, kind: input, shape index: {}]   ;;  %s14135_s6 = inlined_call_operand.vmem [shape: f32[1,9], index: 6, kind: input, shape index: {}]   ;;  %s14136_s7 = inlined_call_operand.hbm [shape: f32[2,9], index: 7, kind: output, shape index: {}]  }
   0x1 LB: > { %s12354_s25 = sadd.s32 4294967295, %s12294_s24   ;;  %p8875_p0 = scmp.ge.s32.totalorder %s12294_s24, 1  ;;  %s12294_s24 = sphi %s12348_s24, %s18_s24  }
   0x2   : > { %p235_p1 = scmp.lt.s32.totalorder %s12294_s24, 3 }
   0x4   : > { %p236_p2 = pnand %p8875_p0, %p235_p1 }
   0x5   : > { %s263_s26 = smul.u32 (!%p236_p2), 10, %s12354_s25  ;;  %p8877_p4 = scmp.ne.s32.totalorder (!%p236_p2), %s12354_s25, 0 }
   0x6   : > { %239 = sbr.rel (%p236_p2) target bundleno = 1972 (0x7b4), region = 48 }
   0x7   : > { %p264_p3 = scmp.lt.s32.totalorder (!%p236_p2), %s263_s26, 19 }
   0xd   : > { %s14144_s26 = smov (!%p264_p3, %s263_s26), 19  ;;  %274 = sbr.rel (%p8877_p4) target bundleno = 308 (0x134), region = 52 }
   0xe   : > { %s10955_s27 = smul.u32 672, %s14144_s26  ;;  %v279_v0 = vld [vmem:[%s14129_s0 + $0x8] sm:$0xff] (!%p8877_p4)  ;;  %v282_v1 = vld [vmem:[%s14129_s0 + $0x20] sm:$0xff] (!%p8877_p4)  ;;  %v280_v2 = vld [vmem:[%s14129_s0 + $0x10] sm:$0xff] (!%p8877_p4)  ;;  %v12296_v3 = vmov (!%p8877_p4), 0.0|0.0   ;;  %v539_v8 = vlaneseq (!%p8877_p4)  ;;  %vm1283_vm0 = vcmask (!%p8877_p4), 1043458  }
   0xf   : > { %10734 = vmatprep.subr.bf16.mxu1 (!%p8877_p4), %v12296_v3  ;;  %v10708_v4 = vpack.c.bf16 (!%p8877_p4), %v282_v1, %v279_v0  ;;  %v283_v5 = vld [vmem:[%s14129_s0 + $0x28] sm:$0xff] (!%p8877_p4)  ;;  %v278_v6 = vld [vmem:[%s14129_s0] sm:$0xff] (!%p8877_p4)  ;;  %v281_v7 = vld [vmem:[%s14129_s0 + $0x18] sm:$0xff] (!%p8877_p4)  ;;  %v12297_v30 = vmov (!%p8877_p4), 1983009808   ;;  %v12298_v46 = vmov (!%p8877_p4), 0.0  }
  0x10   : > { %s12362_s30 = scalar_lea.vmem %s14132_s3, %s10955_s27  ;;  %v10735_v9 = vpack.c.bf16 (!%p8877_p4), %v283_v5, %v280_v2  ;;  %v10710_v10 = vpack.c.bf16 (!%p8877_p4), %v281_v7, %v278_v6  ;;  %v285_v11 = vld [vmem:[%s14129_s0 + $0x38] sm:$0xff] (!%p8877_p4)  ;;  %v288_v12 = vld [vmem:[%s14129_s0 + $0x50] sm:$0xff] (!%p8877_p4)  ;;  %v286_v13 = vld [vmem:[%s14129_s0 + $0x40] sm:$0xff] (!%p8877_p4)  ;;  %v12422_v27 = vshrl.u32 (!%p8877_p4), %v539_v8, 7  ;;  %v1268_v31 = vunpack.c.l.s4 (!%p8877_p4), %v12297_v30  ;;  %416 = vmatprep.mubr.f32.mxu0 (!%p8877_p4), %v12298_v46 }
  0x11   : > { %10709 = vmatprep.subr.bf16.mxu0 (!%p8877_p4), %v10708_v4  ;;  %v10712_v14 = vpack.c.bf16 (!%p8877_p4), %v288_v12, %v285_v11  ;;  %v289_v15 = vld [vmem:[%s14129_s0 + $0x58] sm:$0xff] (!%p8877_p4)  ;;  %v284_v16 = vld [vmem:[%s14129_s0 + $0x30] sm:$0xff] (!%p8877_p4)  ;;  %v287_v17 = vld [vmem:[%s14129_s0 + $0x48] sm:$0xff] (!%p8877_p4)  ;;  %vm12299_vm1 = vmmov (!%p8877_p4), 0   ;;  %vm342_vm2 = vcmask (!%p8877_p4), 1041408   ;;  %v12300_v51 = vmov (!%p8877_p4), 0  }
  0x12   : > { %10736 = vmatpush3.bf16.msra.mxu1 (!%p8877_p4), %v10735_v9  ;;  %10711 = vmatpush1.bf16.msra.mxu0 (!%p8877_p4), %v10710_v10  ;;  %v10738_v18 = vpack.c.bf16 (!%p8877_p4), %v289_v15, %v286_v13  ;;  %v10714_v19 = vpack.c.bf16 (!%p8877_p4), %v287_v17, %v284_v16  ;;  %v291_v20 = vld [vmem:[%s14129_s0 + $0x68] sm:$0xff] (!%p8877_p4)  ;;  %v294_v21 = vld [vmem:[%s14129_s0 + $0x80] sm:$0xff] (!%p8877_p4)  ;;  %v292_v22 = vld [vmem:[%s14129_s0 + $0x70] sm:$0xff] (!%p8877_p4)  ;;  %v1251_v33 = vsub.s32 (!%p8877_p4), 0, %v12422_v27  ;;  %v1255_v34 = vsub.s32 (!%p8877_p4), 1, %v12422_v27 }
  0x13   : > { %10737 = vmatprep.subr.bf16.mxu1 (!%p8877_p4), %v12296_v3  ;;  %10713 = vmatprep.subr.bf16.mxu0 (!%p8877_p4), %v10712_v14  ;;  %v10716_v23 = vpack.c.bf16 (!%p8877_p4), %v294_v21, %v291_v20  ;;  %v295_v24 = vld [vmem:[%s14129_s0 + $0x88] sm:$0xff] (!%p8877_p4)  ;;  %v290_v25 = vld [vmem:[%s14129_s0 + $0x60] sm:$0xff] (!%p8877_p4)  ;;  %v293_v26 = vld [vmem:[%s14129_s0 + $0x78] sm:$0xff] (!%p8877_p4)  ;;  %v1259_v35 = vsub.s32 (!%p8877_p4), 2, %v12422_v27  ;;  %v1269_v41 = vunpack.c.0.s8 (!%p8877_p4), %v1268_v31  ;;  %v1263_v43 = vsub.s32 (!%p8877_p4), 3, %v12422_v27 }
  0x14   : > { %v297_v28 = vld [vmem:[%s14129_s0 + $0x98] sm:$0xff]  ;;  %v300_v29 = vld [vmem:[%s14129_s0 + $0xb0] sm:$0xff]  ;;  %v298_v32 = vld [vmem:[%s14129_s0 + $0xa0] sm:$0xff]  ;;  %v10741_v36 = vpack.c.bf16 %v295_v24, %v292_v22  ;;  %v10718_v37 = vpack.c.bf16 %v293_v26, %v290_v25  ;;  %10666 = vmatprep.mubr.msk.f32.mxu1 %vm12299_vm1, %v12298_v46  ;;  %10982 = vset.pattern.permute.xlu0 %v12300_v51  ;;  %vm1285_vm4 = vcmask 1045508   ;;  %vm1287_vm6 = vcmask 949254  }
  0x15   : > { %v301_v38 = vld [vmem:[%s14129_s0 + $0xb8] sm:$0xff]  ;;  %v296_v39 = vld [vmem:[%s14129_s0 + $0x90] sm:$0xff]  ;;  %v299_v40 = vld [vmem:[%s14129_s0 + $0xa8] sm:$0xff]  ;;  %v10720_v42 = vpack.c.bf16 %v300_v29, %v297_v28  ;;  %v1272_v50 = vsub.s32 %v1269_v41, %v12422_v27  ;;  %10983 = vset.pattern.permute.xlu1 %v12300_v51  ;;  %vm12301_vm7 = vmmov 1   ;;  %vm332_vm10 = vcmask 736256  }
  0x16   : > { %10739 = vmatpush3.bf16.msra.mxu1 %v10738_v18  ;;  %10715 = vmatpush1.bf16.msra.mxu0 %v10714_v19  ;;  %v303_v44 = vld [vmem:[%s14129_s0 + $0xc8] sm:$0xff]  ;;  %v306_v45 = vld [vmem:[%s14129_s0 + $0xe0] sm:$0xff]  ;;  %v10744_v47 = vpack.c.bf16 %v301_v38, %v298_v32  ;;  %v10722_v48 = vpack.c.bf16 %v299_v40, %v296_v39  ;;  %v304_v52 = vld [vmem:[%s14129_s0 + $0xd0] sm:$0xff]  ;;  %v12302_v5 = vmov 1966171168   ;;  %vm12702_vm11 = vcmp.lt.s32.totalorder %v539_v8, 336 }
  0x17   : > { %10740 = vmatprep.subr.bf16.mxu1 %v12296_v3  ;;  %10717 = vmatprep.subr.bf16.mxu0 %v10716_v23  ;;  %v1247_v49 = vld [vmem:[%s14133_s4] sm:$0xf]  ;;  %vm1284_vm3 = vmor %vm1283_vm0, %vm342_vm2  ;;  %v10724_v56 = vpack.c.bf16 %v306_v45, %v303_v44  ;;  %v307_v57 = vld [vmem:[%s14129_s0 + $0xe8] sm:$0xff] }
  0x18   : > { %v1252_v53 = vrot.slane %v1247_v49, %v1251_v33  ;;  %v1256_v54 = vrot.slane %v1247_v49, %v1255_v34  ;;  %v1260_v55 = vrot.slane %v1247_v49, %v1259_v35  ;;  %v302_v58 = vld [vmem:[%s14129_s0 + $0xc0] sm:$0xff]  ;;  %v305_v59 = vld [vmem:[%s14129_s0 + $0xd8] sm:$0xff]  ;;  %v1264_v60 = vrot.slane %v1247_v49, %v1263_v43  ;;  %v312_v62 = vld [vmem:[%s14129_s0 + $0x110] sm:$0x3] }
  0x19   : > { %v309_v61 = vld [vmem:[%s14129_s0 + $0xf8] sm:$0xff]  ;;  %vm12481_vm5 = vmor %vm1285_vm4, %vm1284_vm3  ;;  %v10747_v2 = vpack.c.bf16 %v307_v57, %v304_v52  ;;  %v10726_v4 = vpack.c.bf16 %v305_v59, %v302_v58  ;;  %v310_v7 = vld [vmem:[%s14129_s0 + $0x100] sm:$0xff] }
  0x1a   : > { %10742 = vmatpush3.bf16.msra.mxu1 %v10741_v36  ;;  %10719 = vmatpush1.bf16.msra.mxu0 %v10718_v37  ;;  %v1265_v63 = vcombine.low %v1252_v53, %v1256_v54  ;;  %v1266_v0 = vcombine.low %v1260_v55, %v1264_v60  ;;  %vm12486_vm8 = vmpackc.low %vm342_vm2, %vm12301_vm7  ;;  %v10728_v9 = vpack.c.bf16 %v312_v62, %v309_v61  ;;  %v313_v11 = vld [vmem:[%s14129_s0 + $0x118] sm:$0x3]  ;;  %v308_v12 = vld [vmem:[%s14129_s0 + $0xf0] sm:$0xff] }
  0x1b   : > { %10743 = vmatprep.subr.bf16.mxu1 %v12296_v3  ;;  %10721 = vmatprep.subr.bf16.mxu0 %v10720_v42  ;;  %v311_v13 = vld [vmem:[%s14129_s0 + $0x108] sm:$0x3]  ;;  %vm1288_vm9 = vmor %vm1287_vm6, %vm12481_vm5  ;;  %v8891_v15 = vld [vmem:[%s14129_s0 + $0x140] sm:$0xff]  ;;  %v10750_v17 = vpack.c.bf16 %v313_v11, %v310_v7 }
  0x1c   : > { %v1273_v6 = vrot.slane %v1265_v63, %v1272_v50  ;;  %v1280_v10 = vrot.slane %v1266_v0, %v1272_v50  ;;  %v8888_v14 = vld [vmem:[%s14129_s0 + $0x128] sm:$0xff]  ;;  %v10731_v18 = vpack.c.bf16 %v311_v13, %v308_v12  ;;  %v8889_v19 = vld [vmem:[%s14129_s0 + $0x130] sm:$0xff]  ;;  %v8887_v22 = vld [vmem:[%s14129_s0 + $0x120] sm:$0xff] }
  0x1d   : > { %v10753_v20 = vpack.c.bf16 %v8891_v15, %v8888_v14  ;;  %v8892_v21 = vld [vmem:[%s14129_s0 + $0x148] sm:$0xff]  ;;  %v8890_v23 = vld [vmem:[%s14129_s0 + $0x138] sm:$0xff]  ;;  %v8897_v25 = vld [vmem:[%s14129_s0 + $0x170] sm:$0xff] }
  0x1e   : > { %10745 = vmatpush3.bf16.msra.mxu1 %v10744_v47  ;;  %10723 = vmatpush1.bf16.msra.mxu0 %v10722_v48  ;;  %v1281_v16 = vcombine.low %v1273_v6, %v1280_v10  ;;  %v8894_v24 = vld [vmem:[%s14129_s0 + $0x158] sm:$0xff]  ;;  %v12540_v26 = vld [vmem:[%s14130_s1] sm:$0xff]  ;;  %v10780_v28 = vpack.c.bf16 %v8892_v21, %v8889_v19  ;;  %v10755_v29 = vpack.c.bf16 %v8890_v23, %v8887_v22  ;;  %v8893_v33 = vld [vmem:[%s14129_s0 + $0x150] sm:$0xff]  ;;  %v537_v19 = vunpack.c.l.s4 %v12302_v5 }
  0x1f   : > { %10746 = vmatprep.subr.bf16.mxu1 %v12296_v3  ;;  %10725 = vmatprep.subr.bf16.mxu0 %v10724_v56  ;;  %v8895_v30 = vld [vmem:[%s14129_s0 + $0x160] sm:$0xff]  ;;  %v10757_v31 = vpack.c.bf16 %v8897_v25, %v8894_v24  ;;  %v8898_v32 = vld [vmem:[%s14129_s0 + $0x178] sm:$0xff]  ;;  %v8896_v34 = vld [vmem:[%s14129_s0 + $0x168] sm:$0xff] }
  0x20   : > { %1289 = vst.msk [vmem:[#allocation3] sm:$0xff] %vm1288_vm9, %v1281_v16  ;;  %v8900_v35 = vld [vmem:[%s14129_s0 + $0x188] sm:$0xff]  ;;  %v8903_v36 = vld [vmem:[%s14129_s0 + $0x1a0] sm:$0xff]  ;;  %v10783_v37 = vpack.c.bf16 %v8898_v32, %v8895_v30  ;;  %v10759_v38 = vpack.c.bf16 %v8896_v34, %v8893_v33  ;;  %v8901_v39 = vld [vmem:[%s14129_s0 + $0x190] sm:$0xff] }
  0x21   : > { %v12571_v40 = vld [vmem:[%s14130_s1 + $0x8] sm:$0xff]  ;;  %v10761_v41 = vpack.c.bf16 %v8903_v36, %v8900_v35  ;;  %v8899_v43 = vld [vmem:[%s14129_s0 + $0x180] sm:$0xff]  ;;  %v8902_v44 = vld [vmem:[%s14129_s0 + $0x198] sm:$0xff] }
  0x22   : > { %10748 = vmatpush3.bf16.msra.mxu1 %v10747_v2  ;;  %10727 = vmatpush1.bf16.msra.mxu0 %v10726_v4  ;;  %v8904_v42 = vld [vmem:[%s14129_s0 + $0x1a8] sm:$0xff]  ;;  %v8906_v45 = vld [vmem:[%s14129_s0 + $0x1b8] sm:$0xff]  ;;  %v8909_v47 = vld [vmem:[%s14129_s0 + $0x1d0] sm:$0xff]  ;;  %v10763_v49 = vpack.c.bf16 %v8902_v44, %v8899_v43 }
  0x23   : > { %10749 = vmatprep.subr.bf16.mxu1 %v12296_v3  ;;  %10730 = vmatprep.subr.msk.bf16.mxu0 %vm12486_vm8, %v10728_v9  ;;  %v10786_v48 = vpack.c.bf16 %v8904_v42, %v8901_v39  ;;  %v8907_v50 = vld [vmem:[%s14129_s0 + $0x1c0] sm:$0xff]  ;;  %v277_v51 = vld [vmem:[%s14130_s1 + $0x10] sm:$0xf]  ;;  %v10765_v52 = vpack.c.bf16 %v8909_v47, %v8906_v45  ;;  %v8910_v53 = vld [vmem:[%s14129_s0 + $0x1d8] sm:$0xff] }
  0x24   : > { %v8905_v54 = vld [vmem:[%s14129_s0 + $0x1b0] sm:$0xff]  ;;  %v8908_v55 = vld [vmem:[%s14129_s0 + $0x1c8] sm:$0xff]  ;;  %v8915_v57 = vld [vmem:[%s14129_s0 + $0x200] sm:$0xff]  ;;  %v10789_v58 = vpack.c.bf16 %v8910_v53, %v8907_v50 }
  0x25   : > { %v8912_v56 = vld [vmem:[%s14129_s0 + $0x1e8] sm:$0xff]  ;;  %v10767_v59 = vpack.c.bf16 %v8908_v55, %v8905_v54  ;;  %v8913_v60 = vld [vmem:[%s14129_s0 + $0x1f0] sm:$0xff]  ;;  %v314_v61 = vld [vmem:[%s14131_s2] sm:$0xff] }
  0x26   : > { %10752 = vmatpush3.bf16.msk.msra.mxu1 %vm12486_vm8, %v10750_v17  ;;  %10733 = vmatpush1.bf16.msk.msra.mxu0 %vm12486_vm8, %v10731_v18  ;;  %v316_v62 = vld [vmem:[%s14131_s2 + $0x10] sm:$0xf]  ;;  %v10769_v63 = vpack.c.bf16 %v8915_v57, %v8912_v56  ;;  %v8916_v0 = vld [vmem:[%s14129_s0 + $0x208] sm:$0xff]  ;;  %v8911_v1 = vld [vmem:[%s14129_s0 + $0x1e0] sm:$0xff] }
  0x27   : > { %10779 = vmatprep.subr.bf16.mxu1 %v12296_v3  ;;  %10754 = vmatprep.subr.bf16.mxu0 %v10753_v20  ;;  %v8914_v2 = vld [vmem:[%s14129_s0 + $0x1f8] sm:$0xff]  ;;  %v8921_v6 = vld [vmem:[%s14129_s0 + $0x230] sm:$0x3]  ;;  %v10792_v7 = vpack.c.bf16 %v8916_v0, %v8913_v60  ;;  %v8919_v10 = vld [vmem:[%s14129_s0 + $0x220] sm:$0xff]  ;;  %v538_v20 = vunpack.c.0.s8 %v537_v19 }
  0x28   : > { %v8918_v4 = vld [vmem:[%s14129_s0 + $0x218] sm:$0xff]  ;;  %319 = vperm.xlu0 %10982, %v314_v61   ;;  %329 = vperm.xlu1 %10983, %v316_v62   ;;  %v10771_v9 = vpack.c.bf16 %v8914_v2, %v8911_v1  ;;  %v315_v11 = vld [vmem:[%s14131_s2 + $0x8] sm:$0xff]  ;;  %v8917_v14 = vld [vmem:[%s14129_s0 + $0x210] sm:$0xff] }
  0x29   : > { %8880 = vmatmul.mubr.msk.f32.vlgmr.msra.gmra.mrb[0].mxu0 %vm332_vm10, %v12540_v26  ;;  %10667 = vmatmul.mubr.msk.f32.vlgmr.msra.gmra.mrb[0].mxu1 %vm332_vm10, %v12540_v26  ;;  %v10773_v12 = vpack.c.bf16 %v8921_v6, %v8918_v4  ;;  %v8922_v13 = vld [vmem:[%s14129_s0 + $0x238] sm:$0x3]  ;;  %v8920_v15 = vld [vmem:[%s14129_s0 + $0x228] sm:$0x3]  ;;  %v805_v18 = vld [vmem:[%s14131_s2 + $0x10] sm:$0xf]  ;;  %v12697_v24 = vsub.s32 %v538_v20, %v12422_v27 }
  0x2a   : > { %10781 = vmatpush3.bf16.msra.mxu1 %v10780_v28  ;;  %10756 = vmatpush1.bf16.msra.mxu0 %v10755_v29  ;;  %v10795_v16 = vpack.c.bf16 %v8922_v13, %v8919_v10  ;;  %v10776_v17 = vpack.c.bf16 %v8920_v15, %v8917_v14 }
  0x2b   : > { %10782 = vmatprep.subr.bf16.mxu1 %v12296_v3  ;;  %10758 = vmatprep.subr.bf16.mxu0 %v10757_v31 }
  0x2c   : > { %422 = vmatprep.mubr.f32.mxu0 %v12298_v46  ;;  %10669 = vmatprep.mubr.msk.f32.mxu1 %vm12299_vm1, %v12298_v46 }
  0x2d   : > { %8881 = vmatmul.mubr.msk.f32.gmra.mrb[2].mxu0 %vm332_vm10, %v12571_v40  ;;  %10670 = vmatmul.mubr.msk.f32.gmra.mrb[2].mxu1 %vm332_vm10, %v12571_v40 }
  0x2e   : > { %10784 = vmatpush3.bf16.msra.mxu1 %v10783_v37  ;;  %10760 = vmatpush1.bf16.msra.mxu0 %v10759_v38 }
  0x2f   : > { %10785 = vmatprep.subr.bf16.mxu1 %v12296_v3  ;;  %10762 = vmatprep.subr.bf16.mxu0 %v10761_v41 }
  0x30   : > { %428 = vmatprep.mubr.f32.mxu0 %v12298_v46  ;;  %10672 = vmatprep.mubr.msk.f32.mxu1 %vm12299_vm1, %v12298_v46 }
  0x31   : > { %8882 = vmatmul.mubr.msk.f32.gmra.mrb[4].mxu0 %vm332_vm10, %v277_v51  ;;  %10673 = vmatmul.mubr.msk.f32.gmra.mrb[4].mxu1 %vm332_vm10, %v277_v51 }
  0x32   : > { %10787 = vmatpush3.bf16.msra.mxu1 %v10786_v48  ;;  %10764 = vmatpush1.bf16.msra.mxu0 %v10763_v49 }
  0x33   : > { %10788 = vmatprep.subr.bf16.mxu1 %v12296_v3  ;;  %10766 = vmatprep.subr.bf16.mxu0 %v10765_v52 }
  0x34   : > { %10699 = vmatprep.mubr.msk.f32.mxu1 %vm12299_vm1, %v12298_v46  ;;  %903 = vmatprep.mubr.f32.mxu0 %v12298_v46 }
  0x35   : > { %324 = vperm.xlu0 %10982, %v315_v11   ;;  %808 = vperm.xlu1 %10983, %v314_v61  }
  0x36   : > { %10790 = vmatpush3.bf16.msra.mxu1 %v10789_v58  ;;  %10768 = vmatpush1.bf16.msra.mxu0 %v10767_v59 }
  0x37   : > { %10791 = vmatprep.subr.bf16.mxu1 %v12296_v3  ;;  %10770 = vmatprep.subr.bf16.mxu0 %v10769_v63 }
  0x39   : > { %818 = vperm.xlu1 %10983, %v805_v18   ;;  %813 = vperm.xlu0 %10982, %v315_v11  }
  0x3a   : > { %10793 = vmatpush3.bf16.msra.mxu1 %v10792_v7  ;;  %10772 = vmatpush1.bf16.msra.mxu0 %v10771_v9 }
  0x3b   : > { %10794 = vmatprep.subr.bf16.mxu1 %v12296_v3  ;;  %10775 = vmatprep.subr.msk.bf16.mxu0 %vm12486_vm8, %v10773_v12  ;;  %v765_v3 = vld [vmem:[%s14130_s1 + $0x10] sm:$0xf] }
  0x3e   : > { %10797 = vmatpush3.bf16.msk.msra.mxu1 %vm12486_vm8, %v10795_v16  ;;  %10778 = vmatpush1.bf16.msk.msra.mxu0 %vm12486_vm8, %v10776_v17 }
  0x41   : > { %10700 = vmatmul.mubr.msk.f32.vlgmr.msra.gmra.mrb[6].mxu1 %vm332_vm10, %v12540_v26  ;;  %8925 = vmatmul.mubr.msk.f32.vlgmr.msra.gmra.mrb[6].mxu0 %vm332_vm10, %v12540_v26 }
  0x42   : > { %10702 = vmatprep.mubr.msk.f32.mxu1 %vm12299_vm1, %v12298_v46  ;;  %909 = vmatprep.mubr.f32.mxu0 %v12298_v46 }
  0x45   : > { %10703 = vmatmul.mubr.msk.f32.gmra.mrb[8].mxu1 %vm332_vm10, %v12571_v40  ;;  %8926 = vmatmul.mubr.msk.f32.gmra.mrb[8].mxu0 %vm332_vm10, %v12571_v40 }
  0x46   : > { %10705 = vmatprep.mubr.msk.f32.mxu1 %vm12299_vm1, %v12298_v46  ;;  %915 = vmatprep.mubr.f32.mxu0 %v12298_v46 }
  0x49   : > { %10706 = vmatmul.mubr.msk.f32.gmra.mrb[10].mxu1 %vm332_vm10, %v765_v3  ;;  %8927 = vmatmul.mubr.msk.f32.gmra.mrb[10].mxu0 %vm332_vm10, %v765_v3 }
  0xa7   : > { %v320_v21 = vpop.permute.xlu0 %319  ;;  %v330_v48 = vpop.permute.xlu1 %329 }
  0xb4   : > { %v325_v30 = vpop.permute.xlu0 %324 }
  0xfc   : > { %v418_v22 = vpop.f32.mrb[0].mxu0  ;;  %v501_v23 = vpop.f32.mrb[0].mxu1 }
  0xfd   : > { %v419_v25 = vadd.f32 %v418_v22, %v320_v21  ;;  %v420_v26 = vpop.f32.mrb[1].mxu0  ;;  %v502_v46 = vadd.f32 %v501_v23, %v320_v21  ;;  %v10668_v28 = vpop.f32.mrb[1].mxu1 }
  0xfe   : > { %v421_v29 = vadd.f32 %v420_v26, %v320_v21 }
  0xff   : > { %v515_v31 = vmax.f32 %v419_v25, 0.0  ;;  %v517_v32 = vmax.f32 %v502_v46, 0.0 }
 0x100   : > { %v516_v33 = vmax.f32 %v421_v29, 0.0  ;;  %v424_v34 = vpop.f32.mrb[2].mxu0  ;;  %v506_v35 = vpop.f32.mrb[2].mxu1 }
 0x101   : > { %v535_v36 = vcombine.high %v517_v32, %v517_v32  ;;  %v556_v37 = vrot.slane %v517_v32, %v12697_v24  ;;  %v425_v38 = vadd.f32 %v424_v34, %v325_v30  ;;  %v426_v39 = vpop.f32.mrb[3].mxu0  ;;  %v507_v40 = vadd.f32 %v506_v35, %v325_v30  ;;  %v10671_v41 = vpop.f32.mrb[3].mxu1 }
 0x102   : > { %v533_v27 = vcombine.low %v515_v31, %v516_v33  ;;  %v534_v42 = vcombine.high %v515_v31, %v516_v33  ;;  %v427_v43 = vadd.f32 %v426_v39, %v325_v30 }
 0x103   : > { %v563_v44 = vrot.slane %v535_v36, %v12697_v24  ;;  %v518_v45 = vmax.f32 %v425_v38, 0.0  ;;  %v520_v47 = vmax.f32 %v507_v40, 0.0  ;;  %v809_v36 = vpop.permute.xlu1 %808 }
 0x104   : > { %v542_v50 = vrot.slane %v533_v27, %v12697_v24  ;;  %v549_v51 = vrot.slane %v534_v42, %v12697_v24  ;;  %v519_v52 = vmax.f32 %v427_v43, 0.0  ;;  %v430_v53 = vpop.f32.mrb[4].mxu0  ;;  %v511_v54 = vpop.f32.mrb[4].mxu1 }
 0x105   : > { %v602_v55 = vcombine.high %v520_v47, %v520_v47  ;;  %v623_v56 = vrot.slane %v520_v47, %v12697_v24  ;;  %v431_v57 = vadd.f32 %v430_v53, %v330_v48  ;;  %v432_v58 = vpop.f32.mrb[5].mxu0  ;;  %v512_v59 = vadd.f32 %v511_v54, %v330_v48  ;;  %v10674_v60 = vpop.f32.mrb[5].mxu1 }
 0x106   : > { %v564_v61 = vcombine.low %v542_v50, %v556_v37  ;;  %v565_v62 = vcombine.high %v542_v50, %v556_v37  ;;  %v566_v8 = vcombine.low %v549_v51, %v563_v44  ;;  %v567_v63 = vcombine.high %v549_v51, %v563_v44  ;;  %v814_v50 = vpop.permute.xlu0 %813 }
 0x107   : > { %v600_v0 = vcombine.low %v518_v45, %v519_v52  ;;  %v601_v1 = vcombine.high %v518_v45, %v519_v52  ;;  %v630_v2 = vrot.slane %v602_v55, %v12697_v24  ;;  %v521_v4 = vmax.f32 %v431_v57, 0.0 }
 0x108   : > { %v574_v6 = vrot.slane %v564_v61, %v12697_v24  ;;  %v581_v7 = vrot.slane %v566_v8, %v12697_v24  ;;  %v588_v9 = vrot.slane %v565_v62, %v12697_v24  ;;  %v595_v10 = vrot.slane %v567_v63, %v12697_v24  ;;  %v819_v63 = vpop.permute.xlu1 %818 }
 0x109   : > { %v609_v11 = vrot.slane %v600_v0, %v12697_v24  ;;  %v616_v12 = vrot.slane %v601_v1, %v12697_v24  ;;  %v433_v13 = vadd.f32 %v432_v58, %v330_v48  ;;  %v523_v14 = vmax.f32 %v512_v59, 0.0 }
 0x10a   : > { %v596_v15 = vcombine.high %v574_v6, %v574_v6  ;;  %v597_v16 = vcombine.high %v581_v7, %v581_v7  ;;  %v598_v17 = vcombine.high %v588_v9, %v588_v9  ;;  %v599_v18 = vcombine.high %v595_v10, %v595_v10  ;;  %724 = vst.msk [vmem:[#allocation2] ss:$2 sm:$0x7] %vm12702_vm11, %v574_v6 }
 0x10b   : > { %726 = vst.msk [vmem:[#allocation2 + $0x6] ss:$2 sm:$0x7] %vm12702_vm11, %v588_v9  ;;  %732 = vst.msk [vmem:[#allocation2 + $0x18] ss:$2 sm:$0x7] %vm12702_vm11, %v581_v7  ;;  %v631_v3 = vcombine.low %v609_v11, %v623_v56  ;;  %v632_v5 = vcombine.high %v609_v11, %v623_v56  ;;  %v633_v19 = vcombine.low %v616_v12, %v630_v2 }
 0x10c   : > { %734 = vst.msk [vmem:[#allocation2 + $0x1e] ss:$2 sm:$0x7] %vm12702_vm11, %v595_v10  ;;  %v634_v20 = vcombine.high %v616_v12, %v630_v2  ;;  %728 = vst.msk [vmem:[#allocation2 + $0xc] ss:$2 sm:$0x7] %vm12702_vm11, %v596_v15  ;;  %v681_v22 = vrot.slane %v523_v14, %v12697_v24 }
 0x10d   : > { %730 = vst.msk [vmem:[#allocation2 + $0x12] ss:$2 sm:$0x7] %vm12702_vm11, %v598_v17  ;;  %736 = vst.msk [vmem:[#allocation2 + $0x24] ss:$2 sm:$0x7] %vm12702_vm11, %v597_v16  ;;  %v641_v23 = vrot.slane %v631_v3, %v12697_v24  ;;  %v648_v25 = vrot.slane %v633_v19, %v12697_v24  ;;  %v655_v26 = vrot.slane %v632_v5, %v12697_v24 }
 0x10e   : > { %738 = vst.msk [vmem:[#allocation2 + $0x2a] ss:$2 sm:$0x7] %vm12702_vm11, %v599_v18  ;;  %v522_v21 = vmax.f32 %v433_v13, 0.0  ;;  %v662_v46 = vrot.slane %v634_v20, %v12697_v24 }
 0x10f   : > { %v663_v29 = vcombine.high %v641_v23, %v641_v23  ;;  %v664_v30 = vcombine.high %v648_v25, %v648_v25  ;;  %v665_v31 = vcombine.high %v655_v26, %v655_v26  ;;  %740 = vst.msk [vmem:[#allocation2 + $0x30] ss:$2 sm:$0x7] %vm12702_vm11, %v641_v23  ;;  %742 = vst.msk [vmem:[#allocation2 + $0x36] ss:$2 sm:$0x7] %vm12702_vm11, %v655_v26 }
 0x110   : > { %v667_v28 = vcombine.low %v521_v4, %v522_v21  ;;  %v666_v32 = vcombine.high %v662_v46, %v662_v46  ;;  %748 = vst.msk [vmem:[#allocation2 + $0x48] ss:$2 sm:$0x7] %vm12702_vm11, %v648_v25  ;;  %750 = vst.msk [vmem:[#allocation2 + $0x4e] ss:$2 sm:$0x7] %vm12702_vm11, %v662_v46 }
 0x111   : > { %744 = vst.msk [vmem:[#allocation2 + $0x3c] ss:$2 sm:$0x7] %vm12702_vm11, %v663_v29  ;;  %746 = vst.msk [vmem:[#allocation2 + $0x42] ss:$2 sm:$0x7] %vm12702_vm11, %v665_v31 }
 0x112   : > { %v674_v33 = vrot.slane %v667_v28, %v12697_v24  ;;  %752 = vst.msk [vmem:[#allocation2 + $0x54] ss:$2 sm:$0x7] %vm12702_vm11, %v664_v30  ;;  %754 = vst.msk [vmem:[#allocation2 + $0x5a] ss:$2 sm:$0x7] %vm12702_vm11, %v666_v32 }
 0x114   : > { %v682_v34 = vcombine.low %v674_v33, %v681_v22  ;;  %v683_v35 = vcombine.high %v674_v33, %v681_v22  ;;  %v905_v39 = vpop.f32.mrb[6].mxu0  ;;  %v988_v40 = vpop.f32.mrb[6].mxu1 }
 0x115   : > { %v906_v41 = vadd.f32 %v905_v39, %v809_v36  ;;  %v907_v27 = vpop.f32.mrb[7].mxu0  ;;  %v989_v42 = vadd.f32 %v988_v40, %v809_v36  ;;  %v10701_v43 = vpop.f32.mrb[7].mxu1 }
 0x116   : > { %v690_v37 = vrot.slane %v682_v34, %v12697_v24  ;;  %v697_v38 = vrot.slane %v683_v35, %v12697_v24  ;;  %v908_v47 = vadd.f32 %v907_v27, %v809_v36 }
 0x117   : > { %v1002_v48 = vmax.f32 %v906_v41, 0.0  ;;  %v1004_v51 = vmax.f32 %v989_v42, 0.0 }
 0x118   : > { %v698_v44 = vcombine.high %v690_v37, %v690_v37  ;;  %v699_v45 = vcombine.high %v697_v38, %v697_v38  ;;  %756 = vst.msk [vmem:[#allocation2 + $0x60] ss:$2 sm:$0x7] %vm12702_vm11, %v690_v37  ;;  %758 = vst.msk [vmem:[#allocation2 + $0x66] ss:$2 sm:$0x7] %vm12702_vm11, %v697_v38 }
 0x119   : > { %v1003_v52 = vmax.f32 %v908_v47, 0.0  ;;  %v993_v53 = vpop.f32.mrb[8].mxu1  ;;  %v911_v54 = vpop.f32.mrb[8].mxu0  ;;  %v1022_v55 = vcombine.high %v1004_v51, %v1004_v51  ;;  %v1043_v56 = vrot.slane %v1004_v51, %v12697_v24 }
 0x11a   : > { %760 = vst.msk [vmem:[#allocation2 + $0x6c] ss:$2 sm:$0x7] %vm12702_vm11, %v698_v44  ;;  %762 = vst.msk [vmem:[#allocation2 + $0x72] ss:$2 sm:$0x7] %vm12702_vm11, %v699_v45  ;;  %v994_v57 = vadd.f32 %v993_v53, %v814_v50  ;;  %v912_v58 = vadd.f32 %v911_v54, %v814_v50 }
 0x11b   : > { %v913_v59 = vpop.f32.mrb[9].mxu0  ;;  %v10704_v60 = vpop.f32.mrb[9].mxu1  ;;  %v1020_v61 = vcombine.low %v1002_v48, %v1003_v52  ;;  %v1021_v62 = vcombine.high %v1002_v48, %v1003_v52  ;;  %v1050_v0 = vrot.slane %v1022_v55, %v12697_v24 }
 0x11c   : > { %v914_v8 = vadd.f32 %v913_v59, %v814_v50  ;;  %v1007_v1 = vmax.f32 %v994_v57, 0.0  ;;  %v1005_v2 = vmax.f32 %v912_v58, 0.0  ;;  %v998_v9 = vpop.f32.mrb[10].mxu1  ;;  %v917_v10 = vpop.f32.mrb[10].mxu0 }
 0x11d   : > { %v1029_v4 = vrot.slane %v1020_v61, %v12697_v24  ;;  %v1036_v6 = vrot.slane %v1021_v62, %v12697_v24  ;;  %v999_v13 = vadd.f32 %v998_v9, %v819_v63  ;;  %v918_v14 = vadd.f32 %v917_v10, %v819_v63  ;;  %v919_v15 = vpop.f32.mrb[11].mxu0  ;;  %v10707_v16 = vpop.f32.mrb[11].mxu1 }
 0x11e   : > { %v1006_v7 = vmax.f32 %v914_v8, 0.0  ;;  %v1089_v11 = vcombine.high %v1007_v1, %v1007_v1  ;;  %v1110_v12 = vrot.slane %v1007_v1, %v12697_v24  ;;  %v920_v40 = vadd.f32 %v919_v15, %v819_v63 }
 0x11f   : > { %v1051_v17 = vcombine.low %v1029_v4, %v1043_v56  ;;  %v1052_v18 = vcombine.high %v1029_v4, %v1043_v56  ;;  %v1053_v3 = vcombine.low %v1036_v6, %v1050_v0  ;;  %v1054_v5 = vcombine.high %v1036_v6, %v1050_v0 }
 0x120   : > { %v1117_v19 = vrot.slane %v1089_v11, %v12697_v24  ;;  %v1087_v20 = vcombine.low %v1005_v2, %v1006_v7  ;;  %v1088_v21 = vcombine.high %v1005_v2, %v1006_v7  ;;  %v1010_v22 = vmax.f32 %v999_v13, 0.0 }
 0x121   : > { %v1061_v23 = vrot.slane %v1051_v17, %v12697_v24  ;;  %v1068_v25 = vrot.slane %v1053_v3, %v12697_v24  ;;  %v1075_v26 = vrot.slane %v1052_v18, %v12697_v24  ;;  %v1082_v46 = vrot.slane %v1054_v5, %v12697_v24 }
 0x122   : > { %v1096_v28 = vrot.slane %v1087_v20, %v12697_v24  ;;  %v1103_v29 = vrot.slane %v1088_v21, %v12697_v24  ;;  %v1168_v30 = vrot.slane %v1010_v22, %v12697_v24  ;;  %v1008_v39 = vmax.f32 %v918_v14, 0.0 }
 0x123   : > { %v1083_v31 = vcombine.high %v1061_v23, %v1061_v23  ;;  %v1084_v32 = vcombine.high %v1068_v25, %v1068_v25  ;;  %v1085_v33 = vcombine.high %v1075_v26, %v1075_v26  ;;  %v1086_v34 = vcombine.high %v1082_v46, %v1082_v46  ;;  %1208 = vst.msk [vmem:[#allocation2 + $0x1] ss:$2 sm:$0x7] %vm12702_vm11, %v1061_v23 }
 0x124   : > { %1210 = vst.msk [vmem:[#allocation2 + $0x7] ss:$2 sm:$0x7] %vm12702_vm11, %v1075_v26  ;;  %1216 = vst.msk [vmem:[#allocation2 + $0x19] ss:$2 sm:$0x7] %vm12702_vm11, %v1068_v25  ;;  %v1118_v35 = vcombine.low %v1096_v28, %v1110_v12  ;;  %v1119_v36 = vcombine.high %v1096_v28, %v1110_v12  ;;  %v1120_v37 = vcombine.low %v1103_v29, %v1117_v19 }
 0x125   : > { %1218 = vst.msk [vmem:[#allocation2 + $0x1f] ss:$2 sm:$0x7] %vm12702_vm11, %v1082_v46  ;;  %v1121_v38 = vcombine.high %v1103_v29, %v1117_v19  ;;  %1212 = vst.msk [vmem:[#allocation2 + $0xd] ss:$2 sm:$0x7] %vm12702_vm11, %v1083_v31 }
 0x126   : > { %1214 = vst.msk [vmem:[#allocation2 + $0x13] ss:$2 sm:$0x7] %vm12702_vm11, %v1085_v33  ;;  %1220 = vst.msk [vmem:[#allocation2 + $0x25] ss:$2 sm:$0x7] %vm12702_vm11, %v1084_v32  ;;  %v1128_v41 = vrot.slane %v1118_v35, %v12697_v24  ;;  %v1135_v27 = vrot.slane %v1120_v37, %v12697_v24  ;;  %v1142_v42 = vrot.slane %v1119_v36, %v12697_v24 }
 0x127   : > { %1222 = vst.msk [vmem:[#allocation2 + $0x2b] ss:$2 sm:$0x7] %vm12702_vm11, %v1086_v34  ;;  %v1149_v43 = vrot.slane %v1121_v38, %v12697_v24  ;;  %v1009_v44 = vmax.f32 %v920_v40, 0.0 }
 0x128   : > { %v1150_v45 = vcombine.high %v1128_v41, %v1128_v41  ;;  %v1151_v47 = vcombine.high %v1135_v27, %v1135_v27  ;;  %v1152_v48 = vcombine.high %v1142_v42, %v1142_v42  ;;  %1224 = vst.msk [vmem:[#allocation2 + $0x31] ss:$2 sm:$0x7] %vm12702_vm11, %v1128_v41  ;;  %1226 = vst.msk [vmem:[#allocation2 + $0x37] ss:$2 sm:$0x7] %vm12702_vm11, %v1142_v42 }
 0x129   : > { %v1153_v50 = vcombine.high %v1149_v43, %v1149_v43  ;;  %1232 = vst.msk [vmem:[#allocation2 + $0x49] ss:$2 sm:$0x7] %vm12702_vm11, %v1135_v27  ;;  %1234 = vst.msk [vmem:[#allocation2 + $0x4f] ss:$2 sm:$0x7] %vm12702_vm11, %v1149_v43  ;;  %v1154_v51 = vcombine.low %v1008_v39, %v1009_v44 }
 0x12a   : > { %1228 = vst.msk [vmem:[#allocation2 + $0x3d] ss:$2 sm:$0x7] %vm12702_vm11, %v1150_v45  ;;  %1230 = vst.msk [vmem:[#allocation2 + $0x43] ss:$2 sm:$0x7] %vm12702_vm11, %v1152_v48 }
 0x12b   : > { %1236 = vst.msk [vmem:[#allocation2 + $0x55] ss:$2 sm:$0x7] %vm12702_vm11, %v1151_v47  ;;  %1238 = vst.msk [vmem:[#allocation2 + $0x5b] ss:$2 sm:$0x7] %vm12702_vm11, %v1153_v50  ;;  %v1161_v52 = vrot.slane %v1154_v51, %v12697_v24 }
 0x12d   : > { %v1169_v53 = vcombine.low %v1161_v52, %v1168_v30  ;;  %v1170_v54 = vcombine.high %v1161_v52, %v1168_v30 }
 0x12f   : > { %v1177_v55 = vrot.slane %v1169_v53, %v12697_v24  ;;  %v1184_v56 = vrot.slane %v1170_v54, %v12697_v24 }
 0x131   : > { %v1185_v57 = vcombine.high %v1177_v55, %v1177_v55  ;;  %v1186_v58 = vcombine.high %v1184_v56, %v1184_v56  ;;  %1240 = vst.msk [vmem:[#allocation2 + $0x61] ss:$2 sm:$0x7] %vm12702_vm11, %v1177_v55  ;;  %1242 = vst.msk [vmem:[#allocation2 + $0x67] ss:$2 sm:$0x7] %vm12702_vm11, %v1184_v56 }
 0x133   : > { %1244 = vst.msk [vmem:[#allocation2 + $0x6d] ss:$2 sm:$0x7] %vm12702_vm11, %v1185_v57  ;;  %1246 = vst.msk [vmem:[#allocation2 + $0x73] ss:$2 sm:$0x7] %vm12702_vm11, %v1186_v58 }
 0x134 PF: > { %v10984_v24 = vld [vmem:[%s12362_s30 + $0x4] ss:$16 sps:$4 sm:$0xff]   ;;  %v10986_v59 = vld [vmem:[%s12362_s30 + $0xc] ss:$16 sps:$4 sm:$0xff]   ;;  %v10988_v60 = vld [vmem:[%s12362_s30] ss:$16 sps:$4 sm:$0xff]   ;;  %v1301_v32 = vlaneseq }
 0x135   : > { %1827 = vmatprep.subr.bf16.mxu0 %v10984_v24  ;;  %v10989_v61 = vld [vmem:[%s12362_s30 + $0x8] ss:$16 sps:$4 sm:$0xff]   ;;  %1909 = vmatprep.subr.bf16.mxu1 %v10986_v59  ;;  %v10990_v49 = vld [vmem:[%s12362_s30 + $0x24] ss:$16 sps:$4 sm:$0xff]   ;;  %v10992_v62 = vld [vmem:[%s12362_s30 + $0x2c] ss:$16 sps:$4 sm:$0xff]  }
 0x136   : > { %1828 = vmatpush1.bf16.msra.mxu0 %v10988_v60  ;;  %1910 = vmatpush1.bf16.msra.mxu1 %v10989_v61  ;;  %v10994_v8 = vld [vmem:[%s12362_s30 + $0x20] ss:$16 sps:$4 sm:$0xff]   ;;  %v10995_v63 = vld [vmem:[%s12362_s30 + $0x28] ss:$16 sps:$4 sm:$0xff]   ;;  %v10996_v0 = vld [vmem:[%s12362_s30 + $0x44] ss:$16 sps:$4 sm:$0xff]  }
 0x137   : > { %1829 = vmatprep.subr.bf16.mxu0 %v10990_v49  ;;  %1911 = vmatprep.subr.bf16.mxu1 %v10992_v62  ;;  %v10998_v1 = vld [vmem:[%s12362_s30 + $0x4c] ss:$16 sps:$4 sm:$0xff]   ;;  %v11000_v2 = vld [vmem:[%s12362_s30 + $0x40] ss:$16 sps:$4 sm:$0xff]   ;;  %v11001_v4 = vld [vmem:[%s12362_s30 + $0x48] ss:$16 sps:$4 sm:$0xff]  }
 0x138   : > { %v11002_v6 = vld [vmem:[%s12362_s30 + $0x64] ss:$16 sps:$4 sm:$0xff]   ;;  %v11004_v7 = vld [vmem:[%s12362_s30 + $0x6c] ss:$16 sps:$4 sm:$0xff]   ;;  %v11006_v9 = vld [vmem:[%s12362_s30 + $0x60] ss:$16 sps:$4 sm:$0xff]  }
 0x139   : > { %v11007_v10 = vld [vmem:[%s12362_s30 + $0x68] ss:$16 sps:$4 sm:$0xff]   ;;  %v11008_v11 = vld [vmem:[%s12362_s30 + $0x84] ss:$16 sps:$4 sm:$0xff]   ;;  %v11010_v12 = vld [vmem:[%s12362_s30 + $0x8c] ss:$16 sps:$4 sm:$0xff]  }
 0x13a   : > { %1830 = vmatpush1.bf16.msra.mxu0 %v10994_v8  ;;  %1912 = vmatpush1.bf16.msra.mxu1 %v10995_v63  ;;  %v11012_v13 = vld [vmem:[%s12362_s30 + $0x80] ss:$16 sps:$4 sm:$0xff]   ;;  %v11013_v14 = vld [vmem:[%s12362_s30 + $0x88] ss:$16 sps:$4 sm:$0xff]   ;;  %v11014_v15 = vld [vmem:[%s12362_s30 + $0xa4] ss:$16 sps:$4 sm:$0xff]  }
 0x13b   : > { %1831 = vmatprep.subr.bf16.mxu0 %v10996_v0  ;;  %1913 = vmatprep.subr.bf16.mxu1 %v10998_v1  ;;  %v11016_v16 = vld [vmem:[%s12362_s30 + $0xac] ss:$16 sps:$4 sm:$0xff]   ;;  %v11018_v17 = vld [vmem:[%s12362_s30 + $0xa0] ss:$16 sps:$4 sm:$0xff]   ;;  %v11019_v18 = vld [vmem:[%s12362_s30 + $0xa8] ss:$16 sps:$4 sm:$0xff]  }
 0x13c   : > { %v11020_v3 = vld [vmem:[%s12362_s30 + $0xc4] ss:$16 sps:$4 sm:$0xff]   ;;  %v11022_v5 = vld [vmem:[%s12362_s30 + $0xcc] ss:$16 sps:$4 sm:$0xff]   ;;  %v11024_v19 = vld [vmem:[%s12362_s30 + $0xc0] ss:$16 sps:$4 sm:$0xff]  }
 0x13d   : > { %v11025_v20 = vld [vmem:[%s12362_s30 + $0xc8] ss:$16 sps:$4 sm:$0xff]   ;;  %v11026_v21 = vld [vmem:[%s12362_s30 + $0xe4] ss:$16 sps:$4 sm:$0xff]   ;;  %v11028_v22 = vld [vmem:[%s12362_s30 + $0xec] ss:$16 sps:$4 sm:$0xff]  }
 0x13e   : > { %1832 = vmatpush1.bf16.msra.mxu0 %v11000_v2  ;;  %1914 = vmatpush1.bf16.msra.mxu1 %v11001_v4  ;;  %v11030_v23 = vld [vmem:[%s12362_s30 + $0xe0] ss:$16 sps:$4 sm:$0xff]   ;;  %v11031_v25 = vld [vmem:[%s12362_s30 + $0xe8] ss:$16 sps:$4 sm:$0xff]   ;;  %v11032_v26 = vld [vmem:[%s12362_s30 + $0x104] ss:$16 sps:$4 sm:$0xff]  }
 0x13f   : > { %1833 = vmatprep.subr.bf16.mxu0 %v11002_v6  ;;  %1915 = vmatprep.subr.bf16.mxu1 %v11004_v7  ;;  %v11034_v46 = vld [vmem:[%s12362_s30 + $0x10c] ss:$16 sps:$4 sm:$0xff]   ;;  %v11036_v28 = vld [vmem:[%s12362_s30 + $0x100] ss:$16 sps:$4 sm:$0xff]   ;;  %v11037_v29 = vld [vmem:[%s12362_s30 + $0x108] ss:$16 sps:$4 sm:$0xff]  }
 0x140   : > { %v12303_v30 = vmov 1983009808   ;;  %v11038_v33 = vld [vmem:[%s12362_s30 + $0x124] ss:$16 sps:$4 sm:$0xff]   ;;  %v11040_v34 = vld [vmem:[%s12362_s30 + $0x12c] ss:$16 sps:$4 sm:$0xff]  }
 0x141   : > { %v1299_v31 = vunpack.c.l.s4 %v12303_v30  ;;  %v11042_v35 = vld [vmem:[%s12362_s30 + $0x120] ss:$16 sps:$4 sm:$0xff]   ;;  %s10576_s10 = smul.u32 60, %s12354_s25  ;;  %v1302_v37 = vshrl.u32 %v1301_v32, 7  ;;  %v11043_v38 = vld [vmem:[%s12362_s30 + $0x128] ss:$16 sps:$4 sm:$0xff]  }
 0x142   : > { %1834 = vmatpush1.bf16.msra.mxu0 %v11006_v9  ;;  %1916 = vmatpush1.bf16.msra.mxu1 %v11007_v10  ;;  %v11044_v39 = vld [vmem:[%s12362_s30 + $0x144] ss:$16 sps:$4 sm:$0xff]   ;;  %v11046_v40 = vld [vmem:[%s12362_s30 + $0x14c] ss:$16 sps:$4 sm:$0xff]   ;;  %v11048_v41 = vld [vmem:[%s12362_s30 + $0x140] ss:$16 sps:$4 sm:$0xff]  }
 0x143   : > { %1835 = vmatprep.subr.bf16.mxu0 %v11008_v11  ;;  %1917 = vmatprep.subr.bf16.mxu1 %v11010_v12  ;;  %v1300_v36 = vunpack.c.0.s8 %v1299_v31  ;;  %v11049_v27 = vld [vmem:[%s12362_s30 + $0x148] ss:$16 sps:$4 sm:$0xff]   ;;  %v11050_v43 = vld [vmem:[%s12362_s30 + $0x164] ss:$16 sps:$4 sm:$0xff]   ;;  %v11052_v44 = vld [vmem:[%s12362_s30 + $0x16c] ss:$16 sps:$4 sm:$0xff]  }
 0x144   : > { %s12873_s11 = scalar_lea.vmem [#allocation2], %s10576_s10  ;;  %v11054_v47 = vld [vmem:[%s12362_s30 + $0x160] ss:$16 sps:$4 sm:$0xff]   ;;  %v11055_v50 = vld [vmem:[%s12362_s30 + $0x168] ss:$16 sps:$4 sm:$0xff]   ;;  %vm1823_vm12 = vcmask 654336  }
 0x145   : > { %v12869_v42 = vsub.s32 %v1300_v36, %v1302_v37  ;;  %v12876_v45 = vld [vmem:[%s12873_s11] sm:$0x3f]  ;;  %v11058_v52 = vld [vmem:[%s12362_s30 + $0x18c] ss:$16 sps:$4 sm:$0xff]   ;;  %v11061_v56 = vld [vmem:[%s12362_s30 + $0x188] ss:$16 sps:$4 sm:$0xff]  }
 0x146   : > { %1836 = vmatpush1.bf16.msra.mxu0 %v11012_v13  ;;  %1918 = vmatpush1.bf16.msra.mxu1 %v11013_v14  ;;  %v11056_v51 = vld [vmem:[%s12362_s30 + $0x184] ss:$16 sps:$4 sm:$0xff]   ;;  %v11060_v54 = vld [vmem:[%s12362_s30 + $0x180] ss:$16 sps:$4 sm:$0xff]   ;;  %v11064_v58 = vld [vmem:[%s12362_s30 + $0x1ac] ss:$16 sps:$4 sm:$0xff]  }
 0x147   : > { %1837 = vmatprep.subr.bf16.mxu0 %v11014_v15  ;;  %1919 = vmatprep.subr.bf16.mxu1 %v11016_v16  ;;  %v1304_v48 = vrot.slane %v12876_v45, %v12869_v42  ;;  %v11062_v57 = vld [vmem:[%s12362_s30 + $0x1a4] ss:$16 sps:$4 sm:$0xff]   ;;  %v11066_v24 = vld [vmem:[%s12362_s30 + $0x1a0] ss:$16 sps:$4 sm:$0xff]   ;;  %v11067_v59 = vld [vmem:[%s12362_s30 + $0x1a8] ss:$16 sps:$4 sm:$0xff]  }
 0x148   : > { %v11068_v60 = vld [vmem:[%s12362_s30 + $0x1c4] ss:$16 sps:$4 sm:$0xff]   ;;  %v11070_v61 = vld [vmem:[%s12362_s30 + $0x1cc] ss:$16 sps:$4 sm:$0xff]   ;;  %v11072_v49 = vld [vmem:[%s12362_s30 + $0x1c0] ss:$16 sps:$4 sm:$0xff]  }
 0x149   : > { %v1312_v53 = vcombine.high %v1304_v48, %v1304_v48  ;;  %v11073_v62 = vld [vmem:[%s12362_s30 + $0x1c8] ss:$16 sps:$4 sm:$0xff]   ;;  %v11074_v8 = vld [vmem:[%s12362_s30 + $0x1e4] ss:$16 sps:$4 sm:$0xff]   ;;  %v11076_v63 = vld [vmem:[%s12362_s30 + $0x1ec] ss:$16 sps:$4 sm:$0xff]   ;;  %v1316_v7 = vpack.c.bf16 %v1304_v48, %v1304_v48 }
 0x14a   : > { %1838 = vmatpush1.bf16.msra.mxu0 %v11018_v17  ;;  %1920 = vmatpush1.bf16.msra.mxu1 %v11019_v18  ;;  %v11078_v0 = vld [vmem:[%s12362_s30 + $0x1e0] ss:$16 sps:$4 sm:$0xff]   ;;  %v11079_v1 = vld [vmem:[%s12362_s30 + $0x1e8] ss:$16 sps:$4 sm:$0xff]   ;;  %v11083_v2 = vld [vmem:[%s12362_s30 + $0x204] ss:$16 sps:$4 sm:$0xff]  }
 0x14b   : > { %1839 = vmatprep.subr.bf16.mxu0 %v11020_v3  ;;  %1921 = vmatprep.subr.bf16.mxu1 %v11022_v5  ;;  %v1317_v55 = vpack.c.bf16 %v1312_v53, %v1312_v53  ;;  %v11086_v4 = vld [vmem:[%s12362_s30 + $0x20c] ss:$16 sps:$4 sm:$0xff]   ;;  %v11081_v6 = vld [vmem:[%s12362_s30 + $0x200] ss:$16 sps:$4 sm:$0xff]   ;;  %v11084_v9 = vld [vmem:[%s12362_s30 + $0x208] ss:$16 sps:$4 sm:$0xff]  }
 0x14c   : > { %v11089_v10 = vld [vmem:[%s12362_s30 + $0x224] ss:$16 sps:$4 sm:$0xff]   ;;  %v11092_v11 = vld [vmem:[%s12362_s30 + $0x22c] ss:$16 sps:$4 sm:$0xff]   ;;  %v11087_v12 = vld [vmem:[%s12362_s30 + $0x220] ss:$16 sps:$4 sm:$0xff]  }
 0x14d   : > { %1859 = vmatprep.mubr.bf16.mxu0 %v1317_v55  ;;  %1941 = vmatprep.mubr.bf16.mxu1 %v1317_v55  ;;  %v11090_v13 = vld [vmem:[%s12362_s30 + $0x228] ss:$16 sps:$4 sm:$0xff]   ;;  %v11095_v14 = vld [vmem:[%s12362_s30 + $0x244] ss:$16 sps:$4 sm:$0xff]   ;;  %v11098_v15 = vld [vmem:[%s12362_s30 + $0x24c] ss:$16 sps:$4 sm:$0xff]  }
 0x14e   : > { %1840 = vmatpush1.bf16.msra.mxu0 %v11024_v19  ;;  %1922 = vmatpush1.bf16.msra.mxu1 %v11025_v20  ;;  %v12304_v16 = vmov 0   ;;  %v11093_v17 = vld [vmem:[%s12362_s30 + $0x240] ss:$16 sps:$4 sm:$0xff]   ;;  %v11096_v18 = vld [vmem:[%s12362_s30 + $0x248] ss:$16 sps:$4 sm:$0xff]   ;;  %v1297_v19 = vcombine.high %v12876_v45, %v12876_v45  ;;  %vm8521_vm13 = vcmask 1041408  }
 0x14f   : > { %1841 = vmatprep.subr.bf16.mxu0 %v11026_v21  ;;  %1923 = vmatprep.subr.bf16.mxu1 %v11028_v22  ;;  %v11101_v3 = vld [vmem:[%s12362_s30 + $0x264] ss:$16 sps:$4 sm:$0xff]   ;;  %v11104_v5 = vld [vmem:[%s12362_s30 + $0x26c] ss:$16 sps:$4 sm:$0xff]   ;;  %v11099_v20 = vld [vmem:[%s12362_s30 + $0x260] ss:$16 sps:$4 sm:$0xff]  }
 0x150   : > { %v11102_v21 = vld [vmem:[%s12362_s30 + $0x268] ss:$16 sps:$4 sm:$0xff]   ;;  %v11107_v22 = vld [vmem:[%s12362_s30 + $0x284] ss:$16 sps:$4 sm:$0xff]   ;;  %v11111_v31 = vld [vmem:[%s12362_s30 + $0x2a0] ss:$16 sps:$4 sm:$0xff]  }
 0x151   : > { %v11114_v32 = vld [vmem:[%s12362_s30 + $0x2a8] ss:$16 sps:$4 sm:$0xff]   ;;  %v11125_v37 = vld [vmem:[%s12362_s30 + $0x2e4] ss:$16 sps:$4 sm:$0xff]   ;;  %vm8522_vm14 = vcmask 1043458   ;;  %vm8524_vm0 = vcmask 1045508  }
 0x152   : > { %1842 = vmatpush1.bf16.msra.mxu0 %v11030_v23  ;;  %1924 = vmatpush1.bf16.msra.mxu1 %v11031_v25  ;;  %v11110_v23 = vld [vmem:[%s12362_s30 + $0x28c] ss:$16 sps:$4 sm:$0xff]   ;;  %v1311_v25 = vrot.slane %v1297_v19, %v12869_v42  ;;  %v11120_v36 = vld [vmem:[%s12362_s30 + $0x2c8] ss:$16 sps:$4 sm:$0xff]   ;;  %v11137_v45 = vld [vmem:[%s12362_s30 + $0x324] ss:$16 sps:$4 sm:$0xff]  }
 0x153   : > { %1843 = vmatprep.subr.bf16.mxu0 %v11032_v26  ;;  %1925 = vmatprep.subr.bf16.mxu1 %v11034_v46  ;;  %v11105_v26 = vld [vmem:[%s12362_s30 + $0x280] ss:$16 sps:$4 sm:$0xff]   ;;  %v11108_v46 = vld [vmem:[%s12362_s30 + $0x288] ss:$16 sps:$4 sm:$0xff]   ;;  %v11143_v53 = vld [vmem:[%s12362_s30 + $0x344] ss:$16 sps:$4 sm:$0xff]  }
 0x154   : > { %v1318_v30 = vpack.c.bf16 %v1311_v25, %v1311_v25  ;;  %v12944_v48 = vld [vmem:[%s12873_s11 + $0x6] sm:$0x3f]  ;;  %v11188_v19 = vld [vmem:[%s12362_s30 + $0x42c] ss:$16 sps:$4 sm:$0xff]   ;;  %v11189_v25 = vld [vmem:[%s12362_s30 + $0x440] ss:$16 sps:$4 sm:$0xff]  }
 0x155   : > { %vm8523_vm15 = vmor %vm8522_vm14, %vm8521_vm13  ;;  %vm8526_vm2 = vcmask 949254   ;;  %p10568_p5 = scmp.ne.s32.totalorder %s12354_s25, 1 }
 0x156   : > { %1844 = vmatpush1.bf16.msra.mxu0 %v11036_v28  ;;  %1926 = vmatpush1.bf16.msra.mxu1 %v11037_v29  ;;  %v11113_v28 = vld [vmem:[%s12362_s30 + $0x2a4] ss:$16 sps:$4 sm:$0xff]   ;;  %v11116_v29 = vld [vmem:[%s12362_s30 + $0x2ac] ss:$16 sps:$4 sm:$0xff]   ;;  %vm8525_vm1 = vmor %vm8524_vm0, %vm8523_vm15  ;;  %vm8626_vm4 = vcmask (!%p10568_p5), 949248   ;;  %vm8629_vm5 = vcmask (!%p10568_p5), 1043456  }
 0x157   : > { %1845 = vmatprep.subr.bf16.mxu0 %v11038_v33  ;;  %1927 = vmatprep.subr.bf16.mxu1 %v11040_v34  ;;  %v11119_v33 = vld [vmem:[%s12362_s30 + $0x2c4] ss:$16 sps:$4 sm:$0xff]   ;;  %v11122_v34 = vld [vmem:[%s12362_s30 + $0x2cc] ss:$16 sps:$4 sm:$0xff]   ;;  %vm8527_vm3 = vmor %vm8526_vm2, %vm8525_vm1  ;;  %vm8773_vm6 = vcmask (!%p10568_p5), 66560  }
 0x15a   : > { %1846 = vmatpush1.bf16.msra.mxu0 %v11042_v35  ;;  %1928 = vmatpush1.bf16.msra.mxu1 %v11043_v38  ;;  %v11117_v35 = vld [vmem:[%s12362_s30 + $0x2c0] ss:$16 sps:$4 sm:$0xff]   ;;  %v11128_v38 = vld [vmem:[%s12362_s30 + $0x2ec] ss:$16 sps:$4 sm:$0xff]  }
 0x15b   : > { %1847 = vmatprep.subr.bf16.mxu0 %v11044_v39  ;;  %1929 = vmatprep.subr.bf16.mxu1 %v11046_v40  ;;  %v11123_v39 = vld [vmem:[%s12362_s30 + $0x2e0] ss:$16 sps:$4 sm:$0xff]   ;;  %v11126_v40 = vld [vmem:[%s12362_s30 + $0x2e8] ss:$16 sps:$4 sm:$0xff]  }
 0x15e   : > { %1848 = vmatpush1.bf16.msra.mxu0 %v11048_v41  ;;  %1930 = vmatpush1.bf16.msra.mxu1 %v11049_v27  ;;  %v11131_v41 = vld [vmem:[%s12362_s30 + $0x304] ss:$16 sps:$4 sm:$0xff]   ;;  %v11134_v27 = vld [vmem:[%s12362_s30 + $0x30c] ss:$16 sps:$4 sm:$0xff]  }
 0x15f   : > { %1849 = vmatprep.subr.bf16.mxu0 %v11050_v43  ;;  %1931 = vmatprep.subr.bf16.mxu1 %v11052_v44  ;;  %v11129_v43 = vld [vmem:[%s12362_s30 + $0x300] ss:$16 sps:$4 sm:$0xff]   ;;  %v11132_v44 = vld [vmem:[%s12362_s30 + $0x308] ss:$16 sps:$4 sm:$0xff]  }
 0x162   : > { %1850 = vmatpush1.bf16.msra.mxu0 %v11054_v47  ;;  %1932 = vmatpush1.bf16.msra.mxu1 %v11055_v50  ;;  %v11140_v47 = vld [vmem:[%s12362_s30 + $0x32c] ss:$16 sps:$4 sm:$0xff]   ;;  %v11135_v50 = vld [vmem:[%s12362_s30 + $0x320] ss:$16 sps:$4 sm:$0xff]  }
 0x163   : > { %1851 = vmatprep.subr.bf16.mxu0 %v11056_v51  ;;  %1933 = vmatprep.subr.bf16.mxu1 %v11058_v52  ;;  %v11138_v51 = vld [vmem:[%s12362_s30 + $0x328] ss:$16 sps:$4 sm:$0xff]   ;;  %v12950_v52 = vrot.slane %v12944_v48, %v12869_v42 }
 0x165   : > { %v2035_v55 = vcombine.high %v12950_v52, %v12950_v52 }
 0x166   : > { %1852 = vmatpush1.bf16.msra.mxu0 %v11060_v54  ;;  %1934 = vmatpush1.bf16.msra.mxu1 %v11061_v56  ;;  %v11146_v54 = vld [vmem:[%s12362_s30 + $0x34c] ss:$16 sps:$4 sm:$0xff]   ;;  %v11141_v56 = vld [vmem:[%s12362_s30 + $0x340] ss:$16 sps:$4 sm:$0xff]  }
 0x167   : > { %1853 = vmatprep.subr.bf16.mxu0 %v11062_v57  ;;  %1935 = vmatprep.subr.bf16.mxu1 %v11064_v58  ;;  %v11144_v57 = vld [vmem:[%s12362_s30 + $0x348] ss:$16 sps:$4 sm:$0xff]   ;;  %v2040_v58 = vpack.c.bf16 %v2035_v55, %v2035_v55  ;;  %v13020_v55 = vld [vmem:[%s12873_s11 + $0xc] sm:$0x3f] }
 0x16a   : > { %1854 = vmatpush1.bf16.msra.mxu0 %v11066_v24  ;;  %1936 = vmatpush1.bf16.msra.mxu1 %v11067_v59  ;;  %v11149_v24 = vld [vmem:[%s12362_s30 + $0x364] ss:$16 sps:$4 sm:$0xff]   ;;  %v11152_v59 = vld [vmem:[%s12362_s30 + $0x36c] ss:$16 sps:$4 sm:$0xff]  }
 0x16b   : > { %1855 = vmatprep.subr.bf16.mxu0 %v11068_v60  ;;  %1937 = vmatprep.subr.bf16.mxu1 %v11070_v61  ;;  %v11147_v60 = vld [vmem:[%s12362_s30 + $0x360] ss:$16 sps:$4 sm:$0xff]   ;;  %v11150_v61 = vld [vmem:[%s12362_s30 + $0x368] ss:$16 sps:$4 sm:$0xff]  }
 0x16e   : > { %1856 = vmatpush1.bf16.msra.mxu0 %v11072_v49  ;;  %1938 = vmatpush1.bf16.msra.mxu1 %v11073_v62  ;;  %v11155_v49 = vld [vmem:[%s12362_s30 + $0x384] ss:$16 sps:$4 sm:$0xff]   ;;  %v11158_v62 = vld [vmem:[%s12362_s30 + $0x38c] ss:$16 sps:$4 sm:$0xff]  }
 0x16f   : > { %1857 = vmatprep.subr.bf16.mxu0 %v11074_v8  ;;  %1939 = vmatprep.subr.bf16.mxu1 %v11076_v63  ;;  %v11153_v8 = vld [vmem:[%s12362_s30 + $0x380] ss:$16 sps:$4 sm:$0xff]   ;;  %v11156_v63 = vld [vmem:[%s12362_s30 + $0x388] ss:$16 sps:$4 sm:$0xff]  }
 0x172   : > { %1858 = vmatpush1.bf16.msra.mxu0 %v11078_v0  ;;  %1940 = vmatpush1.bf16.msra.mxu1 %v11079_v1  ;;  %v11161_v0 = vld [vmem:[%s12362_s30 + $0x3a4] ss:$16 sps:$4 sm:$0xff]   ;;  %v11164_v1 = vld [vmem:[%s12362_s30 + $0x3ac] ss:$16 sps:$4 sm:$0xff]  }
 0x173   : > { %1868 = vmatprep.subr.bf16.mxu0 %v11083_v2  ;;  %1950 = vmatprep.subr.bf16.mxu1 %v11086_v4  ;;  %v11159_v2 = vld [vmem:[%s12362_s30 + $0x3a0] ss:$16 sps:$4 sm:$0xff]   ;;  %v11162_v4 = vld [vmem:[%s12362_s30 + $0x3a8] ss:$16 sps:$4 sm:$0xff]  }
 0x175   : > { %1860 = vmatmul.mubr.bf16.vlgmr.msra.gmra.mrb[0].mxu0 %v1316_v7  ;;  %1942 = vmatmul.mubr.bf16.vlgmr.msra.gmra.mrb[0].mxu1 %v1316_v7  ;;  %v11170_v7 = vld [vmem:[%s12362_s30 + $0x3cc] ss:$16 sps:$4 sm:$0xff]  }
 0x176   : > { %1869 = vmatpush1.bf16.msra.mxu0 %v11081_v6  ;;  %1951 = vmatpush1.bf16.msra.mxu1 %v11084_v9  ;;  %v11167_v6 = vld [vmem:[%s12362_s30 + $0x3c4] ss:$16 sps:$4 sm:$0xff]   ;;  %v11165_v9 = vld [vmem:[%s12362_s30 + $0x3c0] ss:$16 sps:$4 sm:$0xff]  }
 0x177   : > { %1870 = vmatprep.subr.bf16.mxu0 %v11089_v10  ;;  %1952 = vmatprep.subr.bf16.mxu1 %v11092_v11  ;;  %v11168_v10 = vld [vmem:[%s12362_s30 + $0x3c8] ss:$16 sps:$4 sm:$0xff]   ;;  %v11173_v11 = vld [vmem:[%s12362_s30 + $0x3e4] ss:$16 sps:$4 sm:$0xff]  }
 0x178   : > { %1900 = vmatprep.mubr.bf16.mxu0 %v12304_v16  ;;  %1982 = vmatprep.mubr.bf16.mxu1 %v12304_v16 }
 0x17a   : > { %1871 = vmatpush1.bf16.msra.mxu0 %v11087_v12  ;;  %1953 = vmatpush1.bf16.msra.mxu1 %v11090_v13  ;;  %v11176_v12 = vld [vmem:[%s12362_s30 + $0x3ec] ss:$16 sps:$4 sm:$0xff]   ;;  %v11171_v13 = vld [vmem:[%s12362_s30 + $0x3e0] ss:$16 sps:$4 sm:$0xff]  }
 0x17b   : > { %1872 = vmatprep.subr.bf16.mxu0 %v11095_v14  ;;  %1954 = vmatprep.subr.bf16.mxu1 %v11098_v15  ;;  %v11174_v14 = vld [vmem:[%s12362_s30 + $0x3e8] ss:$16 sps:$4 sm:$0xff]   ;;  %v11179_v15 = vld [vmem:[%s12362_s30 + $0x404] ss:$16 sps:$4 sm:$0xff]  }
 0x17e   : > { %1873 = vmatpush1.bf16.msra.mxu0 %v11093_v17  ;;  %1955 = vmatpush1.bf16.msra.mxu1 %v11096_v18  ;;  %v11182_v17 = vld [vmem:[%s12362_s30 + $0x40c] ss:$16 sps:$4 sm:$0xff]   ;;  %v11177_v18 = vld [vmem:[%s12362_s30 + $0x400] ss:$16 sps:$4 sm:$0xff]  }
 0x17f   : > { %1874 = vmatprep.subr.bf16.mxu0 %v11101_v3  ;;  %1956 = vmatprep.subr.bf16.mxu1 %v11104_v5  ;;  %v11180_v3 = vld [vmem:[%s12362_s30 + $0x408] ss:$16 sps:$4 sm:$0xff]   ;;  %v11185_v5 = vld [vmem:[%s12362_s30 + $0x424] ss:$16 sps:$4 sm:$0xff]  }
 0x182   : > { %1875 = vmatpush1.bf16.msra.mxu0 %v11099_v20  ;;  %1957 = vmatpush1.bf16.msra.mxu1 %v11102_v21  ;;  %v11183_v20 = vld [vmem:[%s12362_s30 + $0x420] ss:$16 sps:$4 sm:$0xff]   ;;  %v11186_v21 = vld [vmem:[%s12362_s30 + $0x428] ss:$16 sps:$4 sm:$0xff]  }
 0x183   : > { %1876 = vmatprep.subr.bf16.mxu0 %v11107_v22  ;;  %1958 = vmatprep.subr.bf16.mxu1 %v11110_v23  ;;  %v11191_v22 = vld [vmem:[%s12362_s30 + $0x444] ss:$16 sps:$4 sm:$0xff]   ;;  %v11194_v23 = vld [vmem:[%s12362_s30 + $0x44c] ss:$16 sps:$4 sm:$0xff]  }
 0x186   : > { %1877 = vmatpush1.bf16.msra.mxu0 %v11105_v26  ;;  %1959 = vmatpush1.bf16.msra.mxu1 %v11108_v46  ;;  %v11192_v26 = vld [vmem:[%s12362_s30 + $0x448] ss:$16 sps:$4 sm:$0xff]   ;;  %v11197_v46 = vld [vmem:[%s12362_s30 + $0x464] ss:$16 sps:$4 sm:$0xff]  }
 0x187   : > { %2550 = vmatprep.subr.bf16.mxu0 %v11113_v28  ;;  %2632 = vmatprep.subr.bf16.mxu1 %v11116_v29  ;;  %v11200_v28 = vld [vmem:[%s12362_s30 + $0x46c] ss:$16 sps:$4 sm:$0xff]   ;;  %v11195_v29 = vld [vmem:[%s12362_s30 + $0x460] ss:$16 sps:$4 sm:$0xff]  }
 0x189   : > { %9018 = vmatmul.mubr.msk.bf16.vlgmr.msra.gmra.mrb[0].mxu0 %vm1823_vm12, %v1318_v30  ;;  %9019 = vmatmul.mubr.msk.bf16.vlgmr.msra.gmra.mrb[0].mxu1 %vm1823_vm12, %v1318_v30  ;;  %v11198_v30 = vld [vmem:[%s12362_s30 + $0x468] ss:$16 sps:$4 sm:$0xff]  }
 0x18a   : > { %2551 = vmatpush1.bf16.msra.mxu0 %v11111_v31  ;;  %2633 = vmatpush1.bf16.msra.mxu1 %v11114_v32  ;;  %v11203_v31 = vld [vmem:[%s12362_s30 + $0x484] ss:$16 sps:$4 sm:$0xff]   ;;  %v11206_v32 = vld [vmem:[%s12362_s30 + $0x48c] ss:$16 sps:$4 sm:$0xff]  }
 0x18b   : > { %2552 = vmatprep.subr.bf16.mxu0 %v11119_v33  ;;  %2634 = vmatprep.subr.bf16.mxu1 %v11122_v34  ;;  %v11201_v33 = vld [vmem:[%s12362_s30 + $0x480] ss:$16 sps:$4 sm:$0xff]   ;;  %v11204_v34 = vld [vmem:[%s12362_s30 + $0x488] ss:$16 sps:$4 sm:$0xff]  }
 0x18c   : > { %2582 = vmatprep.mubr.bf16.mxu0 %v2040_v58  ;;  %2664 = vmatprep.mubr.bf16.mxu1 %v2040_v58  ;;  %v11237_v58 = vld [vmem:[%s12362_s30 + $0x52c] ss:$16 sps:$4 sm:$0xff]  }
 0x18e   : > { %2553 = vmatpush1.bf16.msra.mxu0 %v11117_v35  ;;  %2635 = vmatpush1.bf16.msra.mxu1 %v11120_v36  ;;  %v11210_v35 = vld [vmem:[%s12362_s30 + $0x4a4] ss:$16 sps:$4 sm:$0xff]   ;;  %v11213_v36 = vld [vmem:[%s12362_s30 + $0x4ac] ss:$16 sps:$4 sm:$0xff]  }
 0x18f   : > { %2554 = vmatprep.subr.bf16.mxu0 %v11125_v37  ;;  %2636 = vmatprep.subr.bf16.mxu1 %v11128_v38  ;;  %v2039_v37 = vpack.c.bf16 %v12950_v52, %v12950_v52  ;;  %v11208_v38 = vld [vmem:[%s12362_s30 + $0x4a0] ss:$16 sps:$4 sm:$0xff]   ;;  %v11231_v52 = vld [vmem:[%s12362_s30 + $0x50c] ss:$16 sps:$4 sm:$0xff]  }
 0x192   : > { %2555 = vmatpush1.bf16.msra.mxu0 %v11123_v39  ;;  %2637 = vmatpush1.bf16.msra.mxu1 %v11126_v40  ;;  %v11211_v39 = vld [vmem:[%s12362_s30 + $0x4a8] ss:$16 sps:$4 sm:$0xff]   ;;  %v11216_v40 = vld [vmem:[%s12362_s30 + $0x4c4] ss:$16 sps:$4 sm:$0xff]  }
 0x193   : > { %2556 = vmatprep.subr.bf16.mxu0 %v11131_v41  ;;  %2638 = vmatprep.subr.bf16.mxu1 %v11134_v27  ;;  %v11219_v41 = vld [vmem:[%s12362_s30 + $0x4cc] ss:$16 sps:$4 sm:$0xff]   ;;  %v11214_v27 = vld [vmem:[%s12362_s30 + $0x4c0] ss:$16 sps:$4 sm:$0xff]  }
 0x196   : > { %2557 = vmatpush1.bf16.msra.mxu0 %v11129_v43  ;;  %2639 = vmatpush1.bf16.msra.mxu1 %v11132_v44  ;;  %v11217_v43 = vld [vmem:[%s12362_s30 + $0x4c8] ss:$16 sps:$4 sm:$0xff]   ;;  %v11222_v44 = vld [vmem:[%s12362_s30 + $0x4e4] ss:$16 sps:$4 sm:$0xff]  }
 0x197   : > { %2558 = vmatprep.subr.bf16.mxu0 %v11137_v45  ;;  %2640 = vmatprep.subr.bf16.mxu1 %v11140_v47  ;;  %v11225_v45 = vld [vmem:[%s12362_s30 + $0x4ec] ss:$16 sps:$4 sm:$0xff]   ;;  %v11220_v47 = vld [vmem:[%s12362_s30 + $0x4e0] ss:$16 sps:$4 sm:$0xff]  }
 0x19a   : > { %2559 = vmatpush1.bf16.msra.mxu0 %v11135_v50  ;;  %2641 = vmatpush1.bf16.msra.mxu1 %v11138_v51  ;;  %v11223_v50 = vld [vmem:[%s12362_s30 + $0x4e8] ss:$16 sps:$4 sm:$0xff]   ;;  %v11228_v51 = vld [vmem:[%s12362_s30 + $0x504] ss:$16 sps:$4 sm:$0xff]  }
 0x19b   : > { %2560 = vmatprep.subr.bf16.mxu0 %v11143_v53  ;;  %2642 = vmatprep.subr.bf16.mxu1 %v11146_v54  ;;  %v2020_v53 = vcombine.high %v12944_v48, %v12944_v48  ;;  %v11226_v54 = vld [vmem:[%s12362_s30 + $0x500] ss:$16 sps:$4 sm:$0xff]  }
 0x19d   : > { %v2034_v48 = vrot.slane %v2020_v53, %v12869_v42  ;;  %v11315_v53 = vld [vmem:[%s12362_s30 + $0x6cc] ss:$16 sps:$4 sm:$0xff]  }
 0x19e   : > { %2561 = vmatpush1.bf16.msra.mxu0 %v11141_v56  ;;  %2643 = vmatpush1.bf16.msra.mxu1 %v11144_v57  ;;  %v11229_v56 = vld [vmem:[%s12362_s30 + $0x508] ss:$16 sps:$4 sm:$0xff]   ;;  %v11234_v57 = vld [vmem:[%s12362_s30 + $0x524] ss:$16 sps:$4 sm:$0xff]  }
 0x19f   : > { %2562 = vmatprep.subr.bf16.mxu0 %v11149_v24  ;;  %2644 = vmatprep.subr.bf16.mxu1 %v11152_v59  ;;  %v13027_v24 = vrot.slane %v13020_v55, %v12869_v42  ;;  %v11232_v59 = vld [vmem:[%s12362_s30 + $0x520] ss:$16 sps:$4 sm:$0xff]  }
 0x1a2   : > { %2563 = vmatpush1.bf16.msra.mxu0 %v11147_v60  ;;  %2645 = vmatpush1.bf16.msra.mxu1 %v11150_v61  ;;  %v11235_v60 = vld [vmem:[%s12362_s30 + $0x528] ss:$16 sps:$4 sm:$0xff]   ;;  %v11240_v61 = vld [vmem:[%s12362_s30 + $0x544] ss:$16 sps:$4 sm:$0xff]  }
 0x1a3   : > { %2564 = vmatprep.subr.bf16.mxu0 %v11155_v49  ;;  %2646 = vmatprep.subr.bf16.mxu1 %v11158_v62  ;;  %v11243_v49 = vld [vmem:[%s12362_s30 + $0x54c] ss:$16 sps:$4 sm:$0xff]   ;;  %v2758_v62 = vcombine.high %v13027_v24, %v13027_v24 }
 0x1a6   : > { %2565 = vmatpush1.bf16.msra.mxu0 %v11153_v8  ;;  %2647 = vmatpush1.bf16.msra.mxu1 %v11156_v63  ;;  %v2041_v8 = vpack.c.bf16 %v2034_v48, %v2034_v48  ;;  %v11238_v63 = vld [vmem:[%s12362_s30 + $0x540] ss:$16 sps:$4 sm:$0xff]  }
 0x1a7   : > { %2566 = vmatprep.subr.bf16.mxu0 %v11161_v0  ;;  %2648 = vmatprep.subr.bf16.mxu1 %v11164_v1  ;;  %v11241_v0 = vld [vmem:[%s12362_s30 + $0x548] ss:$16 sps:$4 sm:$0xff]   ;;  %v11246_v1 = vld [vmem:[%s12362_s30 + $0x564] ss:$16 sps:$4 sm:$0xff]   ;;  %v11316_v48 = vld [vmem:[%s12362_s30 + $0x6e0] ss:$16 sps:$4 sm:$0xff]  }
 0x1aa   : > { %2567 = vmatpush1.bf16.msra.mxu0 %v11159_v2  ;;  %2649 = vmatpush1.bf16.msra.mxu1 %v11162_v4  ;;  %v11249_v2 = vld [vmem:[%s12362_s30 + $0x56c] ss:$16 sps:$4 sm:$0xff]   ;;  %v2763_v4 = vpack.c.bf16 %v2758_v62, %v2758_v62  ;;  %v11325_v62 = vld [vmem:[%s12362_s30 + $0x708] ss:$16 sps:$4 sm:$0xff]  }
 0x1ab   : > { %2568 = vmatprep.subr.bf16.mxu0 %v11167_v6  ;;  %2650 = vmatprep.subr.bf16.mxu1 %v11170_v7  ;;  %v11244_v6 = vld [vmem:[%s12362_s30 + $0x560] ss:$16 sps:$4 sm:$0xff]   ;;  %v11247_v7 = vld [vmem:[%s12362_s30 + $0x568] ss:$16 sps:$4 sm:$0xff]  }
 0x1ae   : > { %2569 = vmatpush1.bf16.msra.mxu0 %v11165_v9  ;;  %2651 = vmatpush1.bf16.msra.mxu1 %v11168_v10  ;;  %v11252_v9 = vld [vmem:[%s12362_s30 + $0x584] ss:$16 sps:$4 sm:$0xff]   ;;  %v11255_v10 = vld [vmem:[%s12362_s30 + $0x58c] ss:$16 sps:$4 sm:$0xff]  }
 0x1af   : > { %2570 = vmatprep.subr.bf16.mxu0 %v11173_v11  ;;  %2652 = vmatprep.subr.bf16.mxu1 %v11176_v12  ;;  %v11250_v11 = vld [vmem:[%s12362_s30 + $0x580] ss:$16 sps:$4 sm:$0xff]   ;;  %v11253_v12 = vld [vmem:[%s12362_s30 + $0x588] ss:$16 sps:$4 sm:$0xff]  }
 0x1b2   : > { %2571 = vmatpush1.bf16.msra.mxu0 %v11171_v13  ;;  %2653 = vmatpush1.bf16.msra.mxu1 %v11174_v14  ;;  %v11258_v13 = vld [vmem:[%s12362_s30 + $0x5a4] ss:$16 sps:$4 sm:$0xff]   ;;  %v11261_v14 = vld [vmem:[%s12362_s30 + $0x5ac] ss:$16 sps:$4 sm:$0xff]  }
 0x1b3   : > { %2572 = vmatprep.subr.bf16.mxu0 %v11179_v15  ;;  %2654 = vmatprep.subr.bf16.mxu1 %v11182_v17  ;;  %v11256_v15 = vld [vmem:[%s12362_s30 + $0x5a0] ss:$16 sps:$4 sm:$0xff]   ;;  %v11259_v17 = vld [vmem:[%s12362_s30 + $0x5a8] ss:$16 sps:$4 sm:$0xff]  }
 0x1b6   : > { %2573 = vmatpush1.bf16.msra.mxu0 %v11177_v18  ;;  %2655 = vmatpush1.bf16.msra.mxu1 %v11180_v3  ;;  %v11264_v18 = vld [vmem:[%s12362_s30 + $0x5c4] ss:$16 sps:$4 sm:$0xff]   ;;  %v11267_v3 = vld [vmem:[%s12362_s30 + $0x5cc] ss:$16 sps:$4 sm:$0xff]  }
 0x1b7   : > { %2574 = vmatprep.subr.bf16.mxu0 %v11185_v5  ;;  %2656 = vmatprep.subr.bf16.mxu1 %v11188_v19  ;;  %v11262_v5 = vld [vmem:[%s12362_s30 + $0x5c0] ss:$16 sps:$4 sm:$0xff]   ;;  %v11265_v19 = vld [vmem:[%s12362_s30 + $0x5c8] ss:$16 sps:$4 sm:$0xff]  }
 0x1ba   : > { %2575 = vmatpush1.bf16.msra.mxu0 %v11183_v20  ;;  %2657 = vmatpush1.bf16.msra.mxu1 %v11186_v21  ;;  %v11270_v20 = vld [vmem:[%s12362_s30 + $0x5e4] ss:$16 sps:$4 sm:$0xff]   ;;  %v11273_v21 = vld [vmem:[%s12362_s30 + $0x5ec] ss:$16 sps:$4 sm:$0xff]  }
 0x1bb   : > { %2576 = vmatprep.subr.bf16.mxu0 %v11191_v22  ;;  %2658 = vmatprep.subr.bf16.mxu1 %v11194_v23  ;;  %v11268_v22 = vld [vmem:[%s12362_s30 + $0x5e0] ss:$16 sps:$4 sm:$0xff]   ;;  %v11271_v23 = vld [vmem:[%s12362_s30 + $0x5e8] ss:$16 sps:$4 sm:$0xff]  }
 0x1be   : > { %2577 = vmatpush1.bf16.msra.mxu0 %v11189_v25  ;;  %2659 = vmatpush1.bf16.msra.mxu1 %v11192_v26  ;;  %v11276_v25 = vld [vmem:[%s12362_s30 + $0x604] ss:$16 sps:$4 sm:$0xff]   ;;  %v11279_v26 = vld [vmem:[%s12362_s30 + $0x60c] ss:$16 sps:$4 sm:$0xff]  }
 0x1bf   : > { %2578 = vmatprep.subr.bf16.mxu0 %v11197_v46  ;;  %2660 = vmatprep.subr.bf16.mxu1 %v11200_v28  ;;  %v11274_v46 = vld [vmem:[%s12362_s30 + $0x600] ss:$16 sps:$4 sm:$0xff]   ;;  %v11277_v28 = vld [vmem:[%s12362_s30 + $0x608] ss:$16 sps:$4 sm:$0xff]  }
 0x1c2   : > { %2579 = vmatpush1.bf16.msra.mxu0 %v11195_v29  ;;  %2661 = vmatpush1.bf16.msra.mxu1 %v11198_v30  ;;  %v11282_v29 = vld [vmem:[%s12362_s30 + $0x624] ss:$16 sps:$4 sm:$0xff]   ;;  %v11285_v30 = vld [vmem:[%s12362_s30 + $0x62c] ss:$16 sps:$4 sm:$0xff]  }
 0x1c3   : > { %2580 = vmatprep.subr.bf16.mxu0 %v11203_v31  ;;  %2662 = vmatprep.subr.bf16.mxu1 %v11206_v32  ;;  %v11280_v31 = vld [vmem:[%s12362_s30 + $0x620] ss:$16 sps:$4 sm:$0xff]   ;;  %v11283_v32 = vld [vmem:[%s12362_s30 + $0x628] ss:$16 sps:$4 sm:$0xff]  }
 0x1c6   : > { %2581 = vmatpush1.bf16.msra.mxu0 %v11201_v33  ;;  %2663 = vmatpush1.bf16.msra.mxu1 %v11204_v34  ;;  %v11288_v33 = vld [vmem:[%s12362_s30 + $0x644] ss:$16 sps:$4 sm:$0xff]   ;;  %v11291_v34 = vld [vmem:[%s12362_s30 + $0x64c] ss:$16 sps:$4 sm:$0xff]  }
 0x1c7   : > { %2591 = vmatprep.subr.bf16.mxu0 %v11210_v35  ;;  %2673 = vmatprep.subr.bf16.mxu1 %v11213_v36  ;;  %v11286_v35 = vld [vmem:[%s12362_s30 + $0x640] ss:$16 sps:$4 sm:$0xff]   ;;  %v11289_v36 = vld [vmem:[%s12362_s30 + $0x648] ss:$16 sps:$4 sm:$0xff]  }
 0x1c9   : > { %2583 = vmatmul.mubr.bf16.vlgmr.msra.gmra.mrb[4].mxu0 %v2039_v37  ;;  %2665 = vmatmul.mubr.bf16.vlgmr.msra.gmra.mrb[4].mxu1 %v2039_v37  ;;  %v11294_v37 = vld [vmem:[%s12362_s30 + $0x664] ss:$16 sps:$4 sm:$0xff]  }
 0x1ca   : > { %2592 = vmatpush1.bf16.msra.mxu0 %v11208_v38  ;;  %2674 = vmatpush1.bf16.msra.mxu1 %v11211_v39  ;;  %v11297_v38 = vld [vmem:[%s12362_s30 + $0x66c] ss:$16 sps:$4 sm:$0xff]   ;;  %v11292_v39 = vld [vmem:[%s12362_s30 + $0x660] ss:$16 sps:$4 sm:$0xff]  }
 0x1cb   : > { %2593 = vmatprep.subr.bf16.mxu0 %v11216_v40  ;;  %2675 = vmatprep.subr.bf16.mxu1 %v11219_v41  ;;  %v11295_v40 = vld [vmem:[%s12362_s30 + $0x668] ss:$16 sps:$4 sm:$0xff]   ;;  %v11300_v41 = vld [vmem:[%s12362_s30 + $0x684] ss:$16 sps:$4 sm:$0xff]  }
 0x1cc   : > { %2623 = vmatprep.mubr.bf16.mxu0 %v12304_v16  ;;  %2705 = vmatprep.mubr.bf16.mxu1 %v12304_v16 }
 0x1ce   : > { %2594 = vmatpush1.bf16.msra.mxu0 %v11214_v27  ;;  %2676 = vmatpush1.bf16.msra.mxu1 %v11217_v43  ;;  %v11303_v27 = vld [vmem:[%s12362_s30 + $0x68c] ss:$16 sps:$4 sm:$0xff]   ;;  %v11298_v43 = vld [vmem:[%s12362_s30 + $0x680] ss:$16 sps:$4 sm:$0xff]  }
 0x1cf   : > { %2595 = vmatprep.subr.bf16.mxu0 %v11222_v44  ;;  %2677 = vmatprep.subr.bf16.mxu1 %v11225_v45  ;;  %v11301_v44 = vld [vmem:[%s12362_s30 + $0x688] ss:$16 sps:$4 sm:$0xff]   ;;  %v11306_v45 = vld [vmem:[%s12362_s30 + $0x6a4] ss:$16 sps:$4 sm:$0xff]  }
 0x1d2   : > { %2596 = vmatpush1.bf16.msra.mxu0 %v11220_v47  ;;  %2678 = vmatpush1.bf16.msra.mxu1 %v11223_v50  ;;  %v11309_v47 = vld [vmem:[%s12362_s30 + $0x6ac] ss:$16 sps:$4 sm:$0xff]   ;;  %v11304_v50 = vld [vmem:[%s12362_s30 + $0x6a0] ss:$16 sps:$4 sm:$0xff]  }
 0x1d3   : > { %2597 = vmatprep.subr.bf16.mxu0 %v11228_v51  ;;  %2679 = vmatprep.subr.bf16.mxu1 %v11231_v52  ;;  %v11307_v51 = vld [vmem:[%s12362_s30 + $0x6a8] ss:$16 sps:$4 sm:$0xff]   ;;  %v11312_v52 = vld [vmem:[%s12362_s30 + $0x6c4] ss:$16 sps:$4 sm:$0xff]  }
 0x1d6   : > { %2598 = vmatpush1.bf16.msra.mxu0 %v11226_v54  ;;  %2680 = vmatpush1.bf16.msra.mxu1 %v11229_v56  ;;  %v11310_v54 = vld [vmem:[%s12362_s30 + $0x6c0] ss:$16 sps:$4 sm:$0xff]   ;;  %v11313_v56 = vld [vmem:[%s12362_s30 + $0x6c8] ss:$16 sps:$4 sm:$0xff]  }
 0x1d7   : > { %2599 = vmatprep.subr.bf16.mxu0 %v11234_v57  ;;  %2681 = vmatprep.subr.bf16.mxu1 %v11237_v58  ;;  %v11318_v57 = vld [vmem:[%s12362_s30 + $0x6e4] ss:$16 sps:$4 sm:$0xff]   ;;  %v11321_v58 = vld [vmem:[%s12362_s30 + $0x6ec] ss:$16 sps:$4 sm:$0xff]  }
 0x1da   : > { %2600 = vmatpush1.bf16.msra.mxu0 %v11232_v59  ;;  %2682 = vmatpush1.bf16.msra.mxu1 %v11235_v60  ;;  %v11319_v59 = vld [vmem:[%s12362_s30 + $0x6e8] ss:$16 sps:$4 sm:$0xff]   ;;  %v11324_v60 = vld [vmem:[%s12362_s30 + $0x704] ss:$16 sps:$4 sm:$0xff]  }
 0x1db   : > { %3273 = vmatprep.subr.bf16.mxu0 %v11240_v61  ;;  %3355 = vmatprep.subr.bf16.mxu1 %v11243_v49  ;;  %v11327_v61 = vld [vmem:[%s12362_s30 + $0x70c] ss:$16 sps:$4 sm:$0xff]   ;;  %v11322_v49 = vld [vmem:[%s12362_s30 + $0x700] ss:$16 sps:$4 sm:$0xff]  }
 0x1dd   : > { %9190 = vmatmul.mubr.msk.bf16.vlgmr.msra.gmra.mrb[4].mxu0 %vm1823_vm12, %v2041_v8  ;;  %9191 = vmatmul.mubr.msk.bf16.vlgmr.msra.gmra.mrb[4].mxu1 %vm1823_vm12, %v2041_v8  ;;  %v11330_v8 = vld [vmem:[%s12362_s30 + $0x724] ss:$16 sps:$4 sm:$0xff]  }
 0x1de   : > { %3274 = vmatpush1.bf16.msra.mxu0 %v11238_v63  ;;  %3356 = vmatpush1.bf16.msra.mxu1 %v11241_v0  ;;  %v11333_v63 = vld [vmem:[%s12362_s30 + $0x72c] ss:$16 sps:$4 sm:$0xff]   ;;  %v11328_v0 = vld [vmem:[%s12362_s30 + $0x720] ss:$16 sps:$4 sm:$0xff]  }
 0x1df   : > { %3275 = vmatprep.subr.bf16.mxu0 %v11246_v1  ;;  %3357 = vmatprep.subr.bf16.mxu1 %v11249_v2  ;;  %v11331_v1 = vld [vmem:[%s12362_s30 + $0x728] ss:$16 sps:$4 sm:$0xff]   ;;  %v11337_v2 = vld [vmem:[%s12362_s30 + $0x744] ss:$16 sps:$4 sm:$0xff]  }
 0x1e0   : > { %3305 = vmatprep.mubr.bf16.mxu0 %v2763_v4  ;;  %3387 = vmatprep.mubr.bf16.mxu1 %v2763_v4  ;;  %v11340_v4 = vld [vmem:[%s12362_s30 + $0x74c] ss:$16 sps:$4 sm:$0xff]  }
 0x1e2   : > { %3276 = vmatpush1.bf16.msra.mxu0 %v11244_v6  ;;  %3358 = vmatpush1.bf16.msra.mxu1 %v11247_v7  ;;  %v11335_v6 = vld [vmem:[%s12362_s30 + $0x740] ss:$16 sps:$4 sm:$0xff]   ;;  %v2762_v7 = vpack.c.bf16 %v13027_v24, %v13027_v24  ;;  %v11344_v24 = vld [vmem:[%s12362_s30 + $0x768] ss:$16 sps:$4 sm:$0xff]  }
 0x1e3   : > { %3277 = vmatprep.subr.bf16.mxu0 %v11252_v9  ;;  %3359 = vmatprep.subr.bf16.mxu1 %v11255_v10  ;;  %v11338_v9 = vld [vmem:[%s12362_s30 + $0x748] ss:$16 sps:$4 sm:$0xff]   ;;  %v11343_v10 = vld [vmem:[%s12362_s30 + $0x764] ss:$16 sps:$4 sm:$0xff]  }
 0x1e6   : > { %3278 = vmatpush1.bf16.msra.mxu0 %v11250_v11  ;;  %3360 = vmatpush1.bf16.msra.mxu1 %v11253_v12  ;;  %v11346_v11 = vld [vmem:[%s12362_s30 + $0x76c] ss:$16 sps:$4 sm:$0xff]   ;;  %v11341_v12 = vld [vmem:[%s12362_s30 + $0x760] ss:$16 sps:$4 sm:$0xff]  }
 0x1e7   : > { %3279 = vmatprep.subr.bf16.mxu0 %v11258_v13  ;;  %3361 = vmatprep.subr.bf16.mxu1 %v11261_v14  ;;  %v11349_v13 = vld [vmem:[%s12362_s30 + $0x784] ss:$16 sps:$4 sm:$0xff]   ;;  %v11352_v14 = vld [vmem:[%s12362_s30 + $0x78c] ss:$16 sps:$4 sm:$0xff]  }
 0x1ea   : > { %3280 = vmatpush1.bf16.msra.mxu0 %v11256_v15  ;;  %3362 = vmatpush1.bf16.msra.mxu1 %v11259_v17  ;;  %v11347_v15 = vld [vmem:[%s12362_s30 + $0x780] ss:$16 sps:$4 sm:$0xff]   ;;  %v11350_v17 = vld [vmem:[%s12362_s30 + $0x788] ss:$16 sps:$4 sm:$0xff]  }
 0x1eb   : > { %3281 = vmatprep.subr.bf16.mxu0 %v11264_v18  ;;  %3363 = vmatprep.subr.bf16.mxu1 %v11267_v3  ;;  %v11355_v18 = vld [vmem:[%s12362_s30 + $0x7a4] ss:$16 sps:$4 sm:$0xff]   ;;  %v11358_v3 = vld [vmem:[%s12362_s30 + $0x7ac] ss:$16 sps:$4 sm:$0xff]  }
 0x1ee   : > { %3282 = vmatpush1.bf16.msra.mxu0 %v11262_v5  ;;  %3364 = vmatpush1.bf16.msra.mxu1 %v11265_v19  ;;  %v11353_v5 = vld [vmem:[%s12362_s30 + $0x7a0] ss:$16 sps:$4 sm:$0xff]   ;;  %v2743_v19 = vcombine.high %v13020_v55, %v13020_v55 }
 0x1ef   : > { %3283 = vmatprep.subr.bf16.mxu0 %v11270_v20  ;;  %3365 = vmatprep.subr.bf16.mxu1 %v11273_v21  ;;  %v13122_v20 = vld [vmem:[%s12873_s11 + $0x12] sm:$0x3f]  ;;  %v11356_v21 = vld [vmem:[%s12362_s30 + $0x7a8] ss:$16 sps:$4 sm:$0xff]  }
 0x1f0   : > { %v11359_v55 = vld [vmem:[%s12362_s30 + $0x7c0] ss:$16 sps:$4 sm:$0xff]  }
 0x1f2   : > { %3284 = vmatpush1.bf16.msra.mxu0 %v11268_v22  ;;  %3366 = vmatpush1.bf16.msra.mxu1 %v11271_v23  ;;  %v11361_v22 = vld [vmem:[%s12362_s30 + $0x7c4] ss:$16 sps:$4 sm:$0xff]   ;;  %v11364_v23 = vld [vmem:[%s12362_s30 + $0x7cc] ss:$16 sps:$4 sm:$0xff]  }
 0x1f3   : > { %3285 = vmatprep.subr.bf16.mxu0 %v11276_v25  ;;  %3367 = vmatprep.subr.bf16.mxu1 %v11279_v26  ;;  %v13129_v25 = vrot.slane %v13122_v20, %v12869_v42  ;;  %v2757_v26 = vrot.slane %v2743_v19, %v12869_v42 }
 0x1f6   : > { %3286 = vmatpush1.bf16.msra.mxu0 %v11274_v46  ;;  %3368 = vmatpush1.bf16.msra.mxu1 %v11277_v28  ;;  %v11362_v46 = vld [vmem:[%s12362_s30 + $0x7c8] ss:$16 sps:$4 sm:$0xff]   ;;  %v11367_v28 = vld [vmem:[%s12362_s30 + $0x7e4] ss:$16 sps:$4 sm:$0xff]  }
 0x1f7   : > { %3287 = vmatprep.subr.bf16.mxu0 %v11282_v29  ;;  %3369 = vmatprep.subr.bf16.mxu1 %v11285_v30  ;;  %v11370_v29 = vld [vmem:[%s12362_s30 + $0x7ec] ss:$16 sps:$4 sm:$0xff]   ;;  %v3481_v30 = vcombine.high %v13129_v25, %v13129_v25 }
 0x1fa   : > { %3288 = vmatpush1.bf16.msra.mxu0 %v11280_v31  ;;  %3370 = vmatpush1.bf16.msra.mxu1 %v11283_v32  ;;  %v2764_v31 = vpack.c.bf16 %v2757_v26, %v2757_v26  ;;  %v11365_v32 = vld [vmem:[%s12362_s30 + $0x7e0] ss:$16 sps:$4 sm:$0xff]  }
 0x1fb   : > { %3289 = vmatprep.subr.bf16.mxu0 %v11288_v33  ;;  %3371 = vmatprep.subr.bf16.mxu1 %v11291_v34  ;;  %v11368_v33 = vld [vmem:[%s12362_s30 + $0x7e8] ss:$16 sps:$4 sm:$0xff]   ;;  %v11373_v34 = vld [vmem:[%s12362_s30 + $0x804] ss:$16 sps:$4 sm:$0xff]  }
 0x1fe   : > { %3290 = vmatpush1.bf16.msra.mxu0 %v11286_v35  ;;  %3372 = vmatpush1.bf16.msra.mxu1 %v11289_v36  ;;  %v11376_v35 = vld [vmem:[%s12362_s30 + $0x80c] ss:$16 sps:$4 sm:$0xff]   ;;  %v3486_v36 = vpack.c.bf16 %v3481_v30, %v3481_v30  ;;  %v11440_v30 = vld [vmem:[%s12362_s30 + $0x968] ss:$16 sps:$4 sm:$0xff]  }
 0x1ff   : > { %3291 = vmatprep.subr.bf16.mxu0 %v11294_v37  ;;  %3373 = vmatprep.subr.bf16.mxu1 %v11297_v38  ;;  %v11371_v37 = vld [vmem:[%s12362_s30 + $0x800] ss:$16 sps:$4 sm:$0xff]   ;;  %v11374_v38 = vld [vmem:[%s12362_s30 + $0x808] ss:$16 sps:$4 sm:$0xff]  }
 0x202   : > { %3292 = vmatpush1.bf16.msra.mxu0 %v11292_v39  ;;  %3374 = vmatpush1.bf16.msra.mxu1 %v11295_v40  ;;  %v11379_v39 = vld [vmem:[%s12362_s30 + $0x824] ss:$16 sps:$4 sm:$0xff]   ;;  %v11382_v40 = vld [vmem:[%s12362_s30 + $0x82c] ss:$16 sps:$4 sm:$0xff]  }
 0x203   : > { %3293 = vmatprep.subr.bf16.mxu0 %v11300_v41  ;;  %3375 = vmatprep.subr.bf16.mxu1 %v11303_v27  ;;  %v11377_v41 = vld [vmem:[%s12362_s30 + $0x820] ss:$16 sps:$4 sm:$0xff]   ;;  %v11380_v27 = vld [vmem:[%s12362_s30 + $0x828] ss:$16 sps:$4 sm:$0xff]  }
 0x206   : > { %3294 = vmatpush1.bf16.msra.mxu0 %v11298_v43  ;;  %3376 = vmatpush1.bf16.msra.mxu1 %v11301_v44  ;;  %v11385_v43 = vld [vmem:[%s12362_s30 + $0x844] ss:$16 sps:$4 sm:$0xff]   ;;  %v11388_v44 = vld [vmem:[%s12362_s30 + $0x84c] ss:$16 sps:$4 sm:$0xff]  }
 0x207   : > { %3295 = vmatprep.subr.bf16.mxu0 %v11306_v45  ;;  %3377 = vmatprep.subr.bf16.mxu1 %v11309_v47  ;;  %v11383_v45 = vld [vmem:[%s12362_s30 + $0x840] ss:$16 sps:$4 sm:$0xff]   ;;  %v11386_v47 = vld [vmem:[%s12362_s30 + $0x848] ss:$16 sps:$4 sm:$0xff]  }
 0x20a   : > { %3296 = vmatpush1.bf16.msra.mxu0 %v11304_v50  ;;  %3378 = vmatpush1.bf16.msra.mxu1 %v11307_v51  ;;  %v11391_v50 = vld [vmem:[%s12362_s30 + $0x864] ss:$16 sps:$4 sm:$0xff]   ;;  %v11394_v51 = vld [vmem:[%s12362_s30 + $0x86c] ss:$16 sps:$4 sm:$0xff]  }
 0x20b   : > { %3297 = vmatprep.subr.bf16.mxu0 %v11312_v52  ;;  %3379 = vmatprep.subr.bf16.mxu1 %v11315_v53  ;;  %v11389_v52 = vld [vmem:[%s12362_s30 + $0x860] ss:$16 sps:$4 sm:$0xff]   ;;  %v11392_v53 = vld [vmem:[%s12362_s30 + $0x868] ss:$16 sps:$4 sm:$0xff]  }
 0x20e   : > { %3298 = vmatpush1.bf16.msra.mxu0 %v11310_v54  ;;  %3380 = vmatpush1.bf16.msra.mxu1 %v11313_v56  ;;  %v11397_v54 = vld [vmem:[%s12362_s30 + $0x884] ss:$16 sps:$4 sm:$0xff]   ;;  %v11400_v56 = vld [vmem:[%s12362_s30 + $0x88c] ss:$16 sps:$4 sm:$0xff]  }
 0x20f   : > { %3299 = vmatprep.subr.bf16.mxu0 %v11318_v57  ;;  %3381 = vmatprep.subr.bf16.mxu1 %v11321_v58  ;;  %v11395_v57 = vld [vmem:[%s12362_s30 + $0x880] ss:$16 sps:$4 sm:$0xff]   ;;  %v11398_v58 = vld [vmem:[%s12362_s30 + $0x888] ss:$16 sps:$4 sm:$0xff]  }
 0x212   : > { %3300 = vmatpush1.bf16.msra.mxu0 %v11316_v48  ;;  %3382 = vmatpush1.bf16.msra.mxu1 %v11319_v59  ;;  %v11403_v48 = vld [vmem:[%s12362_s30 + $0x8a4] ss:$16 sps:$4 sm:$0xff]   ;;  %v11406_v59 = vld [vmem:[%s12362_s30 + $0x8ac] ss:$16 sps:$4 sm:$0xff]  }
 0x213   : > { %3301 = vmatprep.subr.bf16.mxu0 %v11324_v60  ;;  %3383 = vmatprep.subr.bf16.mxu1 %v11327_v61  ;;  %v11401_v60 = vld [vmem:[%s12362_s30 + $0x8a0] ss:$16 sps:$4 sm:$0xff]   ;;  %v11404_v61 = vld [vmem:[%s12362_s30 + $0x8a8] ss:$16 sps:$4 sm:$0xff]  }
 0x216   : > { %3302 = vmatpush1.bf16.msra.mxu0 %v11322_v49  ;;  %3384 = vmatpush1.bf16.msra.mxu1 %v11325_v62  ;;  %v11409_v49 = vld [vmem:[%s12362_s30 + $0x8c4] ss:$16 sps:$4 sm:$0xff]   ;;  %v11412_v62 = vld [vmem:[%s12362_s30 + $0x8cc] ss:$16 sps:$4 sm:$0xff]  }
 0x217   : > { %3303 = vmatprep.subr.bf16.mxu0 %v11330_v8  ;;  %3385 = vmatprep.subr.bf16.mxu1 %v11333_v63  ;;  %v11407_v8 = vld [vmem:[%s12362_s30 + $0x8c0] ss:$16 sps:$4 sm:$0xff]   ;;  %v11410_v63 = vld [vmem:[%s12362_s30 + $0x8c8] ss:$16 sps:$4 sm:$0xff]  }
 0x21a   : > { %3304 = vmatpush1.bf16.msra.mxu0 %v11328_v0  ;;  %3386 = vmatpush1.bf16.msra.mxu1 %v11331_v1  ;;  %v11415_v0 = vld [vmem:[%s12362_s30 + $0x8e4] ss:$16 sps:$4 sm:$0xff]   ;;  %v11418_v1 = vld [vmem:[%s12362_s30 + $0x8ec] ss:$16 sps:$4 sm:$0xff]  }
 0x21b   : > { %3314 = vmatprep.subr.bf16.mxu0 %v11337_v2  ;;  %3396 = vmatprep.subr.bf16.mxu1 %v11340_v4  ;;  %v11413_v2 = vld [vmem:[%s12362_s30 + $0x8e0] ss:$16 sps:$4 sm:$0xff]   ;;  %v11416_v4 = vld [vmem:[%s12362_s30 + $0x8e8] ss:$16 sps:$4 sm:$0xff]  }
 0x21d   : > { %3306 = vmatmul.mubr.bf16.vlgmr.msra.gmra.mrb[8].mxu0 %v2762_v7  ;;  %3388 = vmatmul.mubr.bf16.vlgmr.msra.gmra.mrb[8].mxu1 %v2762_v7  ;;  %v11424_v7 = vld [vmem:[%s12362_s30 + $0x90c] ss:$16 sps:$4 sm:$0xff]  }
 0x21e   : > { %3315 = vmatpush1.bf16.msra.mxu0 %v11335_v6  ;;  %3397 = vmatpush1.bf16.msra.mxu1 %v11338_v9  ;;  %v11421_v6 = vld [vmem:[%s12362_s30 + $0x904] ss:$16 sps:$4 sm:$0xff]   ;;  %v11419_v9 = vld [vmem:[%s12362_s30 + $0x900] ss:$16 sps:$4 sm:$0xff]  }
 0x21f   : > { %3316 = vmatprep.subr.bf16.mxu0 %v11343_v10  ;;  %3398 = vmatprep.subr.bf16.mxu1 %v11346_v11  ;;  %v11422_v10 = vld [vmem:[%s12362_s30 + $0x908] ss:$16 sps:$4 sm:$0xff]   ;;  %v11427_v11 = vld [vmem:[%s12362_s30 + $0x924] ss:$16 sps:$4 sm:$0xff]  }
 0x220   : > { %3346 = vmatprep.mubr.bf16.mxu0 %v12304_v16  ;;  %3428 = vmatprep.mubr.bf16.mxu1 %v12304_v16 }
 0x222   : > { %3317 = vmatpush1.bf16.msra.mxu0 %v11341_v12  ;;  %3399 = vmatpush1.bf16.msra.mxu1 %v11344_v24  ;;  %v11430_v12 = vld [vmem:[%s12362_s30 + $0x92c] ss:$16 sps:$4 sm:$0xff]   ;;  %v11425_v24 = vld [vmem:[%s12362_s30 + $0x920] ss:$16 sps:$4 sm:$0xff]  }
 0x223   : > { %3318 = vmatprep.subr.bf16.mxu0 %v11349_v13  ;;  %3400 = vmatprep.subr.bf16.mxu1 %v11352_v14  ;;  %v11428_v13 = vld [vmem:[%s12362_s30 + $0x928] ss:$16 sps:$4 sm:$0xff]   ;;  %v11433_v14 = vld [vmem:[%s12362_s30 + $0x944] ss:$16 sps:$4 sm:$0xff]  }
 0x226   : > { %3319 = vmatpush1.bf16.msra.mxu0 %v11347_v15  ;;  %3401 = vmatpush1.bf16.msra.mxu1 %v11350_v17  ;;  %v11436_v15 = vld [vmem:[%s12362_s30 + $0x94c] ss:$16 sps:$4 sm:$0xff]   ;;  %v11431_v17 = vld [vmem:[%s12362_s30 + $0x940] ss:$16 sps:$4 sm:$0xff]  }
 0x227   : > { %3320 = vmatprep.subr.bf16.mxu0 %v11355_v18  ;;  %3402 = vmatprep.subr.bf16.mxu1 %v11358_v3  ;;  %v11434_v18 = vld [vmem:[%s12362_s30 + $0x948] ss:$16 sps:$4 sm:$0xff]   ;;  %v11439_v3 = vld [vmem:[%s12362_s30 + $0x964] ss:$16 sps:$4 sm:$0xff]  }
 0x22a   : > { %3321 = vmatpush1.bf16.msra.mxu0 %v11353_v5  ;;  %3403 = vmatpush1.bf16.msra.mxu1 %v11356_v21  ;;  %v11442_v5 = vld [vmem:[%s12362_s30 + $0x96c] ss:$16 sps:$4 sm:$0xff]  }
 0x22b   : > { %3322 = vmatprep.subr.bf16.mxu0 %v11361_v22  ;;  %3404 = vmatprep.subr.bf16.mxu1 %v11364_v23 }
 0x22e   : > { %3323 = vmatpush1.bf16.msra.mxu0 %v11359_v55  ;;  %3405 = vmatpush1.bf16.msra.mxu1 %v11362_v46 }
 0x22f   : > { %3996 = vmatprep.subr.bf16.mxu0 %v11367_v28  ;;  %4078 = vmatprep.subr.bf16.mxu1 %v11370_v29  ;;  %v11437_v29 = vld [vmem:[%s12362_s30 + $0x960] ss:$16 sps:$4 sm:$0xff]  }
 0x231   : > { %9362 = vmatmul.mubr.msk.bf16.vlgmr.msra.gmra.mrb[8].mxu0 %vm1823_vm12, %v2764_v31  ;;  %9363 = vmatmul.mubr.msk.bf16.vlgmr.msra.gmra.mrb[8].mxu1 %vm1823_vm12, %v2764_v31 }
 0x232   : > { %3997 = vmatpush1.bf16.msra.mxu0 %v11365_v32  ;;  %4079 = vmatpush1.bf16.msra.mxu1 %v11368_v33  ;;  %v11445_v33 = vld [vmem:[%s12362_s30 + $0x984] ss:$16 sps:$4 sm:$0xff]  }
 0x233   : > { %3998 = vmatprep.subr.bf16.mxu0 %v11373_v34  ;;  %4080 = vmatprep.subr.bf16.mxu1 %v11376_v35  ;;  %v11448_v34 = vld [vmem:[%s12362_s30 + $0x98c] ss:$16 sps:$4 sm:$0xff]  }
 0x234   : > { %4028 = vmatprep.mubr.bf16.mxu0 %v3486_v36  ;;  %4110 = vmatprep.mubr.bf16.mxu1 %v3486_v36 }
 0x236   : > { %3999 = vmatpush1.bf16.msra.mxu0 %v11371_v37  ;;  %4081 = vmatpush1.bf16.msra.mxu1 %v11374_v38  ;;  %v11443_v38 = vld [vmem:[%s12362_s30 + $0x980] ss:$16 sps:$4 sm:$0xff]  }
 0x237   : > { %4000 = vmatprep.subr.bf16.mxu0 %v11379_v39  ;;  %4082 = vmatprep.subr.bf16.mxu1 %v11382_v40  ;;  %v11446_v39 = vld [vmem:[%s12362_s30 + $0x988] ss:$16 sps:$4 sm:$0xff]   ;;  %v11451_v40 = vld [vmem:[%s12362_s30 + $0x9a4] ss:$16 sps:$4 sm:$0xff]  }
 0x23a   : > { %4001 = vmatpush1.bf16.msra.mxu0 %v11377_v41  ;;  %4083 = vmatpush1.bf16.msra.mxu1 %v11380_v27  ;;  %v11454_v41 = vld [vmem:[%s12362_s30 + $0x9ac] ss:$16 sps:$4 sm:$0xff]   ;;  %v11449_v27 = vld [vmem:[%s12362_s30 + $0x9a0] ss:$16 sps:$4 sm:$0xff]  }
 0x23b   : > { %4002 = vmatprep.subr.bf16.mxu0 %v11385_v43  ;;  %4084 = vmatprep.subr.bf16.mxu1 %v11388_v44  ;;  %v11452_v43 = vld [vmem:[%s12362_s30 + $0x9a8] ss:$16 sps:$4 sm:$0xff]   ;;  %v11457_v44 = vld [vmem:[%s12362_s30 + $0x9c4] ss:$16 sps:$4 sm:$0xff]  }
 0x23e   : > { %4003 = vmatpush1.bf16.msra.mxu0 %v11383_v45  ;;  %4085 = vmatpush1.bf16.msra.mxu1 %v11386_v47  ;;  %v11460_v45 = vld [vmem:[%s12362_s30 + $0x9cc] ss:$16 sps:$4 sm:$0xff]   ;;  %v11455_v47 = vld [vmem:[%s12362_s30 + $0x9c0] ss:$16 sps:$4 sm:$0xff]  }
 0x23f   : > { %4004 = vmatprep.subr.bf16.mxu0 %v11391_v50  ;;  %4086 = vmatprep.subr.bf16.mxu1 %v11394_v51  ;;  %v11458_v50 = vld [vmem:[%s12362_s30 + $0x9c8] ss:$16 sps:$4 sm:$0xff]   ;;  %v11464_v51 = vld [vmem:[%s12362_s30 + $0x9e4] ss:$16 sps:$4 sm:$0xff]  }
 0x242   : > { %4005 = vmatpush1.bf16.msra.mxu0 %v11389_v52  ;;  %4087 = vmatpush1.bf16.msra.mxu1 %v11392_v53  ;;  %v11467_v52 = vld [vmem:[%s12362_s30 + $0x9ec] ss:$16 sps:$4 sm:$0xff]   ;;  %v3485_v53 = vpack.c.bf16 %v13129_v25, %v13129_v25  ;;  %v11471_v25 = vld [vmem:[%s12362_s30 + $0xa08] ss:$16 sps:$4 sm:$0xff]  }
 0x243   : > { %4006 = vmatprep.subr.bf16.mxu0 %v11397_v54  ;;  %4088 = vmatprep.subr.bf16.mxu1 %v11400_v56  ;;  %v11462_v54 = vld [vmem:[%s12362_s30 + $0x9e0] ss:$16 sps:$4 sm:$0xff]   ;;  %v11465_v56 = vld [vmem:[%s12362_s30 + $0x9e8] ss:$16 sps:$4 sm:$0xff]  }
 0x246   : > { %4007 = vmatpush1.bf16.msra.mxu0 %v11395_v57  ;;  %4089 = vmatpush1.bf16.msra.mxu1 %v11398_v58  ;;  %v11470_v57 = vld [vmem:[%s12362_s30 + $0xa04] ss:$16 sps:$4 sm:$0xff]   ;;  %v11473_v58 = vld [vmem:[%s12362_s30 + $0xa0c] ss:$16 sps:$4 sm:$0xff]  }
 0x247   : > { %4008 = vmatprep.subr.bf16.mxu0 %v11403_v48  ;;  %4090 = vmatprep.subr.bf16.mxu1 %v11406_v59  ;;  %v11468_v48 = vld [vmem:[%s12362_s30 + $0xa00] ss:$16 sps:$4 sm:$0xff]   ;;  %v11476_v59 = vld [vmem:[%s12362_s30 + $0xa24] ss:$16 sps:$4 sm:$0xff]  }
 0x24a   : > { %4009 = vmatpush1.bf16.msra.mxu0 %v11401_v60  ;;  %4091 = vmatpush1.bf16.msra.mxu1 %v11404_v61  ;;  %v11479_v60 = vld [vmem:[%s12362_s30 + $0xa2c] ss:$16 sps:$4 sm:$0xff]   ;;  %v11474_v61 = vld [vmem:[%s12362_s30 + $0xa20] ss:$16 sps:$4 sm:$0xff]  }
 0x24b   : > { %4010 = vmatprep.subr.bf16.mxu0 %v11409_v49  ;;  %4092 = vmatprep.subr.bf16.mxu1 %v11412_v62  ;;  %v11477_v49 = vld [vmem:[%s12362_s30 + $0xa28] ss:$16 sps:$4 sm:$0xff]   ;;  %v11482_v62 = vld [vmem:[%s12362_s30 + $0xa44] ss:$16 sps:$4 sm:$0xff]  }
 0x24e   : > { %4011 = vmatpush1.bf16.msra.mxu0 %v11407_v8  ;;  %4093 = vmatpush1.bf16.msra.mxu1 %v11410_v63  ;;  %v11485_v8 = vld [vmem:[%s12362_s30 + $0xa4c] ss:$16 sps:$4 sm:$0xff]  }
 0x24f   : > { %4012 = vmatprep.subr.bf16.mxu0 %v11415_v0  ;;  %4094 = vmatprep.subr.bf16.mxu1 %v11418_v1  ;;  %v13229_v63 = vld [vmem:[%s12873_s11 + $0x18] sm:$0x3f]  ;;  %v3466_v0 = vcombine.high %v13122_v20, %v13122_v20  ;;  %v11480_v1 = vld [vmem:[%s12362_s30 + $0xa40] ss:$16 sps:$4 sm:$0xff]  }
 0x250   : > { %v11486_v20 = vld [vmem:[%s12362_s30 + $0xa60] ss:$16 sps:$4 sm:$0xff]  }
 0x252   : > { %4013 = vmatpush1.bf16.msra.mxu0 %v11413_v2  ;;  %4095 = vmatpush1.bf16.msra.mxu1 %v11416_v4  ;;  %v11483_v2 = vld [vmem:[%s12362_s30 + $0xa48] ss:$16 sps:$4 sm:$0xff]   ;;  %v11488_v4 = vld [vmem:[%s12362_s30 + $0xa64] ss:$16 sps:$4 sm:$0xff]  }
 0x253   : > { %4014 = vmatprep.subr.bf16.mxu0 %v11421_v6  ;;  %4096 = vmatprep.subr.bf16.mxu1 %v11424_v7  ;;  %v11491_v6 = vld [vmem:[%s12362_s30 + $0xa6c] ss:$16 sps:$4 sm:$0xff]   ;;  %v13239_v7 = vrot.slane %v13229_v63, %v12869_v42 }
 0x256   : > { %4015 = vmatpush1.bf16.msra.mxu0 %v11419_v9  ;;  %4097 = vmatpush1.bf16.msra.mxu1 %v11422_v10  ;;  %v3480_v9 = vrot.slane %v3466_v0, %v12869_v42  ;;  %v11489_v10 = vld [vmem:[%s12362_s30 + $0xa68] ss:$16 sps:$4 sm:$0xff]   ;;  %v11558_v0 = vld [vmem:[%s12362_s30 + $0xbe0] ss:$16 sps:$4 sm:$0xff]  }
 0x257   : > { %4016 = vmatprep.subr.bf16.mxu0 %v11427_v11  ;;  %4098 = vmatprep.subr.bf16.mxu1 %v11430_v12  ;;  %v11494_v11 = vld [vmem:[%s12362_s30 + $0xa84] ss:$16 sps:$4 sm:$0xff]   ;;  %v11497_v12 = vld [vmem:[%s12362_s30 + $0xa8c] ss:$16 sps:$4 sm:$0xff]  }
 0x25a   : > { %4017 = vmatpush1.bf16.msra.mxu0 %v11425_v24  ;;  %4099 = vmatpush1.bf16.msra.mxu1 %v11428_v13  ;;  %v11492_v24 = vld [vmem:[%s12362_s30 + $0xa80] ss:$16 sps:$4 sm:$0xff]   ;;  %v11495_v13 = vld [vmem:[%s12362_s30 + $0xa88] ss:$16 sps:$4 sm:$0xff]  }
 0x25b   : > { %4018 = vmatprep.subr.bf16.mxu0 %v11433_v14  ;;  %4100 = vmatprep.subr.bf16.mxu1 %v11436_v15  ;;  %v4204_v14 = vcombine.high %v13239_v7, %v13239_v7  ;;  %v3487_v15 = vpack.c.bf16 %v3480_v9, %v3480_v9 }
 0x25c   : > { %v1902_v19 = vpop.f32.mrb[0].mxu0  ;;  %v1984_v21 = vpop.f32.mrb[0].mxu1 }
 0x25d   : > { %v1904_v22 = vpop.f32.mrb[1].mxu0  ;;  %v1986_v23 = vpop.f32.mrb[1].mxu1 }
 0x25e   : > { %v1995_v26 = vcombine.low %v1902_v19, %v1904_v22  ;;  %v1996_v55 = vcombine.low %v1984_v21, %v1986_v23  ;;  %v1906_v46 = vpop.f32.mrb[2].mxu0  ;;  %v1988_v28 = vpop.f32.mrb[2].mxu1  ;;  %4019 = vmatpush1.bf16.msra.mxu0 %v11431_v17  ;;  %4101 = vmatpush1.bf16.msra.mxu1 %v11434_v18  ;;  %v11500_v17 = vld [vmem:[%s12362_s30 + $0xaa4] ss:$16 sps:$4 sm:$0xff]   ;;  %v11503_v18 = vld [vmem:[%s12362_s30 + $0xaac] ss:$16 sps:$4 sm:$0xff]   ;;  %v4209_v19 = vpack.c.bf16 %v4204_v14, %v4204_v14 }
 0x25f   : > { %v1907_v31 = vpop.f32.mrb[3].mxu0  ;;  %v1989_v32 = vpop.f32.mrb[3].mxu1  ;;  %4020 = vmatprep.subr.bf16.mxu0 %v11439_v3  ;;  %4102 = vmatprep.subr.bf16.mxu1 %v11442_v5  ;;  %v11498_v3 = vld [vmem:[%s12362_s30 + $0xaa0] ss:$16 sps:$4 sm:$0xff]   ;;  %v11501_v5 = vld [vmem:[%s12362_s30 + $0xaa8] ss:$16 sps:$4 sm:$0xff]  }
 0x260   : > { %v13193_v35 = vrot.slane %v1995_v26, %v12869_v42  ;;  %v13196_v36 = vrot.slane %v1996_v55, %v12869_v42  ;;  %v11506_v21 = vld [vmem:[%s12362_s30 + $0xac4] ss:$16 sps:$4 sm:$0xff]   ;;  %v11509_v22 = vld [vmem:[%s12362_s30 + $0xacc] ss:$16 sps:$4 sm:$0xff]   ;;  %v11504_v23 = vld [vmem:[%s12362_s30 + $0xac0] ss:$16 sps:$4 sm:$0xff]  }
 0x261   : > { %v11507_v26 = vld [vmem:[%s12362_s30 + $0xac8] ss:$16 sps:$4 sm:$0xff]   ;;  %v11512_v55 = vld [vmem:[%s12362_s30 + $0xae4] ss:$16 sps:$4 sm:$0xff]   ;;  %v11515_v46 = vld [vmem:[%s12362_s30 + $0xaec] ss:$16 sps:$4 sm:$0xff]  }
 0x262   : > { %v2011_v37 = vcombine.low %v13193_v35, %v13196_v36  ;;  %4021 = vmatpush1.bf16.msra.mxu0 %v11437_v29  ;;  %4103 = vmatpush1.bf16.msra.mxu1 %v11440_v30  ;;  %v11510_v28 = vld [vmem:[%s12362_s30 + $0xae0] ss:$16 sps:$4 sm:$0xff]   ;;  %v11513_v29 = vld [vmem:[%s12362_s30 + $0xae8] ss:$16 sps:$4 sm:$0xff]   ;;  %v11518_v30 = vld [vmem:[%s12362_s30 + $0xb04] ss:$16 sps:$4 sm:$0xff]  }
 0x263   : > { %4022 = vmatprep.subr.bf16.mxu0 %v11445_v33  ;;  %4104 = vmatprep.subr.bf16.mxu1 %v11448_v34  ;;  %v11521_v31 = vld [vmem:[%s12362_s30 + $0xb0c] ss:$16 sps:$4 sm:$0xff]   ;;  %v11516_v32 = vld [vmem:[%s12362_s30 + $0xb00] ss:$16 sps:$4 sm:$0xff]   ;;  %v11519_v33 = vld [vmem:[%s12362_s30 + $0xb08] ss:$16 sps:$4 sm:$0xff]  }
 0x264   : > { %v11524_v34 = vld [vmem:[%s12362_s30 + $0xb24] ss:$16 sps:$4 sm:$0xff]   ;;  %v11576_v35 = vld [vmem:[%s12362_s30 + $0xc40] ss:$16 sps:$4 sm:$0xff]   ;;  %v11579_v36 = vld [vmem:[%s12362_s30 + $0xc48] ss:$16 sps:$4 sm:$0xff]  }
 0x266   : > { %4023 = vmatpush1.bf16.msra.mxu0 %v11443_v38  ;;  %4105 = vmatpush1.bf16.msra.mxu1 %v11446_v39  ;;  %v11527_v38 = vld [vmem:[%s12362_s30 + $0xb2c] ss:$16 sps:$4 sm:$0xff]   ;;  %v11522_v39 = vld [vmem:[%s12362_s30 + $0xb20] ss:$16 sps:$4 sm:$0xff]  }
 0x267   : > { %4024 = vmatprep.subr.bf16.mxu0 %v11451_v40  ;;  %4106 = vmatprep.subr.bf16.mxu1 %v11454_v41  ;;  %v11525_v40 = vld [vmem:[%s12362_s30 + $0xb28] ss:$16 sps:$4 sm:$0xff]   ;;  %v11530_v41 = vld [vmem:[%s12362_s30 + $0xb44] ss:$16 sps:$4 sm:$0xff]  }
 0x26a   : > { %4025 = vmatpush1.bf16.msra.mxu0 %v11449_v27  ;;  %4107 = vmatpush1.bf16.msra.mxu1 %v11452_v43  ;;  %v11533_v27 = vld [vmem:[%s12362_s30 + $0xb4c] ss:$16 sps:$4 sm:$0xff]   ;;  %v11528_v43 = vld [vmem:[%s12362_s30 + $0xb40] ss:$16 sps:$4 sm:$0xff]  }
 0x26b   : > { %4026 = vmatprep.subr.bf16.mxu0 %v11457_v44  ;;  %4108 = vmatprep.subr.bf16.mxu1 %v11460_v45  ;;  %v11531_v44 = vld [vmem:[%s12362_s30 + $0xb48] ss:$16 sps:$4 sm:$0xff]   ;;  %v11536_v45 = vld [vmem:[%s12362_s30 + $0xb64] ss:$16 sps:$4 sm:$0xff]  }
 0x26e   : > { %4027 = vmatpush1.bf16.msra.mxu0 %v11455_v47  ;;  %4109 = vmatpush1.bf16.msra.mxu1 %v11458_v50  ;;  %v11539_v47 = vld [vmem:[%s12362_s30 + $0xb6c] ss:$16 sps:$4 sm:$0xff]   ;;  %v11534_v50 = vld [vmem:[%s12362_s30 + $0xb60] ss:$16 sps:$4 sm:$0xff]  }
 0x26f   : > { %4037 = vmatprep.subr.bf16.mxu0 %v11464_v51  ;;  %4119 = vmatprep.subr.bf16.mxu1 %v11467_v52  ;;  %v11537_v51 = vld [vmem:[%s12362_s30 + $0xb68] ss:$16 sps:$4 sm:$0xff]   ;;  %v11542_v52 = vld [vmem:[%s12362_s30 + $0xb84] ss:$16 sps:$4 sm:$0xff]  }
 0x271   : > { %4029 = vmatmul.mubr.bf16.vlgmr.msra.gmra.mrb[12].mxu0 %v3485_v53  ;;  %4111 = vmatmul.mubr.bf16.vlgmr.msra.gmra.mrb[12].mxu1 %v3485_v53  ;;  %v11545_v53 = vld [vmem:[%s12362_s30 + $0xb8c] ss:$16 sps:$4 sm:$0xff]  }
 0x272   : > { %4038 = vmatpush1.bf16.msra.mxu0 %v11462_v54  ;;  %4120 = vmatpush1.bf16.msra.mxu1 %v11465_v56  ;;  %v11540_v54 = vld [vmem:[%s12362_s30 + $0xb80] ss:$16 sps:$4 sm:$0xff]   ;;  %v11543_v56 = vld [vmem:[%s12362_s30 + $0xb88] ss:$16 sps:$4 sm:$0xff]  }
 0x273   : > { %4039 = vmatprep.subr.bf16.mxu0 %v11470_v57  ;;  %4121 = vmatprep.subr.bf16.mxu1 %v11473_v58  ;;  %v11548_v57 = vld [vmem:[%s12362_s30 + $0xba4] ss:$16 sps:$4 sm:$0xff]   ;;  %v11551_v58 = vld [vmem:[%s12362_s30 + $0xbac] ss:$16 sps:$4 sm:$0xff]  }
 0x274   : > { %4069 = vmatprep.mubr.bf16.mxu0 %v12304_v16  ;;  %4151 = vmatprep.mubr.bf16.mxu1 %v12304_v16 }
 0x276   : > { %4040 = vmatpush1.bf16.msra.mxu0 %v11468_v48  ;;  %4122 = vmatpush1.bf16.msra.mxu1 %v11471_v25  ;;  %v11546_v48 = vld [vmem:[%s12362_s30 + $0xba0] ss:$16 sps:$4 sm:$0xff]   ;;  %v11549_v25 = vld [vmem:[%s12362_s30 + $0xba8] ss:$16 sps:$4 sm:$0xff]  }
 0x277   : > { %4041 = vmatprep.subr.bf16.mxu0 %v11476_v59  ;;  %4123 = vmatprep.subr.bf16.mxu1 %v11479_v60  ;;  %v11554_v59 = vld [vmem:[%s12362_s30 + $0xbc4] ss:$16 sps:$4 sm:$0xff]   ;;  %v11557_v60 = vld [vmem:[%s12362_s30 + $0xbcc] ss:$16 sps:$4 sm:$0xff]  }
 0x27a   : > { %4042 = vmatpush1.bf16.msra.mxu0 %v11474_v61  ;;  %4124 = vmatpush1.bf16.msra.mxu1 %v11477_v49  ;;  %v11552_v61 = vld [vmem:[%s12362_s30 + $0xbc0] ss:$16 sps:$4 sm:$0xff]   ;;  %v11555_v49 = vld [vmem:[%s12362_s30 + $0xbc8] ss:$16 sps:$4 sm:$0xff]  }
 0x27b   : > { %4043 = vmatprep.subr.bf16.mxu0 %v11482_v62  ;;  %4125 = vmatprep.subr.bf16.mxu1 %v11485_v8  ;;  %v11560_v62 = vld [vmem:[%s12362_s30 + $0xbe4] ss:$16 sps:$4 sm:$0xff]   ;;  %v11563_v8 = vld [vmem:[%s12362_s30 + $0xbec] ss:$16 sps:$4 sm:$0xff]  }
 0x27e   : > { %4044 = vmatpush1.bf16.msra.mxu0 %v11480_v1  ;;  %4126 = vmatpush1.bf16.msra.mxu1 %v11483_v2  ;;  %v11561_v1 = vld [vmem:[%s12362_s30 + $0xbe8] ss:$16 sps:$4 sm:$0xff]   ;;  %v11566_v2 = vld [vmem:[%s12362_s30 + $0xc04] ss:$16 sps:$4 sm:$0xff]  }
 0x27f   : > { %4045 = vmatprep.subr.bf16.mxu0 %v11488_v4  ;;  %4127 = vmatprep.subr.bf16.mxu1 %v11491_v6  ;;  %v11569_v4 = vld [vmem:[%s12362_s30 + $0xc0c] ss:$16 sps:$4 sm:$0xff]  }
 0x282   : > { %4046 = vmatpush1.bf16.msra.mxu0 %v11486_v20  ;;  %4128 = vmatpush1.bf16.msra.mxu1 %v11489_v10  ;;  %v1290_v20 = vld [vmem:[#allocation3] sm:$0xff] }
 0x283   : > { %4719 = vmatprep.subr.bf16.mxu0 %v11494_v11  ;;  %4801 = vmatprep.subr.bf16.mxu1 %v11497_v12 }
 0x285   : > { %9534 = vmatmul.mubr.msk.bf16.vlgmr.msra.gmra.mrb[12].mxu0 %vm1823_vm12, %v3487_v15  ;;  %9535 = vmatmul.mubr.msk.bf16.vlgmr.msra.gmra.mrb[12].mxu1 %vm1823_vm12, %v3487_v15  ;;  %v11564_v15 = vld [vmem:[%s12362_s30 + $0xc00] ss:$16 sps:$4 sm:$0xff]  }
 0x286   : > { %4720 = vmatpush1.bf16.msra.mxu0 %v11492_v24  ;;  %4802 = vmatpush1.bf16.msra.mxu1 %v11495_v13 }
 0x287   : > { %4721 = vmatprep.subr.bf16.mxu0 %v11500_v17  ;;  %4803 = vmatprep.subr.bf16.mxu1 %v11503_v18  ;;  %v11567_v17 = vld [vmem:[%s12362_s30 + $0xc08] ss:$16 sps:$4 sm:$0xff]  }
 0x288   : > { %4751 = vmatprep.mubr.bf16.mxu0 %v4209_v19  ;;  %4833 = vmatprep.mubr.bf16.mxu1 %v4209_v19  ;;  %v11575_v19 = vld [vmem:[%s12362_s30 + $0xc2c] ss:$16 sps:$4 sm:$0xff]  }
 0x28a   : > { %4722 = vmatpush1.bf16.msra.mxu0 %v11498_v3  ;;  %4804 = vmatpush1.bf16.msra.mxu1 %v11501_v5  ;;  %v11572_v5 = vld [vmem:[%s12362_s30 + $0xc24] ss:$16 sps:$4 sm:$0xff]  }
 0x28b   : > { %4723 = vmatprep.subr.bf16.mxu0 %v11506_v21  ;;  %4805 = vmatprep.subr.bf16.mxu1 %v11509_v22 }
 0x28e   : > { %4724 = vmatpush1.bf16.msra.mxu0 %v11504_v23  ;;  %4806 = vmatpush1.bf16.msra.mxu1 %v11507_v26  ;;  %v2013_v23 = vadd.f32 %v2011_v37, %v1290_v20  ;;  %v11584_v37 = vld [vmem:[%s12362_s30 + $0xc64] ss:$16 sps:$4 sm:$0xff]   ;;  %v11628_v20 = vld [vmem:[%s12362_s30 + $0xd48] ss:$16 sps:$4 sm:$0xff]  }
 0x28f   : > { %4725 = vmatprep.subr.bf16.mxu0 %v11512_v55  ;;  %4807 = vmatprep.subr.bf16.mxu1 %v11515_v46  ;;  %v11570_v55 = vld [vmem:[%s12362_s30 + $0xc20] ss:$16 sps:$4 sm:$0xff]   ;;  %v11573_v46 = vld [vmem:[%s12362_s30 + $0xc28] ss:$16 sps:$4 sm:$0xff]  }
 0x292   : > { %4726 = vmatpush1.bf16.msra.mxu0 %v11510_v28  ;;  %4808 = vmatpush1.bf16.msra.mxu1 %v11513_v29  ;;  %v11578_v28 = vld [vmem:[%s12362_s30 + $0xc44] ss:$16 sps:$4 sm:$0xff]   ;;  %v11581_v29 = vld [vmem:[%s12362_s30 + $0xc4c] ss:$16 sps:$4 sm:$0xff]  }
 0x293   : > { %4727 = vmatprep.subr.bf16.mxu0 %v11518_v30  ;;  %4809 = vmatprep.subr.bf16.mxu1 %v11521_v31  ;;  %v11587_v31 = vld [vmem:[%s12362_s30 + $0xc6c] ss:$16 sps:$4 sm:$0xff]  }
 0x296   : > { %4728 = vmatpush1.bf16.msra.mxu0 %v11516_v32  ;;  %4810 = vmatpush1.bf16.msra.mxu1 %v11519_v33  ;;  %v11582_v32 = vld [vmem:[%s12362_s30 + $0xc60] ss:$16 sps:$4 sm:$0xff]   ;;  %v11585_v33 = vld [vmem:[%s12362_s30 + $0xc68] ss:$16 sps:$4 sm:$0xff]  }
 0x297   : > { %4729 = vmatprep.subr.bf16.mxu0 %v11524_v34  ;;  %4811 = vmatprep.subr.bf16.mxu1 %v11527_v38  ;;  %v11591_v34 = vld [vmem:[%s12362_s30 + $0xc84] ss:$16 sps:$4 sm:$0xff]   ;;  %v11594_v38 = vld [vmem:[%s12362_s30 + $0xc8c] ss:$16 sps:$4 sm:$0xff]  }
 0x29a   : > { %4730 = vmatpush1.bf16.msra.mxu0 %v11522_v39  ;;  %4812 = vmatpush1.bf16.msra.mxu1 %v11525_v40  ;;  %v4208_v39 = vpack.c.bf16 %v13239_v7, %v13239_v7  ;;  %v11589_v40 = vld [vmem:[%s12362_s30 + $0xc80] ss:$16 sps:$4 sm:$0xff]   ;;  %v11598_v7 = vld [vmem:[%s12362_s30 + $0xca8] ss:$16 sps:$4 sm:$0xff]  }
 0x29b   : > { %4731 = vmatprep.subr.bf16.mxu0 %v11530_v41  ;;  %4813 = vmatprep.subr.bf16.mxu1 %v11533_v27  ;;  %v11592_v41 = vld [vmem:[%s12362_s30 + $0xc88] ss:$16 sps:$4 sm:$0xff]   ;;  %v11597_v27 = vld [vmem:[%s12362_s30 + $0xca4] ss:$16 sps:$4 sm:$0xff]  }
 0x29e   : > { %4732 = vmatpush1.bf16.msra.mxu0 %v11528_v43  ;;  %4814 = vmatpush1.bf16.msra.mxu1 %v11531_v44  ;;  %v11600_v43 = vld [vmem:[%s12362_s30 + $0xcac] ss:$16 sps:$4 sm:$0xff]   ;;  %v11595_v44 = vld [vmem:[%s12362_s30 + $0xca0] ss:$16 sps:$4 sm:$0xff]  }
 0x29f   : > { %4733 = vmatprep.subr.bf16.mxu0 %v11536_v45  ;;  %4815 = vmatprep.subr.bf16.mxu1 %v11539_v47  ;;  %v11603_v45 = vld [vmem:[%s12362_s30 + $0xcc4] ss:$16 sps:$4 sm:$0xff]   ;;  %v11606_v47 = vld [vmem:[%s12362_s30 + $0xccc] ss:$16 sps:$4 sm:$0xff]  }
 0x2a2   : > { %4734 = vmatpush1.bf16.msra.mxu0 %v11534_v50  ;;  %4816 = vmatpush1.bf16.msra.mxu1 %v11537_v51  ;;  %v11601_v50 = vld [vmem:[%s12362_s30 + $0xcc0] ss:$16 sps:$4 sm:$0xff]   ;;  %v11604_v51 = vld [vmem:[%s12362_s30 + $0xcc8] ss:$16 sps:$4 sm:$0xff]  }
 0x2a3   : > { %4735 = vmatprep.subr.bf16.mxu0 %v11542_v52  ;;  %4817 = vmatprep.subr.bf16.mxu1 %v11545_v53  ;;  %v11609_v52 = vld [vmem:[%s12362_s30 + $0xce4] ss:$16 sps:$4 sm:$0xff]   ;;  %v11612_v53 = vld [vmem:[%s12362_s30 + $0xcec] ss:$16 sps:$4 sm:$0xff]  }
 0x2a6   : > { %4736 = vmatpush1.bf16.msra.mxu0 %v11540_v54  ;;  %4818 = vmatpush1.bf16.msra.mxu1 %v11543_v56  ;;  %v13338_v54 = vld [vmem:[%s12873_s11 + $0x1e] sm:$0x3f]  ;;  %v4189_v56 = vcombine.high %v13229_v63, %v13229_v63 }
 0x2a7   : > { %4737 = vmatprep.subr.bf16.mxu0 %v11548_v57  ;;  %4819 = vmatprep.subr.bf16.mxu1 %v11551_v58  ;;  %v11607_v57 = vld [vmem:[%s12362_s30 + $0xce0] ss:$16 sps:$4 sm:$0xff]   ;;  %v11610_v58 = vld [vmem:[%s12362_s30 + $0xce8] ss:$16 sps:$4 sm:$0xff]  }
 0x2a8   : > { %v11613_v63 = vld [vmem:[%s12362_s30 + $0xd00] ss:$16 sps:$4 sm:$0xff]  }
 0x2aa   : > { %4738 = vmatpush1.bf16.msra.mxu0 %v11546_v48  ;;  %4820 = vmatpush1.bf16.msra.mxu1 %v11549_v25  ;;  %v11615_v48 = vld [vmem:[%s12362_s30 + $0xd04] ss:$16 sps:$4 sm:$0xff]   ;;  %v11618_v25 = vld [vmem:[%s12362_s30 + $0xd0c] ss:$16 sps:$4 sm:$0xff]  }
 0x2ab   : > { %4739 = vmatprep.subr.bf16.mxu0 %v11554_v59  ;;  %4821 = vmatprep.subr.bf16.mxu1 %v11557_v60  ;;  %v13348_v59 = vrot.slane %v13338_v54, %v12869_v42  ;;  %v4203_v60 = vrot.slane %v4189_v56, %v12869_v42  ;;  %v11693_v56 = vld [vmem:[%s12362_s30 + $0xea4] ss:$16 sps:$4 sm:$0xff]  }
 0x2ae   : > { %4740 = vmatpush1.bf16.msra.mxu0 %v11552_v61  ;;  %4822 = vmatpush1.bf16.msra.mxu1 %v11555_v49  ;;  %v11616_v61 = vld [vmem:[%s12362_s30 + $0xd08] ss:$16 sps:$4 sm:$0xff]   ;;  %v11621_v49 = vld [vmem:[%s12362_s30 + $0xd24] ss:$16 sps:$4 sm:$0xff]  }
 0x2af   : > { %4741 = vmatprep.subr.bf16.mxu0 %v11560_v62  ;;  %4823 = vmatprep.subr.bf16.mxu1 %v11563_v8  ;;  %v11624_v62 = vld [vmem:[%s12362_s30 + $0xd2c] ss:$16 sps:$4 sm:$0xff]   ;;  %v11619_v8 = vld [vmem:[%s12362_s30 + $0xd20] ss:$16 sps:$4 sm:$0xff]  }
 0x2b0   : > { %v2625_v6 = vpop.f32.mrb[4].mxu0  ;;  %v2707_v9 = vpop.f32.mrb[4].mxu1 }
 0x2b1   : > { %v2627_v10 = vpop.f32.mrb[5].mxu0  ;;  %v2709_v11 = vpop.f32.mrb[5].mxu1 }
 0x2b2   : > { %v2718_v12 = vcombine.low %v2625_v6, %v2627_v10  ;;  %v2719_v24 = vcombine.low %v2707_v9, %v2709_v11  ;;  %v2629_v13 = vpop.f32.mrb[6].mxu0  ;;  %v2711_v14 = vpop.f32.mrb[6].mxu1  ;;  %4742 = vmatpush1.bf16.msra.mxu0 %v11558_v0  ;;  %4824 = vmatpush1.bf16.msra.mxu1 %v11561_v1  ;;  %v11622_v0 = vld [vmem:[%s12362_s30 + $0xd28] ss:$16 sps:$4 sm:$0xff]   ;;  %v4927_v1 = vcombine.high %v13348_v59, %v13348_v59  ;;  %v11630_v6 = vld [vmem:[%s12362_s30 + $0xd4c] ss:$16 sps:$4 sm:$0xff]  }
 0x2b3   : > { %v2630_v18 = vpop.f32.mrb[7].mxu0  ;;  %v2712_v3 = vpop.f32.mrb[7].mxu1  ;;  %4743 = vmatprep.subr.bf16.mxu0 %v11566_v2  ;;  %4825 = vmatprep.subr.bf16.mxu1 %v11569_v4  ;;  %v4210_v2 = vpack.c.bf16 %v4203_v60, %v4203_v60  ;;  %v11627_v4 = vld [vmem:[%s12362_s30 + $0xd44] ss:$16 sps:$4 sm:$0xff]   ;;  %v11625_v9 = vld [vmem:[%s12362_s30 + $0xd40] ss:$16 sps:$4 sm:$0xff]  }
 0x2b4   : > { %v2726_v21 = vrot.slane %v2718_v12, %v12869_v42  ;;  %v2733_v22 = vrot.slane %v2719_v24, %v12869_v42  ;;  %v4932_v10 = vpack.c.bf16 %v4927_v1, %v4927_v1  ;;  %v11633_v11 = vld [vmem:[%s12362_s30 + $0xd64] ss:$16 sps:$4 sm:$0xff]   ;;  %v11636_v12 = vld [vmem:[%s12362_s30 + $0xd6c] ss:$16 sps:$4 sm:$0xff]   ;;  %v11631_v24 = vld [vmem:[%s12362_s30 + $0xd60] ss:$16 sps:$4 sm:$0xff]  }
 0x2b5   : > { %v11634_v13 = vld [vmem:[%s12362_s30 + $0xd68] ss:$16 sps:$4 sm:$0xff]   ;;  %v11639_v14 = vld [vmem:[%s12362_s30 + $0xd84] ss:$16 sps:$4 sm:$0xff]  }
 0x2b6   : > { %v2734_v26 = vcombine.low %v2726_v21, %v2733_v22  ;;  %4744 = vmatpush1.bf16.msra.mxu0 %v11564_v15  ;;  %4826 = vmatpush1.bf16.msra.mxu1 %v11567_v17  ;;  %v11642_v15 = vld [vmem:[%s12362_s30 + $0xd8c] ss:$16 sps:$4 sm:$0xff]   ;;  %v11637_v17 = vld [vmem:[%s12362_s30 + $0xd80] ss:$16 sps:$4 sm:$0xff]   ;;  %v11640_v18 = vld [vmem:[%s12362_s30 + $0xd88] ss:$16 sps:$4 sm:$0xff]  }
 0x2b7   : > { %4745 = vmatprep.subr.bf16.mxu0 %v11572_v5  ;;  %4827 = vmatprep.subr.bf16.mxu1 %v11575_v19  ;;  %v11645_v3 = vld [vmem:[%s12362_s30 + $0xda4] ss:$16 sps:$4 sm:$0xff]   ;;  %v11648_v5 = vld [vmem:[%s12362_s30 + $0xdac] ss:$16 sps:$4 sm:$0xff]   ;;  %v11643_v19 = vld [vmem:[%s12362_s30 + $0xda0] ss:$16 sps:$4 sm:$0xff]  }
 0x2b8   : > { %v13311_v30 = vadd.f32 %v2734_v26, %v2013_v23  ;;  %v11646_v21 = vld [vmem:[%s12362_s30 + $0xda8] ss:$16 sps:$4 sm:$0xff]   ;;  %v11651_v22 = vld [vmem:[%s12362_s30 + $0xdc4] ss:$16 sps:$4 sm:$0xff]   ;;  %v11654_v23 = vld [vmem:[%s12362_s30 + $0xdcc] ss:$16 sps:$4 sm:$0xff]  }
 0x2b9   : > { %v11649_v26 = vld [vmem:[%s12362_s30 + $0xdc0] ss:$16 sps:$4 sm:$0xff]  }
 0x2ba   : > { %4746 = vmatpush1.bf16.msra.mxu0 %v11570_v55  ;;  %4828 = vmatpush1.bf16.msra.mxu1 %v11573_v46  ;;  %v11652_v55 = vld [vmem:[%s12362_s30 + $0xdc8] ss:$16 sps:$4 sm:$0xff]   ;;  %v11657_v46 = vld [vmem:[%s12362_s30 + $0xde4] ss:$16 sps:$4 sm:$0xff]  }
 0x2bb   : > { %4747 = vmatprep.subr.bf16.mxu0 %v11578_v28  ;;  %4829 = vmatprep.subr.bf16.mxu1 %v11581_v29  ;;  %v11660_v28 = vld [vmem:[%s12362_s30 + $0xdec] ss:$16 sps:$4 sm:$0xff]   ;;  %v11655_v29 = vld [vmem:[%s12362_s30 + $0xde0] ss:$16 sps:$4 sm:$0xff]  }
 0x2be   : > { %4748 = vmatpush1.bf16.msra.mxu0 %v11576_v35  ;;  %4830 = vmatpush1.bf16.msra.mxu1 %v11579_v36  ;;  %v11658_v35 = vld [vmem:[%s12362_s30 + $0xde8] ss:$16 sps:$4 sm:$0xff]   ;;  %v11663_v36 = vld [vmem:[%s12362_s30 + $0xe04] ss:$16 sps:$4 sm:$0xff]  }
 0x2bf   : > { %4749 = vmatprep.subr.bf16.mxu0 %v11584_v37  ;;  %4831 = vmatprep.subr.bf16.mxu1 %v11587_v31  ;;  %v11666_v37 = vld [vmem:[%s12362_s30 + $0xe0c] ss:$16 sps:$4 sm:$0xff]   ;;  %v11661_v31 = vld [vmem:[%s12362_s30 + $0xe00] ss:$16 sps:$4 sm:$0xff]  }
 0x2c2   : > { %4750 = vmatpush1.bf16.msra.mxu0 %v11582_v32  ;;  %4832 = vmatpush1.bf16.msra.mxu1 %v11585_v33  ;;  %v11664_v32 = vld [vmem:[%s12362_s30 + $0xe08] ss:$16 sps:$4 sm:$0xff]   ;;  %v11669_v33 = vld [vmem:[%s12362_s30 + $0xe24] ss:$16 sps:$4 sm:$0xff]  }
 0x2c3   : > { %4760 = vmatprep.subr.bf16.mxu0 %v11591_v34  ;;  %4842 = vmatprep.subr.bf16.mxu1 %v11594_v38  ;;  %v11672_v34 = vld [vmem:[%s12362_s30 + $0xe2c] ss:$16 sps:$4 sm:$0xff]   ;;  %v11667_v38 = vld [vmem:[%s12362_s30 + $0xe20] ss:$16 sps:$4 sm:$0xff]  }
 0x2c5   : > { %4752 = vmatmul.mubr.bf16.vlgmr.msra.gmra.mrb[16].mxu0 %v4208_v39  ;;  %4834 = vmatmul.mubr.bf16.vlgmr.msra.gmra.mrb[16].mxu1 %v4208_v39  ;;  %v11670_v39 = vld [vmem:[%s12362_s30 + $0xe28] ss:$16 sps:$4 sm:$0xff]  }
 0x2c6   : > { %4761 = vmatpush1.bf16.msra.mxu0 %v11589_v40  ;;  %4843 = vmatpush1.bf16.msra.mxu1 %v11592_v41  ;;  %v11675_v40 = vld [vmem:[%s12362_s30 + $0xe44] ss:$16 sps:$4 sm:$0xff]   ;;  %v11678_v41 = vld [vmem:[%s12362_s30 + $0xe4c] ss:$16 sps:$4 sm:$0xff]  }
 0x2c7   : > { %4762 = vmatprep.subr.bf16.mxu0 %v11597_v27  ;;  %4844 = vmatprep.subr.bf16.mxu1 %v11600_v43  ;;  %v11673_v27 = vld [vmem:[%s12362_s30 + $0xe40] ss:$16 sps:$4 sm:$0xff]   ;;  %v11676_v43 = vld [vmem:[%s12362_s30 + $0xe48] ss:$16 sps:$4 sm:$0xff]  }
 0x2c8   : > { %4792 = vmatprep.mubr.bf16.mxu0 %v12304_v16  ;;  %4874 = vmatprep.mubr.bf16.mxu1 %v12304_v16 }
 0x2ca   : > { %4763 = vmatpush1.bf16.msra.mxu0 %v11595_v44  ;;  %4845 = vmatpush1.bf16.msra.mxu1 %v11598_v7  ;;  %v11681_v44 = vld [vmem:[%s12362_s30 + $0xe64] ss:$16 sps:$4 sm:$0xff]   ;;  %v11684_v7 = vld [vmem:[%s12362_s30 + $0xe6c] ss:$16 sps:$4 sm:$0xff]  }
 0x2cb   : > { %4764 = vmatprep.subr.bf16.mxu0 %v11603_v45  ;;  %4846 = vmatprep.subr.bf16.mxu1 %v11606_v47  ;;  %v11679_v45 = vld [vmem:[%s12362_s30 + $0xe60] ss:$16 sps:$4 sm:$0xff]   ;;  %v11682_v47 = vld [vmem:[%s12362_s30 + $0xe68] ss:$16 sps:$4 sm:$0xff]  }
 0x2ce   : > { %4765 = vmatpush1.bf16.msra.mxu0 %v11601_v50  ;;  %4847 = vmatpush1.bf16.msra.mxu1 %v11604_v51  ;;  %v11687_v50 = vld [vmem:[%s12362_s30 + $0xe84] ss:$16 sps:$4 sm:$0xff]   ;;  %v11690_v51 = vld [vmem:[%s12362_s30 + $0xe8c] ss:$16 sps:$4 sm:$0xff]  }
 0x2cf   : > { %4766 = vmatprep.subr.bf16.mxu0 %v11609_v52  ;;  %4848 = vmatprep.subr.bf16.mxu1 %v11612_v53  ;;  %v11685_v52 = vld [vmem:[%s12362_s30 + $0xe80] ss:$16 sps:$4 sm:$0xff]   ;;  %v11688_v53 = vld [vmem:[%s12362_s30 + $0xe88] ss:$16 sps:$4 sm:$0xff]  }
 0x2d2   : > { %4767 = vmatpush1.bf16.msra.mxu0 %v11607_v57  ;;  %4849 = vmatpush1.bf16.msra.mxu1 %v11610_v58  ;;  %v11696_v57 = vld [vmem:[%s12362_s30 + $0xeac] ss:$16 sps:$4 sm:$0xff]  }
 0x2d3   : > { %4768 = vmatprep.subr.bf16.mxu0 %v11615_v48  ;;  %4850 = vmatprep.subr.bf16.mxu1 %v11618_v25 }
 0x2d6   : > { %4769 = vmatpush1.bf16.msra.mxu0 %v11613_v63  ;;  %4851 = vmatpush1.bf16.msra.mxu1 %v11616_v61 }
 0x2d7   : > { %5442 = vmatprep.subr.bf16.mxu0 %v11621_v49  ;;  %5524 = vmatprep.subr.bf16.mxu1 %v11624_v62 }
 0x2d9   : > { %9706 = vmatmul.mubr.msk.bf16.vlgmr.msra.gmra.mrb[16].mxu0 %vm1823_vm12, %v4210_v2  ;;  %9707 = vmatmul.mubr.msk.bf16.vlgmr.msra.gmra.mrb[16].mxu1 %vm1823_vm12, %v4210_v2 }
 0x2da   : > { %5443 = vmatpush1.bf16.msra.mxu0 %v11619_v8  ;;  %5525 = vmatpush1.bf16.msra.mxu1 %v11622_v0  ;;  %v11691_v8 = vld [vmem:[%s12362_s30 + $0xea0] ss:$16 sps:$4 sm:$0xff]   ;;  %v11694_v0 = vld [vmem:[%s12362_s30 + $0xea8] ss:$16 sps:$4 sm:$0xff]  }
 0x2db   : > { %5444 = vmatprep.subr.bf16.mxu0 %v11627_v4  ;;  %5526 = vmatprep.subr.bf16.mxu1 %v11630_v6  ;;  %v11699_v4 = vld [vmem:[%s12362_s30 + $0xec4] ss:$16 sps:$4 sm:$0xff]   ;;  %v11702_v6 = vld [vmem:[%s12362_s30 + $0xecc] ss:$16 sps:$4 sm:$0xff]  }
 0x2dc   : > { %5474 = vmatprep.mubr.bf16.mxu0 %v4932_v10  ;;  %5556 = vmatprep.mubr.bf16.mxu1 %v4932_v10 }
 0x2de   : > { %5445 = vmatpush1.bf16.msra.mxu0 %v11625_v9  ;;  %5527 = vmatpush1.bf16.msra.mxu1 %v11628_v20 }
 0x2df   : > { %5446 = vmatprep.subr.bf16.mxu0 %v11633_v11  ;;  %5528 = vmatprep.subr.bf16.mxu1 %v11636_v12  ;;  %v11697_v11 = vld [vmem:[%s12362_s30 + $0xec0] ss:$16 sps:$4 sm:$0xff]   ;;  %v11700_v12 = vld [vmem:[%s12362_s30 + $0xec8] ss:$16 sps:$4 sm:$0xff]  }
 0x2e2   : > { %5447 = vmatpush1.bf16.msra.mxu0 %v11631_v24  ;;  %5529 = vmatpush1.bf16.msra.mxu1 %v11634_v13  ;;  %v11705_v24 = vld [vmem:[%s12362_s30 + $0xee4] ss:$16 sps:$4 sm:$0xff]   ;;  %v11708_v13 = vld [vmem:[%s12362_s30 + $0xeec] ss:$16 sps:$4 sm:$0xff]  }
 0x2e3   : > { %5448 = vmatprep.subr.bf16.mxu0 %v11639_v14  ;;  %5530 = vmatprep.subr.bf16.mxu1 %v11642_v15  ;;  %v11703_v15 = vld [vmem:[%s12362_s30 + $0xee0] ss:$16 sps:$4 sm:$0xff]  }
 0x2e6   : > { %5449 = vmatpush1.bf16.msra.mxu0 %v11637_v17  ;;  %5531 = vmatpush1.bf16.msra.mxu1 %v11640_v18  ;;  %v11706_v17 = vld [vmem:[%s12362_s30 + $0xee8] ss:$16 sps:$4 sm:$0xff]   ;;  %v11711_v18 = vld [vmem:[%s12362_s30 + $0xf04] ss:$16 sps:$4 sm:$0xff]  }
 0x2e7   : > { %5450 = vmatprep.subr.bf16.mxu0 %v11645_v3  ;;  %5532 = vmatprep.subr.bf16.mxu1 %v11648_v5  ;;  %v11714_v3 = vld [vmem:[%s12362_s30 + $0xf0c] ss:$16 sps:$4 sm:$0xff]   ;;  %v11709_v5 = vld [vmem:[%s12362_s30 + $0xf00] ss:$16 sps:$4 sm:$0xff]  }
 0x2ea   : > { %5451 = vmatpush1.bf16.msra.mxu0 %v11643_v19  ;;  %5533 = vmatpush1.bf16.msra.mxu1 %v11646_v21  ;;  %v11712_v19 = vld [vmem:[%s12362_s30 + $0xf08] ss:$16 sps:$4 sm:$0xff]   ;;  %v11721_v21 = vld [vmem:[%s12362_s30 + $0xf2c] ss:$16 sps:$4 sm:$0xff]  }
 0x2eb   : > { %5452 = vmatprep.subr.bf16.mxu0 %v11651_v22  ;;  %5534 = vmatprep.subr.bf16.mxu1 %v11654_v23  ;;  %v4931_v22 = vpack.c.bf16 %v13348_v59, %v13348_v59  ;;  %v11716_v23 = vld [vmem:[%s12362_s30 + $0xf20] ss:$16 sps:$4 sm:$0xff]   ;;  %v11725_v59 = vld [vmem:[%s12362_s30 + $0xf48] ss:$16 sps:$4 sm:$0xff]  }
 0x2ee   : > { %5453 = vmatpush1.bf16.msra.mxu0 %v11649_v26  ;;  %5535 = vmatpush1.bf16.msra.mxu1 %v11652_v55  ;;  %v11719_v26 = vld [vmem:[%s12362_s30 + $0xf28] ss:$16 sps:$4 sm:$0xff]   ;;  %v11724_v55 = vld [vmem:[%s12362_s30 + $0xf44] ss:$16 sps:$4 sm:$0xff]  }
 0x2ef   : > { %5454 = vmatprep.subr.bf16.mxu0 %v11657_v46  ;;  %5536 = vmatprep.subr.bf16.mxu1 %v11660_v28  ;;  %v11727_v46 = vld [vmem:[%s12362_s30 + $0xf4c] ss:$16 sps:$4 sm:$0xff]   ;;  %v11722_v28 = vld [vmem:[%s12362_s30 + $0xf40] ss:$16 sps:$4 sm:$0xff]  }
 0x2f2   : > { %5455 = vmatpush1.bf16.msra.mxu0 %v11655_v29  ;;  %5537 = vmatpush1.bf16.msra.mxu1 %v11658_v35  ;;  %v11730_v29 = vld [vmem:[%s12362_s30 + $0xf64] ss:$16 sps:$4 sm:$0xff]   ;;  %v11733_v35 = vld [vmem:[%s12362_s30 + $0xf6c] ss:$16 sps:$4 sm:$0xff]  }
 0x2f3   : > { %5456 = vmatprep.subr.bf16.mxu0 %v11663_v36  ;;  %5538 = vmatprep.subr.bf16.mxu1 %v11666_v37  ;;  %v11728_v36 = vld [vmem:[%s12362_s30 + $0xf60] ss:$16 sps:$4 sm:$0xff]   ;;  %v11731_v37 = vld [vmem:[%s12362_s30 + $0xf68] ss:$16 sps:$4 sm:$0xff]  }
 0x2f6   : > { %5457 = vmatpush1.bf16.msra.mxu0 %v11661_v31  ;;  %5539 = vmatpush1.bf16.msra.mxu1 %v11664_v32  ;;  %v11736_v31 = vld [vmem:[%s12362_s30 + $0xf84] ss:$16 sps:$4 sm:$0xff]   ;;  %v11739_v32 = vld [vmem:[%s12362_s30 + $0xf8c] ss:$16 sps:$4 sm:$0xff]  }
 0x2f7   : > { %5458 = vmatprep.subr.bf16.mxu0 %v11669_v33  ;;  %5540 = vmatprep.subr.bf16.mxu1 %v11672_v34  ;;  %v4912_v33 = vcombine.high %v13338_v54, %v13338_v54  ;;  %v13447_v34 = vld [vmem:[%s12873_s11 + $0x24] sm:$0x3f] }
 0x2f9   : > { %v4926_v54 = vrot.slane %v4912_v33, %v12869_v42  ;;  %v11820_v33 = vld [vmem:[%s12362_s30 + $0x1144] ss:$16 sps:$4 sm:$0xff]  }
 0x2fa   : > { %5459 = vmatpush1.bf16.msra.mxu0 %v11667_v38  ;;  %5541 = vmatpush1.bf16.msra.mxu1 %v11670_v39  ;;  %v11734_v38 = vld [vmem:[%s12362_s30 + $0xf80] ss:$16 sps:$4 sm:$0xff]   ;;  %v11737_v39 = vld [vmem:[%s12362_s30 + $0xf88] ss:$16 sps:$4 sm:$0xff]  }
 0x2fb   : > { %5460 = vmatprep.subr.bf16.mxu0 %v11675_v40  ;;  %5542 = vmatprep.subr.bf16.mxu1 %v11678_v41  ;;  %v11742_v40 = vld [vmem:[%s12362_s30 + $0xfa4] ss:$16 sps:$4 sm:$0xff]   ;;  %v11745_v41 = vld [vmem:[%s12362_s30 + $0xfac] ss:$16 sps:$4 sm:$0xff]  }
 0x2fe   : > { %5461 = vmatpush1.bf16.msra.mxu0 %v11673_v27  ;;  %5543 = vmatpush1.bf16.msra.mxu1 %v11676_v43  ;;  %v13455_v27 = vrot.slane %v13447_v34, %v12869_v42  ;;  %v11740_v43 = vld [vmem:[%s12362_s30 + $0xfa0] ss:$16 sps:$4 sm:$0xff]  }
 0x2ff   : > { %5462 = vmatprep.subr.bf16.mxu0 %v11681_v44  ;;  %5544 = vmatprep.subr.bf16.mxu1 %v11684_v7  ;;  %v11743_v44 = vld [vmem:[%s12362_s30 + $0xfa8] ss:$16 sps:$4 sm:$0xff]   ;;  %v11748_v7 = vld [vmem:[%s12362_s30 + $0xfc4] ss:$16 sps:$4 sm:$0xff]  }
 0x302   : > { %5463 = vmatpush1.bf16.msra.mxu0 %v11679_v45  ;;  %5545 = vmatpush1.bf16.msra.mxu1 %v11682_v47  ;;  %v11751_v45 = vld [vmem:[%s12362_s30 + $0xfcc] ss:$16 sps:$4 sm:$0xff]   ;;  %v5650_v47 = vcombine.high %v13455_v27, %v13455_v27 }
 0x303   : > { %5464 = vmatprep.subr.bf16.mxu0 %v11687_v50  ;;  %5546 = vmatprep.subr.bf16.mxu1 %v11690_v51  ;;  %v4933_v50 = vpack.c.bf16 %v4926_v54, %v4926_v54  ;;  %v11746_v51 = vld [vmem:[%s12362_s30 + $0xfc0] ss:$16 sps:$4 sm:$0xff]  }
 0x304   : > { %v3348_v58 = vpop.f32.mrb[8].mxu0  ;;  %v3430_v48 = vpop.f32.mrb[8].mxu1 }
 0x305   : > { %v3350_v25 = vpop.f32.mrb[9].mxu0  ;;  %v3432_v60 = vpop.f32.mrb[9].mxu1 }
 0x306   : > { %v3441_v63 = vcombine.low %v3348_v58, %v3350_v25  ;;  %v3442_v61 = vcombine.low %v3430_v48, %v3432_v60  ;;  %v3352_v49 = vpop.f32.mrb[10].mxu0  ;;  %v3434_v62 = vpop.f32.mrb[10].mxu1  ;;  %5465 = vmatpush1.bf16.msra.mxu0 %v11685_v52  ;;  %5547 = vmatpush1.bf16.msra.mxu1 %v11688_v53  ;;  %v11749_v52 = vld [vmem:[%s12362_s30 + $0xfc8] ss:$16 sps:$4 sm:$0xff]   ;;  %v11754_v53 = vld [vmem:[%s12362_s30 + $0xfe4] ss:$16 sps:$4 sm:$0xff]  }
 0x307   : > { %v3353_v1 = vpop.f32.mrb[11].mxu0  ;;  %v3435_v2 = vpop.f32.mrb[11].mxu1  ;;  %5466 = vmatprep.subr.bf16.mxu0 %v11693_v56  ;;  %5548 = vmatprep.subr.bf16.mxu1 %v11696_v57  ;;  %v11757_v56 = vld [vmem:[%s12362_s30 + $0xfec] ss:$16 sps:$4 sm:$0xff]   ;;  %v5655_v57 = vpack.c.bf16 %v5650_v47, %v5650_v47  ;;  %v11752_v58 = vld [vmem:[%s12362_s30 + $0xfe0] ss:$16 sps:$4 sm:$0xff]  }
 0x308   : > { %v3449_v9 = vrot.slane %v3441_v63, %v12869_v42  ;;  %v3456_v20 = vrot.slane %v3442_v61, %v12869_v42  ;;  %v11755_v48 = vld [vmem:[%s12362_s30 + $0xfe8] ss:$16 sps:$4 sm:$0xff]   ;;  %v11760_v25 = vld [vmem:[%s12362_s30 + $0x1004] ss:$16 sps:$4 sm:$0xff]   ;;  %v11763_v60 = vld [vmem:[%s12362_s30 + $0x100c] ss:$16 sps:$4 sm:$0xff]  }
 0x309   : > { %v11758_v63 = vld [vmem:[%s12362_s30 + $0x1000] ss:$16 sps:$4 sm:$0xff]   ;;  %v11761_v61 = vld [vmem:[%s12362_s30 + $0x1008] ss:$16 sps:$4 sm:$0xff]   ;;  %v11766_v49 = vld [vmem:[%s12362_s30 + $0x1024] ss:$16 sps:$4 sm:$0xff]  }
 0x30a   : > { %v3457_v10 = vcombine.low %v3449_v9, %v3456_v20  ;;  %5467 = vmatpush1.bf16.msra.mxu0 %v11691_v8  ;;  %5549 = vmatpush1.bf16.msra.mxu1 %v11694_v0  ;;  %v11769_v62 = vld [vmem:[%s12362_s30 + $0x102c] ss:$16 sps:$4 sm:$0xff]   ;;  %v11764_v8 = vld [vmem:[%s12362_s30 + $0x1020] ss:$16 sps:$4 sm:$0xff]   ;;  %v11767_v0 = vld [vmem:[%s12362_s30 + $0x1028] ss:$16 sps:$4 sm:$0xff]  }
 0x30b   : > { %5468 = vmatprep.subr.bf16.mxu0 %v11699_v4  ;;  %5550 = vmatprep.subr.bf16.mxu1 %v11702_v6  ;;  %v11772_v1 = vld [vmem:[%s12362_s30 + $0x1044] ss:$16 sps:$4 sm:$0xff]   ;;  %v11775_v2 = vld [vmem:[%s12362_s30 + $0x104c] ss:$16 sps:$4 sm:$0xff]   ;;  %v11770_v4 = vld [vmem:[%s12362_s30 + $0x1040] ss:$16 sps:$4 sm:$0xff]  }
 0x30c   : > { %v13418_v14 = vadd.f32 %v3457_v10, %v13311_v30  ;;  %v11718_v30 = vld [vmem:[%s12362_s30 + $0xf24] ss:$16 sps:$4 sm:$0xff]   ;;  %v11773_v6 = vld [vmem:[%s12362_s30 + $0x1048] ss:$16 sps:$4 sm:$0xff]   ;;  %v11781_v20 = vld [vmem:[%s12362_s30 + $0x106c] ss:$16 sps:$4 sm:$0xff]  }
 0x30d   : > { %v11778_v9 = vld [vmem:[%s12362_s30 + $0x1064] ss:$16 sps:$4 sm:$0xff]   ;;  %v11776_v10 = vld [vmem:[%s12362_s30 + $0x1060] ss:$16 sps:$4 sm:$0xff]  }
 0x30e   : > { %5469 = vmatpush1.bf16.msra.mxu0 %v11697_v11  ;;  %5551 = vmatpush1.bf16.msra.mxu1 %v11700_v12  ;;  %v11779_v11 = vld [vmem:[%s12362_s30 + $0x1068] ss:$16 sps:$4 sm:$0xff]   ;;  %v11784_v12 = vld [vmem:[%s12362_s30 + $0x1084] ss:$16 sps:$4 sm:$0xff]   ;;  %v11818_v47 = vld [vmem:[%s12362_s30 + $0x1140] ss:$16 sps:$4 sm:$0xff]  }
 0x30f   : > { %5470 = vmatprep.subr.bf16.mxu0 %v11705_v24  ;;  %5552 = vmatprep.subr.bf16.mxu1 %v11708_v13  ;;  %v11787_v24 = vld [vmem:[%s12362_s30 + $0x108c] ss:$16 sps:$4 sm:$0xff]   ;;  %v11782_v13 = vld [vmem:[%s12362_s30 + $0x1080] ss:$16 sps:$4 sm:$0xff]  }
 0x312   : > { %5471 = vmatpush1.bf16.msra.mxu0 %v11703_v15  ;;  %5553 = vmatpush1.bf16.msra.mxu1 %v11706_v17  ;;  %v11785_v15 = vld [vmem:[%s12362_s30 + $0x1088] ss:$16 sps:$4 sm:$0xff]   ;;  %v11790_v17 = vld [vmem:[%s12362_s30 + $0x10a4] ss:$16 sps:$4 sm:$0xff]  }
 0x313   : > { %5472 = vmatprep.subr.bf16.mxu0 %v11711_v18  ;;  %5554 = vmatprep.subr.bf16.mxu1 %v11714_v3  ;;  %v11793_v18 = vld [vmem:[%s12362_s30 + $0x10ac] ss:$16 sps:$4 sm:$0xff]   ;;  %v11788_v3 = vld [vmem:[%s12362_s30 + $0x10a0] ss:$16 sps:$4 sm:$0xff]  }
 0x316   : > { %5473 = vmatpush1.bf16.msra.mxu0 %v11709_v5  ;;  %5555 = vmatpush1.bf16.msra.mxu1 %v11712_v19  ;;  %v11791_v5 = vld [vmem:[%s12362_s30 + $0x10a8] ss:$16 sps:$4 sm:$0xff]   ;;  %v11796_v19 = vld [vmem:[%s12362_s30 + $0x10c4] ss:$16 sps:$4 sm:$0xff]  }
 0x317   : > { %5483 = vmatprep.subr.bf16.mxu0 %v11718_v30  ;;  %5565 = vmatprep.subr.bf16.mxu1 %v11721_v21  ;;  %v11799_v30 = vld [vmem:[%s12362_s30 + $0x10cc] ss:$16 sps:$4 sm:$0xff]   ;;  %v11794_v21 = vld [vmem:[%s12362_s30 + $0x10c0] ss:$16 sps:$4 sm:$0xff]  }
 0x319   : > { %5475 = vmatmul.mubr.bf16.vlgmr.msra.gmra.mrb[20].mxu0 %v4931_v22  ;;  %5557 = vmatmul.mubr.bf16.vlgmr.msra.gmra.mrb[20].mxu1 %v4931_v22  ;;  %v11797_v22 = vld [vmem:[%s12362_s30 + $0x10c8] ss:$16 sps:$4 sm:$0xff]  }
 0x31a   : > { %5484 = vmatpush1.bf16.msra.mxu0 %v11716_v23  ;;  %5566 = vmatpush1.bf16.msra.mxu1 %v11719_v26  ;;  %v11802_v23 = vld [vmem:[%s12362_s30 + $0x10e4] ss:$16 sps:$4 sm:$0xff]   ;;  %v11805_v26 = vld [vmem:[%s12362_s30 + $0x10ec] ss:$16 sps:$4 sm:$0xff]  }
 0x31b   : > { %5485 = vmatprep.subr.bf16.mxu0 %v11724_v55  ;;  %5567 = vmatprep.subr.bf16.mxu1 %v11727_v46  ;;  %v11800_v55 = vld [vmem:[%s12362_s30 + $0x10e0] ss:$16 sps:$4 sm:$0xff]   ;;  %v11803_v46 = vld [vmem:[%s12362_s30 + $0x10e8] ss:$16 sps:$4 sm:$0xff]  }
 0x31c   : > { %5515 = vmatprep.mubr.bf16.mxu0 %v12304_v16  ;;  %5597 = vmatprep.mubr.bf16.mxu1 %v12304_v16 }
 0x31e   : > { %5486 = vmatpush1.bf16.msra.mxu0 %v11722_v28  ;;  %5568 = vmatpush1.bf16.msra.mxu1 %v11725_v59  ;;  %v11808_v28 = vld [vmem:[%s12362_s30 + $0x1104] ss:$16 sps:$4 sm:$0xff]   ;;  %v11811_v59 = vld [vmem:[%s12362_s30 + $0x110c] ss:$16 sps:$4 sm:$0xff]  }
 0x31f   : > { %5487 = vmatprep.subr.bf16.mxu0 %v11730_v29  ;;  %5569 = vmatprep.subr.bf16.mxu1 %v11733_v35  ;;  %v11806_v29 = vld [vmem:[%s12362_s30 + $0x1100] ss:$16 sps:$4 sm:$0xff]   ;;  %v11809_v35 = vld [vmem:[%s12362_s30 + $0x1108] ss:$16 sps:$4 sm:$0xff]  }
 0x322   : > { %5488 = vmatpush1.bf16.msra.mxu0 %v11728_v36  ;;  %5570 = vmatpush1.bf16.msra.mxu1 %v11731_v37  ;;  %v11814_v36 = vld [vmem:[%s12362_s30 + $0x1124] ss:$16 sps:$4 sm:$0xff]   ;;  %v11817_v37 = vld [vmem:[%s12362_s30 + $0x112c] ss:$16 sps:$4 sm:$0xff]  }
 0x323   : > { %5489 = vmatprep.subr.bf16.mxu0 %v11736_v31  ;;  %5571 = vmatprep.subr.bf16.mxu1 %v11739_v32  ;;  %v11812_v31 = vld [vmem:[%s12362_s30 + $0x1120] ss:$16 sps:$4 sm:$0xff]   ;;  %v11815_v32 = vld [vmem:[%s12362_s30 + $0x1128] ss:$16 sps:$4 sm:$0xff]  }
 0x326   : > { %5490 = vmatpush1.bf16.msra.mxu0 %v11734_v38  ;;  %5572 = vmatpush1.bf16.msra.mxu1 %v11737_v39  ;;  %v11823_v38 = vld [vmem:[%s12362_s30 + $0x114c] ss:$16 sps:$4 sm:$0xff]  }
 0x327   : > { %5491 = vmatprep.subr.bf16.mxu0 %v11742_v40  ;;  %5573 = vmatprep.subr.bf16.mxu1 %v11745_v41 }
 0x32a   : > { %5492 = vmatpush1.bf16.msra.mxu0 %v11740_v43  ;;  %5574 = vmatpush1.bf16.msra.mxu1 %v11743_v44 }
 0x32b   : > { %6165 = vmatprep.subr.bf16.mxu0 %v11748_v7  ;;  %6247 = vmatprep.subr.bf16.mxu1 %v11751_v45 }
 0x32d   : > { %9878 = vmatmul.mubr.msk.bf16.vlgmr.msra.gmra.mrb[20].mxu0 %vm1823_vm12, %v4933_v50  ;;  %9879 = vmatmul.mubr.msk.bf16.vlgmr.msra.gmra.mrb[20].mxu1 %vm1823_vm12, %v4933_v50  ;;  %v11821_v50 = vld [vmem:[%s12362_s30 + $0x1148] ss:$16 sps:$4 sm:$0xff]  }
 0x32e   : > { %6166 = vmatpush1.bf16.msra.mxu0 %v11746_v51  ;;  %6248 = vmatpush1.bf16.msra.mxu1 %v11749_v52 }
 0x32f   : > { %6167 = vmatprep.subr.bf16.mxu0 %v11754_v53  ;;  %6249 = vmatprep.subr.bf16.mxu1 %v11757_v56  ;;  %v11826_v53 = vld [vmem:[%s12362_s30 + $0x1164] ss:$16 sps:$4 sm:$0xff]   ;;  %v11829_v56 = vld [vmem:[%s12362_s30 + $0x116c] ss:$16 sps:$4 sm:$0xff]  }
 0x330   : > { %6197 = vmatprep.mubr.bf16.mxu0 %v5655_v57  ;;  %6279 = vmatprep.mubr.bf16.mxu1 %v5655_v57 }
 0x332   : > { %6168 = vmatpush1.bf16.msra.mxu0 %v11752_v58  ;;  %6250 = vmatpush1.bf16.msra.mxu1 %v11755_v48 }
 0x333   : > { %6169 = vmatprep.subr.bf16.mxu0 %v11760_v25  ;;  %6251 = vmatprep.subr.bf16.mxu1 %v11763_v60  ;;  %v11824_v25 = vld [vmem:[%s12362_s30 + $0x1160] ss:$16 sps:$4 sm:$0xff]   ;;  %v11827_v60 = vld [vmem:[%s12362_s30 + $0x1168] ss:$16 sps:$4 sm:$0xff]  }
 0x336   : > { %6170 = vmatpush1.bf16.msra.mxu0 %v11758_v63  ;;  %6252 = vmatpush1.bf16.msra.mxu1 %v11761_v61  ;;  %v11832_v63 = vld [vmem:[%s12362_s30 + $0x1184] ss:$16 sps:$4 sm:$0xff]   ;;  %v11835_v61 = vld [vmem:[%s12362_s30 + $0x118c] ss:$16 sps:$4 sm:$0xff]  }
 0x337   : > { %6171 = vmatprep.subr.bf16.mxu0 %v11766_v49  ;;  %6253 = vmatprep.subr.bf16.mxu1 %v11769_v62  ;;  %v11830_v62 = vld [vmem:[%s12362_s30 + $0x1180] ss:$16 sps:$4 sm:$0xff]  }
 0x33a   : > { %6172 = vmatpush1.bf16.msra.mxu0 %v11764_v8  ;;  %6254 = vmatpush1.bf16.msra.mxu1 %v11767_v0  ;;  %v11833_v8 = vld [vmem:[%s12362_s30 + $0x1188] ss:$16 sps:$4 sm:$0xff]   ;;  %v11838_v0 = vld [vmem:[%s12362_s30 + $0x11a4] ss:$16 sps:$4 sm:$0xff]  }
 0x33b   : > { %6173 = vmatprep.subr.bf16.mxu0 %v11772_v1  ;;  %6255 = vmatprep.subr.bf16.mxu1 %v11775_v2  ;;  %v11841_v1 = vld [vmem:[%s12362_s30 + $0x11ac] ss:$16 sps:$4 sm:$0xff]   ;;  %v11836_v2 = vld [vmem:[%s12362_s30 + $0x11a0] ss:$16 sps:$4 sm:$0xff]  }
 0x33e   : > { %6174 = vmatpush1.bf16.msra.mxu0 %v11770_v4  ;;  %6256 = vmatpush1.bf16.msra.mxu1 %v11773_v6  ;;  %v11839_v4 = vld [vmem:[%s12362_s30 + $0x11a8] ss:$16 sps:$4 sm:$0xff]   ;;  %v11848_v6 = vld [vmem:[%s12362_s30 + $0x11cc] ss:$16 sps:$4 sm:$0xff]  }
 0x33f   : > { %6175 = vmatprep.subr.bf16.mxu0 %v11778_v9  ;;  %6257 = vmatprep.subr.bf16.mxu1 %v11781_v20  ;;  %v5654_v9 = vpack.c.bf16 %v13455_v27, %v13455_v27  ;;  %v11843_v20 = vld [vmem:[%s12362_s30 + $0x11c0] ss:$16 sps:$4 sm:$0xff]   ;;  %v11852_v27 = vld [vmem:[%s12362_s30 + $0x11e8] ss:$16 sps:$4 sm:$0xff]  }
 0x342   : > { %6176 = vmatpush1.bf16.msra.mxu0 %v11776_v10  ;;  %6258 = vmatpush1.bf16.msra.mxu1 %v11779_v11  ;;  %v11846_v10 = vld [vmem:[%s12362_s30 + $0x11c8] ss:$16 sps:$4 sm:$0xff]   ;;  %v11851_v11 = vld [vmem:[%s12362_s30 + $0x11e4] ss:$16 sps:$4 sm:$0xff]  }
 0x343   : > { %6177 = vmatprep.subr.bf16.mxu0 %v11784_v12  ;;  %6259 = vmatprep.subr.bf16.mxu1 %v11787_v24  ;;  %v11854_v12 = vld [vmem:[%s12362_s30 + $0x11ec] ss:$16 sps:$4 sm:$0xff]   ;;  %v11849_v24 = vld [vmem:[%s12362_s30 + $0x11e0] ss:$16 sps:$4 sm:$0xff]  }
 0x346   : > { %6178 = vmatpush1.bf16.msra.mxu0 %v11782_v13  ;;  %6260 = vmatpush1.bf16.msra.mxu1 %v11785_v15  ;;  %v11857_v13 = vld [vmem:[%s12362_s30 + $0x1204] ss:$16 sps:$4 sm:$0xff]   ;;  %v11860_v15 = vld [vmem:[%s12362_s30 + $0x120c] ss:$16 sps:$4 sm:$0xff]  }
 0x347   : > { %6179 = vmatprep.subr.bf16.mxu0 %v11790_v17  ;;  %6261 = vmatprep.subr.bf16.mxu1 %v11793_v18  ;;  %v11855_v17 = vld [vmem:[%s12362_s30 + $0x1200] ss:$16 sps:$4 sm:$0xff]   ;;  %v11858_v18 = vld [vmem:[%s12362_s30 + $0x1208] ss:$16 sps:$4 sm:$0xff]  }
 0x34a   : > { %6180 = vmatpush1.bf16.msra.mxu0 %v11788_v3  ;;  %6262 = vmatpush1.bf16.msra.mxu1 %v11791_v5  ;;  %v11863_v3 = vld [vmem:[%s12362_s30 + $0x1224] ss:$16 sps:$4 sm:$0xff]   ;;  %v11866_v5 = vld [vmem:[%s12362_s30 + $0x122c] ss:$16 sps:$4 sm:$0xff]  }
 0x34b   : > { %6181 = vmatprep.subr.bf16.mxu0 %v11796_v19  ;;  %6263 = vmatprep.subr.bf16.mxu1 %v11799_v30  ;;  %v5635_v19 = vcombine.high %v13447_v34, %v13447_v34  ;;  %v13554_v30 = vld [vmem:[%s12873_s11 + $0x2a] sm:$0x3f] }
 0x34d   : > { %v5649_v34 = vrot.slane %v5635_v19, %v12869_v42  ;;  %v11947_v19 = vld [vmem:[%s12362_s30 + $0x13e4] ss:$16 sps:$4 sm:$0xff]  }
 0x34e   : > { %6182 = vmatpush1.bf16.msra.mxu0 %v11794_v21  ;;  %6264 = vmatpush1.bf16.msra.mxu1 %v11797_v22  ;;  %v11861_v21 = vld [vmem:[%s12362_s30 + $0x1220] ss:$16 sps:$4 sm:$0xff]   ;;  %v11864_v22 = vld [vmem:[%s12362_s30 + $0x1228] ss:$16 sps:$4 sm:$0xff]  }
 0x34f   : > { %6183 = vmatprep.subr.bf16.mxu0 %v11802_v23  ;;  %6265 = vmatprep.subr.bf16.mxu1 %v11805_v26  ;;  %v11869_v23 = vld [vmem:[%s12362_s30 + $0x1244] ss:$16 sps:$4 sm:$0xff]   ;;  %v11872_v26 = vld [vmem:[%s12362_s30 + $0x124c] ss:$16 sps:$4 sm:$0xff]  }
 0x352   : > { %6184 = vmatpush1.bf16.msra.mxu0 %v11800_v55  ;;  %6266 = vmatpush1.bf16.msra.mxu1 %v11803_v46  ;;  %v13562_v55 = vrot.slane %v13554_v30, %v12869_v42  ;;  %v11867_v46 = vld [vmem:[%s12362_s30 + $0x1240] ss:$16 sps:$4 sm:$0xff]  }
 0x353   : > { %6185 = vmatprep.subr.bf16.mxu0 %v11808_v28  ;;  %6267 = vmatprep.subr.bf16.mxu1 %v11811_v59  ;;  %v11870_v28 = vld [vmem:[%s12362_s30 + $0x1248] ss:$16 sps:$4 sm:$0xff]   ;;  %v11875_v59 = vld [vmem:[%s12362_s30 + $0x1264] ss:$16 sps:$4 sm:$0xff]  }
 0x356   : > { %6186 = vmatpush1.bf16.msra.mxu0 %v11806_v29  ;;  %6268 = vmatpush1.bf16.msra.mxu1 %v11809_v35  ;;  %v11878_v29 = vld [vmem:[%s12362_s30 + $0x126c] ss:$16 sps:$4 sm:$0xff]   ;;  %v6373_v35 = vcombine.high %v13562_v55, %v13562_v55 }
 0x357   : > { %6187 = vmatprep.subr.bf16.mxu0 %v11814_v36  ;;  %6269 = vmatprep.subr.bf16.mxu1 %v11817_v37  ;;  %v5656_v36 = vpack.c.bf16 %v5649_v34, %v5649_v34  ;;  %v11873_v37 = vld [vmem:[%s12362_s30 + $0x1260] ss:$16 sps:$4 sm:$0xff]  }
 0x358   : > { %v4071_v39 = vpop.f32.mrb[12].mxu0  ;;  %v4153_v40 = vpop.f32.mrb[12].mxu1 }
 0x359   : > { %v4073_v41 = vpop.f32.mrb[13].mxu0  ;;  %v4155_v54 = vpop.f32.mrb[13].mxu1 }
 0x35a   : > { %v4164_v43 = vcombine.low %v4071_v39, %v4073_v41  ;;  %v4165_v44 = vcombine.low %v4153_v40, %v4155_v54  ;;  %v4075_v7 = vpop.f32.mrb[14].mxu0  ;;  %v4157_v45 = vpop.f32.mrb[14].mxu1  ;;  %6188 = vmatpush1.bf16.msra.mxu0 %v11812_v31  ;;  %6270 = vmatpush1.bf16.msra.mxu1 %v11815_v32  ;;  %v11876_v31 = vld [vmem:[%s12362_s30 + $0x1268] ss:$16 sps:$4 sm:$0xff]   ;;  %v11881_v32 = vld [vmem:[%s12362_s30 + $0x1284] ss:$16 sps:$4 sm:$0xff]  }
 0x35b   : > { %v4076_v51 = vpop.f32.mrb[15].mxu0  ;;  %v4158_v52 = vpop.f32.mrb[15].mxu1  ;;  %6189 = vmatprep.subr.bf16.mxu0 %v11820_v33  ;;  %6271 = vmatprep.subr.bf16.mxu1 %v11823_v38  ;;  %v11884_v33 = vld [vmem:[%s12362_s30 + $0x128c] ss:$16 sps:$4 sm:$0xff]   ;;  %v6378_v38 = vpack.c.bf16 %v6373_v35, %v6373_v35  ;;  %v11879_v39 = vld [vmem:[%s12362_s30 + $0x1280] ss:$16 sps:$4 sm:$0xff]  }
 0x35c   : > { %v4172_v57 = vrot.slane %v4164_v43, %v12869_v42  ;;  %v4179_v58 = vrot.slane %v4165_v44, %v12869_v42  ;;  %v11882_v40 = vld [vmem:[%s12362_s30 + $0x1288] ss:$16 sps:$4 sm:$0xff]   ;;  %v11887_v41 = vld [vmem:[%s12362_s30 + $0x12a4] ss:$16 sps:$4 sm:$0xff]   ;;  %v11890_v54 = vld [vmem:[%s12362_s30 + $0x12ac] ss:$16 sps:$4 sm:$0xff]  }
 0x35d   : > { %v11885_v43 = vld [vmem:[%s12362_s30 + $0x12a0] ss:$16 sps:$4 sm:$0xff]   ;;  %v11888_v44 = vld [vmem:[%s12362_s30 + $0x12a8] ss:$16 sps:$4 sm:$0xff]   ;;  %v11893_v7 = vld [vmem:[%s12362_s30 + $0x12c4] ss:$16 sps:$4 sm:$0xff]  }
 0x35e   : > { %v4180_v48 = vcombine.low %v4172_v57, %v4179_v58  ;;  %6190 = vmatpush1.bf16.msra.mxu0 %v11818_v47  ;;  %6272 = vmatpush1.bf16.msra.mxu1 %v11821_v50  ;;  %v11896_v45 = vld [vmem:[%s12362_s30 + $0x12cc] ss:$16 sps:$4 sm:$0xff]   ;;  %v11891_v47 = vld [vmem:[%s12362_s30 + $0x12c0] ss:$16 sps:$4 sm:$0xff]   ;;  %v11894_v50 = vld [vmem:[%s12362_s30 + $0x12c8] ss:$16 sps:$4 sm:$0xff]  }
 0x35f   : > { %6191 = vmatprep.subr.bf16.mxu0 %v11826_v53  ;;  %6273 = vmatprep.subr.bf16.mxu1 %v11829_v56  ;;  %v11899_v51 = vld [vmem:[%s12362_s30 + $0x12e4] ss:$16 sps:$4 sm:$0xff]   ;;  %v11902_v52 = vld [vmem:[%s12362_s30 + $0x12ec] ss:$16 sps:$4 sm:$0xff]   ;;  %v11897_v53 = vld [vmem:[%s12362_s30 + $0x12e0] ss:$16 sps:$4 sm:$0xff]  }
 0x360   : > { %v13525_v49 = vadd.f32 %v4180_v48, %v13418_v14  ;;  %v11845_v14 = vld [vmem:[%s12362_s30 + $0x11c4] ss:$16 sps:$4 sm:$0xff]   ;;  %v11900_v56 = vld [vmem:[%s12362_s30 + $0x12e8] ss:$16 sps:$4 sm:$0xff]   ;;  %v11908_v58 = vld [vmem:[%s12362_s30 + $0x130c] ss:$16 sps:$4 sm:$0xff]  }
 0x361   : > { %v11905_v57 = vld [vmem:[%s12362_s30 + $0x1304] ss:$16 sps:$4 sm:$0xff]   ;;  %v11903_v48 = vld [vmem:[%s12362_s30 + $0x1300] ss:$16 sps:$4 sm:$0xff]  }
 0x362   : > { %6192 = vmatpush1.bf16.msra.mxu0 %v11824_v25  ;;  %6274 = vmatpush1.bf16.msra.mxu1 %v11827_v60  ;;  %v11906_v25 = vld [vmem:[%s12362_s30 + $0x1308] ss:$16 sps:$4 sm:$0xff]   ;;  %v11911_v60 = vld [vmem:[%s12362_s30 + $0x1324] ss:$16 sps:$4 sm:$0xff]   ;;  %v11945_v35 = vld [vmem:[%s12362_s30 + $0x13e0] ss:$16 sps:$4 sm:$0xff]  }
 0x363   : > { %6193 = vmatprep.subr.bf16.mxu0 %v11832_v63  ;;  %6275 = vmatprep.subr.bf16.mxu1 %v11835_v61  ;;  %v11914_v63 = vld [vmem:[%s12362_s30 + $0x132c] ss:$16 sps:$4 sm:$0xff]   ;;  %v11909_v61 = vld [vmem:[%s12362_s30 + $0x1320] ss:$16 sps:$4 sm:$0xff]  }
 0x366   : > { %6194 = vmatpush1.bf16.msra.mxu0 %v11830_v62  ;;  %6276 = vmatpush1.bf16.msra.mxu1 %v11833_v8  ;;  %v11912_v62 = vld [vmem:[%s12362_s30 + $0x1328] ss:$16 sps:$4 sm:$0xff]   ;;  %v11917_v8 = vld [vmem:[%s12362_s30 + $0x1344] ss:$16 sps:$4 sm:$0xff]  }
 0x367   : > { %6195 = vmatprep.subr.bf16.mxu0 %v11838_v0  ;;  %6277 = vmatprep.subr.bf16.mxu1 %v11841_v1  ;;  %v11920_v0 = vld [vmem:[%s12362_s30 + $0x134c] ss:$16 sps:$4 sm:$0xff]   ;;  %v11915_v1 = vld [vmem:[%s12362_s30 + $0x1340] ss:$16 sps:$4 sm:$0xff]  }
 0x36a   : > { %6196 = vmatpush1.bf16.msra.mxu0 %v11836_v2  ;;  %6278 = vmatpush1.bf16.msra.mxu1 %v11839_v4  ;;  %v11918_v2 = vld [vmem:[%s12362_s30 + $0x1348] ss:$16 sps:$4 sm:$0xff]   ;;  %v11923_v4 = vld [vmem:[%s12362_s30 + $0x1364] ss:$16 sps:$4 sm:$0xff]  }
 0x36b   : > { %6206 = vmatprep.subr.bf16.mxu0 %v11845_v14  ;;  %6288 = vmatprep.subr.bf16.mxu1 %v11848_v6  ;;  %v11926_v14 = vld [vmem:[%s12362_s30 + $0x136c] ss:$16 sps:$4 sm:$0xff]   ;;  %v11921_v6 = vld [vmem:[%s12362_s30 + $0x1360] ss:$16 sps:$4 sm:$0xff]  }
 0x36d   : > { %6198 = vmatmul.mubr.bf16.vlgmr.msra.gmra.mrb[24].mxu0 %v5654_v9  ;;  %6280 = vmatmul.mubr.bf16.vlgmr.msra.gmra.mrb[24].mxu1 %v5654_v9  ;;  %v11924_v9 = vld [vmem:[%s12362_s30 + $0x1368] ss:$16 sps:$4 sm:$0xff]  }
 0x36e   : > { %6207 = vmatpush1.bf16.msra.mxu0 %v11843_v20  ;;  %6289 = vmatpush1.bf16.msra.mxu1 %v11846_v10  ;;  %v11929_v20 = vld [vmem:[%s12362_s30 + $0x1384] ss:$16 sps:$4 sm:$0xff]   ;;  %v11932_v10 = vld [vmem:[%s12362_s30 + $0x138c] ss:$16 sps:$4 sm:$0xff]  }
 0x36f   : > { %6208 = vmatprep.subr.bf16.mxu0 %v11851_v11  ;;  %6290 = vmatprep.subr.bf16.mxu1 %v11854_v12  ;;  %v11927_v11 = vld [vmem:[%s12362_s30 + $0x1380] ss:$16 sps:$4 sm:$0xff]   ;;  %v11930_v12 = vld [vmem:[%s12362_s30 + $0x1388] ss:$16 sps:$4 sm:$0xff]  }
 0x370   : > { %6238 = vmatprep.mubr.bf16.mxu0 %v12304_v16  ;;  %6320 = vmatprep.mubr.bf16.mxu1 %v12304_v16 }
 0x372   : > { %6209 = vmatpush1.bf16.msra.mxu0 %v11849_v24  ;;  %6291 = vmatpush1.bf16.msra.mxu1 %v11852_v27  ;;  %v11935_v24 = vld [vmem:[%s12362_s30 + $0x13a4] ss:$16 sps:$4 sm:$0xff]   ;;  %v11938_v27 = vld [vmem:[%s12362_s30 + $0x13ac] ss:$16 sps:$4 sm:$0xff]  }
 0x373   : > { %6210 = vmatprep.subr.bf16.mxu0 %v11857_v13  ;;  %6292 = vmatprep.subr.bf16.mxu1 %v11860_v15  ;;  %v11933_v13 = vld [vmem:[%s12362_s30 + $0x13a0] ss:$16 sps:$4 sm:$0xff]   ;;  %v11936_v15 = vld [vmem:[%s12362_s30 + $0x13a8] ss:$16 sps:$4 sm:$0xff]  }
 0x376   : > { %6211 = vmatpush1.bf16.msra.mxu0 %v11855_v17  ;;  %6293 = vmatpush1.bf16.msra.mxu1 %v11858_v18  ;;  %v11941_v17 = vld [vmem:[%s12362_s30 + $0x13c4] ss:$16 sps:$4 sm:$0xff]   ;;  %v11944_v18 = vld [vmem:[%s12362_s30 + $0x13cc] ss:$16 sps:$4 sm:$0xff]  }
 0x377   : > { %6212 = vmatprep.subr.bf16.mxu0 %v11863_v3  ;;  %6294 = vmatprep.subr.bf16.mxu1 %v11866_v5  ;;  %v11939_v3 = vld [vmem:[%s12362_s30 + $0x13c0] ss:$16 sps:$4 sm:$0xff]   ;;  %v11942_v5 = vld [vmem:[%s12362_s30 + $0x13c8] ss:$16 sps:$4 sm:$0xff]  }
 0x37a   : > { %6213 = vmatpush1.bf16.msra.mxu0 %v11861_v21  ;;  %6295 = vmatpush1.bf16.msra.mxu1 %v11864_v22  ;;  %v11950_v21 = vld [vmem:[%s12362_s30 + $0x13ec] ss:$16 sps:$4 sm:$0xff]  }
 0x37b   : > { %6214 = vmatprep.subr.bf16.mxu0 %v11869_v23  ;;  %6296 = vmatprep.subr.bf16.mxu1 %v11872_v26 }
 0x37e   : > { %6215 = vmatpush1.bf16.msra.mxu0 %v11867_v46  ;;  %6297 = vmatpush1.bf16.msra.mxu1 %v11870_v28 }
 0x37f   : > { %6888 = vmatprep.subr.bf16.mxu0 %v11875_v59  ;;  %6970 = vmatprep.subr.bf16.mxu1 %v11878_v29 }
 0x381   : > { %10050 = vmatmul.mubr.msk.bf16.vlgmr.msra.gmra.mrb[24].mxu0 %vm1823_vm12, %v5656_v36  ;;  %10051 = vmatmul.mubr.msk.bf16.vlgmr.msra.gmra.mrb[24].mxu1 %vm1823_vm12, %v5656_v36  ;;  %v11948_v36 = vld [vmem:[%s12362_s30 + $0x13e8] ss:$16 sps:$4 sm:$0xff]  }
 0x382   : > { %6889 = vmatpush1.bf16.msra.mxu0 %v11873_v37  ;;  %6971 = vmatpush1.bf16.msra.mxu1 %v11876_v31 }
 0x383   : > { %6890 = vmatprep.subr.bf16.mxu0 %v11881_v32  ;;  %6972 = vmatprep.subr.bf16.mxu1 %v11884_v33  ;;  %v11953_v32 = vld [vmem:[%s12362_s30 + $0x1404] ss:$16 sps:$4 sm:$0xff]   ;;  %v11956_v33 = vld [vmem:[%s12362_s30 + $0x140c] ss:$16 sps:$4 sm:$0xff]  }
 0x384   : > { %6920 = vmatprep.mubr.bf16.mxu0 %v6378_v38  ;;  %7002 = vmatprep.mubr.bf16.mxu1 %v6378_v38 }
 0x386   : > { %6891 = vmatpush1.bf16.msra.mxu0 %v11879_v39  ;;  %6973 = vmatpush1.bf16.msra.mxu1 %v11882_v40 }
 0x387   : > { %6892 = vmatprep.subr.bf16.mxu0 %v11887_v41  ;;  %6974 = vmatprep.subr.bf16.mxu1 %v11890_v54  ;;  %v11951_v41 = vld [vmem:[%s12362_s30 + $0x1400] ss:$16 sps:$4 sm:$0xff]   ;;  %v11954_v54 = vld [vmem:[%s12362_s30 + $0x1408] ss:$16 sps:$4 sm:$0xff]  }
 0x38a   : > { %6893 = vmatpush1.bf16.msra.mxu0 %v11885_v43  ;;  %6975 = vmatpush1.bf16.msra.mxu1 %v11888_v44  ;;  %v11959_v43 = vld [vmem:[%s12362_s30 + $0x1424] ss:$16 sps:$4 sm:$0xff]   ;;  %v11962_v44 = vld [vmem:[%s12362_s30 + $0x142c] ss:$16 sps:$4 sm:$0xff]  }
 0x38b   : > { %6894 = vmatprep.subr.bf16.mxu0 %v11893_v7  ;;  %6976 = vmatprep.subr.bf16.mxu1 %v11896_v45  ;;  %v11957_v45 = vld [vmem:[%s12362_s30 + $0x1420] ss:$16 sps:$4 sm:$0xff]  }
 0x38e   : > { %6895 = vmatpush1.bf16.msra.mxu0 %v11891_v47  ;;  %6977 = vmatpush1.bf16.msra.mxu1 %v11894_v50  ;;  %v11960_v47 = vld [vmem:[%s12362_s30 + $0x1428] ss:$16 sps:$4 sm:$0xff]   ;;  %v11965_v50 = vld [vmem:[%s12362_s30 + $0x1444] ss:$16 sps:$4 sm:$0xff]  }
 0x38f   : > { %6896 = vmatprep.subr.bf16.mxu0 %v11899_v51  ;;  %6978 = vmatprep.subr.bf16.mxu1 %v11902_v52  ;;  %v11968_v51 = vld [vmem:[%s12362_s30 + $0x144c] ss:$16 sps:$4 sm:$0xff]   ;;  %v11963_v52 = vld [vmem:[%s12362_s30 + $0x1440] ss:$16 sps:$4 sm:$0xff]  }
 0x392   : > { %6897 = vmatpush1.bf16.msra.mxu0 %v11897_v53  ;;  %6979 = vmatpush1.bf16.msra.mxu1 %v11900_v56  ;;  %v11966_v53 = vld [vmem:[%s12362_s30 + $0x1448] ss:$16 sps:$4 sm:$0xff]   ;;  %v11975_v56 = vld [vmem:[%s12362_s30 + $0x146c] ss:$16 sps:$4 sm:$0xff]  }
 0x393   : > { %6898 = vmatprep.subr.bf16.mxu0 %v11905_v57  ;;  %6980 = vmatprep.subr.bf16.mxu1 %v11908_v58  ;;  %v6377_v57 = vpack.c.bf16 %v13562_v55, %v13562_v55  ;;  %v11970_v58 = vld [vmem:[%s12362_s30 + $0x1460] ss:$16 sps:$4 sm:$0xff]   ;;  %v11979_v55 = vld [vmem:[%s12362_s30 + $0x1488] ss:$16 sps:$4 sm:$0xff]  }
 0x396   : > { %6899 = vmatpush1.bf16.msra.mxu0 %v11903_v48  ;;  %6981 = vmatpush1.bf16.msra.mxu1 %v11906_v25  ;;  %v11973_v48 = vld [vmem:[%s12362_s30 + $0x1468] ss:$16 sps:$4 sm:$0xff]   ;;  %v11978_v25 = vld [vmem:[%s12362_s30 + $0x1484] ss:$16 sps:$4 sm:$0xff]  }
 0x397   : > { %6900 = vmatprep.subr.bf16.mxu0 %v11911_v60  ;;  %6982 = vmatprep.subr.bf16.mxu1 %v11914_v63  ;;  %v11981_v60 = vld [vmem:[%s12362_s30 + $0x148c] ss:$16 sps:$4 sm:$0xff]   ;;  %v11976_v63 = vld [vmem:[%s12362_s30 + $0x1480] ss:$16 sps:$4 sm:$0xff]  }
 0x39a   : > { %6901 = vmatpush1.bf16.msra.mxu0 %v11909_v61  ;;  %6983 = vmatpush1.bf16.msra.mxu1 %v11912_v62  ;;  %v11984_v61 = vld [vmem:[%s12362_s30 + $0x14a4] ss:$16 sps:$4 sm:$0xff]   ;;  %v11987_v62 = vld [vmem:[%s12362_s30 + $0x14ac] ss:$16 sps:$4 sm:$0xff]  }
 0x39b   : > { %6902 = vmatprep.subr.bf16.mxu0 %v11917_v8  ;;  %6984 = vmatprep.subr.bf16.mxu1 %v11920_v0  ;;  %v11982_v8 = vld [vmem:[%s12362_s30 + $0x14a0] ss:$16 sps:$4 sm:$0xff]   ;;  %v11985_v0 = vld [vmem:[%s12362_s30 + $0x14a8] ss:$16 sps:$4 sm:$0xff]  }
 0x39e   : > { %6903 = vmatpush1.bf16.msra.mxu0 %v11915_v1  ;;  %6985 = vmatpush1.bf16.msra.mxu1 %v11918_v2  ;;  %v11990_v1 = vld [vmem:[%s12362_s30 + $0x14c4] ss:$16 sps:$4 sm:$0xff]   ;;  %v11993_v2 = vld [vmem:[%s12362_s30 + $0x14cc] ss:$16 sps:$4 sm:$0xff]  }
 0x39f   : > { %6904 = vmatprep.subr.bf16.mxu0 %v11923_v4  ;;  %6986 = vmatprep.subr.bf16.mxu1 %v11926_v14  ;;  %v6358_v4 = vcombine.high %v13554_v30, %v13554_v30  ;;  %v13661_v14 = vld [vmem:[%s12873_s11 + $0x30] sm:$0x3f] }
 0x3a1   : > { %v6372_v30 = vrot.slane %v6358_v4, %v12869_v42  ;;  %v12074_v4 = vld [vmem:[%s12362_s30 + $0x1684] ss:$16 sps:$4 sm:$0xff]  }
 0x3a2   : > { %6905 = vmatpush1.bf16.msra.mxu0 %v11921_v6  ;;  %6987 = vmatpush1.bf16.msra.mxu1 %v11924_v9  ;;  %v11988_v6 = vld [vmem:[%s12362_s30 + $0x14c0] ss:$16 sps:$4 sm:$0xff]   ;;  %v11991_v9 = vld [vmem:[%s12362_s30 + $0x14c8] ss:$16 sps:$4 sm:$0xff]  }
 0x3a3   : > { %6906 = vmatprep.subr.bf16.mxu0 %v11929_v20  ;;  %6988 = vmatprep.subr.bf16.mxu1 %v11932_v10  ;;  %v11996_v20 = vld [vmem:[%s12362_s30 + $0x14e4] ss:$16 sps:$4 sm:$0xff]   ;;  %v11999_v10 = vld [vmem:[%s12362_s30 + $0x14ec] ss:$16 sps:$4 sm:$0xff]  }
 0x3a6   : > { %6907 = vmatpush1.bf16.msra.mxu0 %v11927_v11  ;;  %6989 = vmatpush1.bf16.msra.mxu1 %v11930_v12  ;;  %v13669_v11 = vrot.slane %v13661_v14, %v12869_v42  ;;  %v11994_v12 = vld [vmem:[%s12362_s30 + $0x14e0] ss:$16 sps:$4 sm:$0xff]  }
 0x3a7   : > { %6908 = vmatprep.subr.bf16.mxu0 %v11935_v24  ;;  %6990 = vmatprep.subr.bf16.mxu1 %v11938_v27  ;;  %v11997_v24 = vld [vmem:[%s12362_s30 + $0x14e8] ss:$16 sps:$4 sm:$0xff]   ;;  %v12002_v27 = vld [vmem:[%s12362_s30 + $0x1504] ss:$16 sps:$4 sm:$0xff]  }
 0x3aa   : > { %6909 = vmatpush1.bf16.msra.mxu0 %v11933_v13  ;;  %6991 = vmatpush1.bf16.msra.mxu1 %v11936_v15  ;;  %v12005_v13 = vld [vmem:[%s12362_s30 + $0x150c] ss:$16 sps:$4 sm:$0xff]   ;;  %v7096_v15 = vcombine.high %v13669_v11, %v13669_v11 }
 0x3ab   : > { %6910 = vmatprep.subr.bf16.mxu0 %v11941_v17  ;;  %6992 = vmatprep.subr.bf16.mxu1 %v11944_v18  ;;  %v6379_v17 = vpack.c.bf16 %v6372_v30, %v6372_v30  ;;  %v12000_v18 = vld [vmem:[%s12362_s30 + $0x1500] ss:$16 sps:$4 sm:$0xff]  }
 0x3ac   : > { %v4794_v22 = vpop.f32.mrb[16].mxu0  ;;  %v4876_v23 = vpop.f32.mrb[16].mxu1 }
 0x3ad   : > { %v4796_v26 = vpop.f32.mrb[17].mxu0  ;;  %v4878_v34 = vpop.f32.mrb[17].mxu1 }
 0x3ae   : > { %v4887_v46 = vcombine.low %v4794_v22, %v4796_v26  ;;  %v4888_v28 = vcombine.low %v4876_v23, %v4878_v34  ;;  %v4798_v59 = vpop.f32.mrb[18].mxu0  ;;  %v4880_v29 = vpop.f32.mrb[18].mxu1  ;;  %6911 = vmatpush1.bf16.msra.mxu0 %v11939_v3  ;;  %6993 = vmatpush1.bf16.msra.mxu1 %v11942_v5  ;;  %v12003_v3 = vld [vmem:[%s12362_s30 + $0x1508] ss:$16 sps:$4 sm:$0xff]   ;;  %v12008_v5 = vld [vmem:[%s12362_s30 + $0x1524] ss:$16 sps:$4 sm:$0xff]  }
 0x3af   : > { %v4799_v37 = vpop.f32.mrb[19].mxu0  ;;  %v4881_v31 = vpop.f32.mrb[19].mxu1  ;;  %6912 = vmatprep.subr.bf16.mxu0 %v11947_v19  ;;  %6994 = vmatprep.subr.bf16.mxu1 %v11950_v21  ;;  %v12011_v19 = vld [vmem:[%s12362_s30 + $0x152c] ss:$16 sps:$4 sm:$0xff]   ;;  %v7101_v21 = vpack.c.bf16 %v7096_v15, %v7096_v15  ;;  %v12006_v22 = vld [vmem:[%s12362_s30 + $0x1520] ss:$16 sps:$4 sm:$0xff]  }
 0x3b0   : > { %v4895_v38 = vrot.slane %v4887_v46, %v12869_v42  ;;  %v4902_v39 = vrot.slane %v4888_v28, %v12869_v42  ;;  %v12009_v23 = vld [vmem:[%s12362_s30 + $0x1528] ss:$16 sps:$4 sm:$0xff]   ;;  %v12014_v26 = vld [vmem:[%s12362_s30 + $0x1544] ss:$16 sps:$4 sm:$0xff]   ;;  %v12017_v34 = vld [vmem:[%s12362_s30 + $0x154c] ss:$16 sps:$4 sm:$0xff]  }
 0x3b1   : > { %v12012_v46 = vld [vmem:[%s12362_s30 + $0x1540] ss:$16 sps:$4 sm:$0xff]   ;;  %v12015_v28 = vld [vmem:[%s12362_s30 + $0x1548] ss:$16 sps:$4 sm:$0xff]   ;;  %v12020_v59 = vld [vmem:[%s12362_s30 + $0x1564] ss:$16 sps:$4 sm:$0xff]  }
 0x3b2   : > { %v4903_v40 = vcombine.low %v4895_v38, %v4902_v39  ;;  %6913 = vmatpush1.bf16.msra.mxu0 %v11945_v35  ;;  %6995 = vmatpush1.bf16.msra.mxu1 %v11948_v36  ;;  %v12023_v29 = vld [vmem:[%s12362_s30 + $0x156c] ss:$16 sps:$4 sm:$0xff]   ;;  %v12018_v35 = vld [vmem:[%s12362_s30 + $0x1560] ss:$16 sps:$4 sm:$0xff]   ;;  %v12021_v36 = vld [vmem:[%s12362_s30 + $0x1568] ss:$16 sps:$4 sm:$0xff]  }
 0x3b3   : > { %6914 = vmatprep.subr.bf16.mxu0 %v11953_v32  ;;  %6996 = vmatprep.subr.bf16.mxu1 %v11956_v33  ;;  %v12026_v37 = vld [vmem:[%s12362_s30 + $0x1584] ss:$16 sps:$4 sm:$0xff]   ;;  %v12029_v31 = vld [vmem:[%s12362_s30 + $0x158c] ss:$16 sps:$4 sm:$0xff]   ;;  %v12024_v32 = vld [vmem:[%s12362_s30 + $0x1580] ss:$16 sps:$4 sm:$0xff]  }
 0x3b4   : > { %v13632_v7 = vadd.f32 %v4903_v40, %v13525_v49  ;;  %v11972_v49 = vld [vmem:[%s12362_s30 + $0x1464] ss:$16 sps:$4 sm:$0xff]   ;;  %v12027_v33 = vld [vmem:[%s12362_s30 + $0x1588] ss:$16 sps:$4 sm:$0xff]   ;;  %v12035_v39 = vld [vmem:[%s12362_s30 + $0x15ac] ss:$16 sps:$4 sm:$0xff]  }
 0x3b5   : > { %v12032_v38 = vld [vmem:[%s12362_s30 + $0x15a4] ss:$16 sps:$4 sm:$0xff]   ;;  %v12030_v40 = vld [vmem:[%s12362_s30 + $0x15a0] ss:$16 sps:$4 sm:$0xff]  }
 0x3b6   : > { %6915 = vmatpush1.bf16.msra.mxu0 %v11951_v41  ;;  %6997 = vmatpush1.bf16.msra.mxu1 %v11954_v54  ;;  %v12033_v41 = vld [vmem:[%s12362_s30 + $0x15a8] ss:$16 sps:$4 sm:$0xff]   ;;  %v12038_v54 = vld [vmem:[%s12362_s30 + $0x15c4] ss:$16 sps:$4 sm:$0xff]   ;;  %v12072_v15 = vld [vmem:[%s12362_s30 + $0x1680] ss:$16 sps:$4 sm:$0xff]  }
 0x3b7   : > { %6916 = vmatprep.subr.bf16.mxu0 %v11959_v43  ;;  %6998 = vmatprep.subr.bf16.mxu1 %v11962_v44  ;;  %v12041_v43 = vld [vmem:[%s12362_s30 + $0x15cc] ss:$16 sps:$4 sm:$0xff]   ;;  %v12036_v44 = vld [vmem:[%s12362_s30 + $0x15c0] ss:$16 sps:$4 sm:$0xff]  }
 0x3ba   : > { %6917 = vmatpush1.bf16.msra.mxu0 %v11957_v45  ;;  %6999 = vmatpush1.bf16.msra.mxu1 %v11960_v47  ;;  %v12039_v45 = vld [vmem:[%s12362_s30 + $0x15c8] ss:$16 sps:$4 sm:$0xff]   ;;  %v12044_v47 = vld [vmem:[%s12362_s30 + $0x15e4] ss:$16 sps:$4 sm:$0xff]  }
 0x3bb   : > { %6918 = vmatprep.subr.bf16.mxu0 %v11965_v50  ;;  %7000 = vmatprep.subr.bf16.mxu1 %v11968_v51  ;;  %v12047_v50 = vld [vmem:[%s12362_s30 + $0x15ec] ss:$16 sps:$4 sm:$0xff]   ;;  %v12042_v51 = vld [vmem:[%s12362_s30 + $0x15e0] ss:$16 sps:$4 sm:$0xff]  }
 0x3be   : > { %6919 = vmatpush1.bf16.msra.mxu0 %v11963_v52  ;;  %7001 = vmatpush1.bf16.msra.mxu1 %v11966_v53  ;;  %v12045_v52 = vld [vmem:[%s12362_s30 + $0x15e8] ss:$16 sps:$4 sm:$0xff]   ;;  %v12050_v53 = vld [vmem:[%s12362_s30 + $0x1604] ss:$16 sps:$4 sm:$0xff]  }
 0x3bf   : > { %6929 = vmatprep.subr.bf16.mxu0 %v11972_v49  ;;  %7011 = vmatprep.subr.bf16.mxu1 %v11975_v56  ;;  %v12053_v49 = vld [vmem:[%s12362_s30 + $0x160c] ss:$16 sps:$4 sm:$0xff]   ;;  %v12048_v56 = vld [vmem:[%s12362_s30 + $0x1600] ss:$16 sps:$4 sm:$0xff]  }
 0x3c1   : > { %6921 = vmatmul.mubr.bf16.vlgmr.msra.gmra.mrb[28].mxu0 %v6377_v57  ;;  %7003 = vmatmul.mubr.bf16.vlgmr.msra.gmra.mrb[28].mxu1 %v6377_v57  ;;  %v12051_v57 = vld [vmem:[%s12362_s30 + $0x1608] ss:$16 sps:$4 sm:$0xff]  }
 0x3c2   : > { %6930 = vmatpush1.bf16.msra.mxu0 %v11970_v58  ;;  %7012 = vmatpush1.bf16.msra.mxu1 %v11973_v48  ;;  %v12056_v58 = vld [vmem:[%s12362_s30 + $0x1624] ss:$16 sps:$4 sm:$0xff]   ;;  %v12059_v48 = vld [vmem:[%s12362_s30 + $0x162c] ss:$16 sps:$4 sm:$0xff]  }
 0x3c3   : > { %6931 = vmatprep.subr.bf16.mxu0 %v11978_v25  ;;  %7013 = vmatprep.subr.bf16.mxu1 %v11981_v60  ;;  %v12054_v25 = vld [vmem:[%s12362_s30 + $0x1620] ss:$16 sps:$4 sm:$0xff]   ;;  %v12057_v60 = vld [vmem:[%s12362_s30 + $0x1628] ss:$16 sps:$4 sm:$0xff]  }
 0x3c4   : > { %6961 = vmatprep.mubr.bf16.mxu0 %v12304_v16  ;;  %7043 = vmatprep.mubr.bf16.mxu1 %v12304_v16 }
 0x3c6   : > { %6932 = vmatpush1.bf16.msra.mxu0 %v11976_v63  ;;  %7014 = vmatpush1.bf16.msra.mxu1 %v11979_v55  ;;  %v12062_v63 = vld [vmem:[%s12362_s30 + $0x1644] ss:$16 sps:$4 sm:$0xff]   ;;  %v12065_v55 = vld [vmem:[%s12362_s30 + $0x164c] ss:$16 sps:$4 sm:$0xff]  }
 0x3c7   : > { %6933 = vmatprep.subr.bf16.mxu0 %v11984_v61  ;;  %7015 = vmatprep.subr.bf16.mxu1 %v11987_v62  ;;  %v12060_v61 = vld [vmem:[%s12362_s30 + $0x1640] ss:$16 sps:$4 sm:$0xff]   ;;  %v12063_v62 = vld [vmem:[%s12362_s30 + $0x1648] ss:$16 sps:$4 sm:$0xff]  }
 0x3ca   : > { %6934 = vmatpush1.bf16.msra.mxu0 %v11982_v8  ;;  %7016 = vmatpush1.bf16.msra.mxu1 %v11985_v0  ;;  %v12068_v8 = vld [vmem:[%s12362_s30 + $0x1664] ss:$16 sps:$4 sm:$0xff]   ;;  %v12071_v0 = vld [vmem:[%s12362_s30 + $0x166c] ss:$16 sps:$4 sm:$0xff]  }
 0x3cb   : > { %6935 = vmatprep.subr.bf16.mxu0 %v11990_v1  ;;  %7017 = vmatprep.subr.bf16.mxu1 %v11993_v2  ;;  %v12066_v1 = vld [vmem:[%s12362_s30 + $0x1660] ss:$16 sps:$4 sm:$0xff]   ;;  %v12069_v2 = vld [vmem:[%s12362_s30 + $0x1668] ss:$16 sps:$4 sm:$0xff]  }
 0x3ce   : > { %6936 = vmatpush1.bf16.msra.mxu0 %v11988_v6  ;;  %7018 = vmatpush1.bf16.msra.mxu1 %v11991_v9  ;;  %v12077_v6 = vld [vmem:[%s12362_s30 + $0x168c] ss:$16 sps:$4 sm:$0xff]  }
 0x3cf   : > { %6937 = vmatprep.subr.bf16.mxu0 %v11996_v20  ;;  %7019 = vmatprep.subr.bf16.mxu1 %v11999_v10 }
 0x3d2   : > { %6938 = vmatpush1.bf16.msra.mxu0 %v11994_v12  ;;  %7020 = vmatpush1.bf16.msra.mxu1 %v11997_v24 }
 0x3d3   : > { %7611 = vmatprep.subr.bf16.mxu0 %v12002_v27  ;;  %7693 = vmatprep.subr.bf16.mxu1 %v12005_v13 }
 0x3d5   : > { %10222 = vmatmul.mubr.msk.bf16.vlgmr.msra.gmra.mrb[28].mxu0 %vm1823_vm12, %v6379_v17  ;;  %10223 = vmatmul.mubr.msk.bf16.vlgmr.msra.gmra.mrb[28].mxu1 %vm1823_vm12, %v6379_v17  ;;  %v12075_v17 = vld [vmem:[%s12362_s30 + $0x1688] ss:$16 sps:$4 sm:$0xff]  }
 0x3d6   : > { %7612 = vmatpush1.bf16.msra.mxu0 %v12000_v18  ;;  %7694 = vmatpush1.bf16.msra.mxu1 %v12003_v3 }
 0x3d7   : > { %7613 = vmatprep.subr.bf16.mxu0 %v12008_v5  ;;  %7695 = vmatprep.subr.bf16.mxu1 %v12011_v19  ;;  %v12080_v5 = vld [vmem:[%s12362_s30 + $0x16a4] ss:$16 sps:$4 sm:$0xff]   ;;  %v12083_v19 = vld [vmem:[%s12362_s30 + $0x16ac] ss:$16 sps:$4 sm:$0xff]  }
 0x3d8   : > { %7643 = vmatprep.mubr.bf16.mxu0 %v7101_v21  ;;  %7725 = vmatprep.mubr.bf16.mxu1 %v7101_v21 }
 0x3da   : > { %7614 = vmatpush1.bf16.msra.mxu0 %v12006_v22  ;;  %7696 = vmatpush1.bf16.msra.mxu1 %v12009_v23 }
 0x3db   : > { %7615 = vmatprep.subr.bf16.mxu0 %v12014_v26  ;;  %7697 = vmatprep.subr.bf16.mxu1 %v12017_v34  ;;  %v12078_v26 = vld [vmem:[%s12362_s30 + $0x16a0] ss:$16 sps:$4 sm:$0xff]   ;;  %v12081_v34 = vld [vmem:[%s12362_s30 + $0x16a8] ss:$16 sps:$4 sm:$0xff]  }
 0x3de   : > { %7616 = vmatpush1.bf16.msra.mxu0 %v12012_v46  ;;  %7698 = vmatpush1.bf16.msra.mxu1 %v12015_v28  ;;  %v12086_v46 = vld [vmem:[%s12362_s30 + $0x16c4] ss:$16 sps:$4 sm:$0xff]   ;;  %v12089_v28 = vld [vmem:[%s12362_s30 + $0x16cc] ss:$16 sps:$4 sm:$0xff]  }
 0x3df   : > { %7617 = vmatprep.subr.bf16.mxu0 %v12020_v59  ;;  %7699 = vmatprep.subr.bf16.mxu1 %v12023_v29  ;;  %v12084_v29 = vld [vmem:[%s12362_s30 + $0x16c0] ss:$16 sps:$4 sm:$0xff]  }
 0x3e2   : > { %7618 = vmatpush1.bf16.msra.mxu0 %v12018_v35  ;;  %7700 = vmatpush1.bf16.msra.mxu1 %v12021_v36  ;;  %v12087_v35 = vld [vmem:[%s12362_s30 + $0x16c8] ss:$16 sps:$4 sm:$0xff]   ;;  %v12092_v36 = vld [vmem:[%s12362_s30 + $0x16e4] ss:$16 sps:$4 sm:$0xff]  }
 0x3e3   : > { %7619 = vmatprep.subr.bf16.mxu0 %v12026_v37  ;;  %7701 = vmatprep.subr.bf16.mxu1 %v12029_v31  ;;  %v12095_v37 = vld [vmem:[%s12362_s30 + $0x16ec] ss:$16 sps:$4 sm:$0xff]   ;;  %v12090_v31 = vld [vmem:[%s12362_s30 + $0x16e0] ss:$16 sps:$4 sm:$0xff]  }
 0x3e6   : > { %7620 = vmatpush1.bf16.msra.mxu0 %v12024_v32  ;;  %7702 = vmatpush1.bf16.msra.mxu1 %v12027_v33  ;;  %v12093_v32 = vld [vmem:[%s12362_s30 + $0x16e8] ss:$16 sps:$4 sm:$0xff]   ;;  %v12102_v33 = vld [vmem:[%s12362_s30 + $0x170c] ss:$16 sps:$4 sm:$0xff]  }
 0x3e7   : > { %7621 = vmatprep.subr.bf16.mxu0 %v12032_v38  ;;  %7703 = vmatprep.subr.bf16.mxu1 %v12035_v39  ;;  %v7100_v38 = vpack.c.bf16 %v13669_v11, %v13669_v11  ;;  %v12097_v39 = vld [vmem:[%s12362_s30 + $0x1700] ss:$16 sps:$4 sm:$0xff]   ;;  %v12106_v11 = vld [vmem:[%s12362_s30 + $0x1728] ss:$16 sps:$4 sm:$0xff]  }
 0x3ea   : > { %7622 = vmatpush1.bf16.msra.mxu0 %v12030_v40  ;;  %7704 = vmatpush1.bf16.msra.mxu1 %v12033_v41  ;;  %v12100_v40 = vld [vmem:[%s12362_s30 + $0x1708] ss:$16 sps:$4 sm:$0xff]   ;;  %v12105_v41 = vld [vmem:[%s12362_s30 + $0x1724] ss:$16 sps:$4 sm:$0xff]  }
 0x3eb   : > { %7623 = vmatprep.subr.bf16.mxu0 %v12038_v54  ;;  %7705 = vmatprep.subr.bf16.mxu1 %v12041_v43  ;;  %v12108_v54 = vld [vmem:[%s12362_s30 + $0x172c] ss:$16 sps:$4 sm:$0xff]   ;;  %v12103_v43 = vld [vmem:[%s12362_s30 + $0x1720] ss:$16 sps:$4 sm:$0xff]  }
 0x3ee   : > { %7624 = vmatpush1.bf16.msra.mxu0 %v12036_v44  ;;  %7706 = vmatpush1.bf16.msra.mxu1 %v12039_v45  ;;  %v12111_v44 = vld [vmem:[%s12362_s30 + $0x1744] ss:$16 sps:$4 sm:$0xff]   ;;  %v12114_v45 = vld [vmem:[%s12362_s30 + $0x174c] ss:$16 sps:$4 sm:$0xff]  }
 0x3ef   : > { %7625 = vmatprep.subr.bf16.mxu0 %v12044_v47  ;;  %7707 = vmatprep.subr.bf16.mxu1 %v12047_v50  ;;  %v12109_v47 = vld [vmem:[%s12362_s30 + $0x1740] ss:$16 sps:$4 sm:$0xff]   ;;  %v12112_v50 = vld [vmem:[%s12362_s30 + $0x1748] ss:$16 sps:$4 sm:$0xff]  }
 0x3f2   : > { %7626 = vmatpush1.bf16.msra.mxu0 %v12042_v51  ;;  %7708 = vmatpush1.bf16.msra.mxu1 %v12045_v52  ;;  %v12117_v51 = vld [vmem:[%s12362_s30 + $0x1764] ss:$16 sps:$4 sm:$0xff]   ;;  %v12120_v52 = vld [vmem:[%s12362_s30 + $0x176c] ss:$16 sps:$4 sm:$0xff]  }
 0x3f3   : > { %7627 = vmatprep.subr.bf16.mxu0 %v12050_v53  ;;  %7709 = vmatprep.subr.bf16.mxu1 %v12053_v49  ;;  %v7081_v53 = vcombine.high %v13661_v14, %v13661_v14  ;;  %v13768_v49 = vld [vmem:[%s12873_s11 + $0x36] sm:$0x3f] }
 0x3f5   : > { %v7095_v14 = vrot.slane %v7081_v53, %v12869_v42  ;;  %v12201_v53 = vld [vmem:[%s12362_s30 + $0x1924] ss:$16 sps:$4 sm:$0xff]  }
 0x3f6   : > { %7628 = vmatpush1.bf16.msra.mxu0 %v12048_v56  ;;  %7710 = vmatpush1.bf16.msra.mxu1 %v12051_v57  ;;  %v12115_v56 = vld [vmem:[%s12362_s30 + $0x1760] ss:$16 sps:$4 sm:$0xff]   ;;  %v12118_v57 = vld [vmem:[%s12362_s30 + $0x1768] ss:$16 sps:$4 sm:$0xff]  }
 0x3f7   : > { %7629 = vmatprep.subr.bf16.mxu0 %v12056_v58  ;;  %7711 = vmatprep.subr.bf16.mxu1 %v12059_v48  ;;  %v12123_v58 = vld [vmem:[%s12362_s30 + $0x1784] ss:$16 sps:$4 sm:$0xff]   ;;  %v12126_v48 = vld [vmem:[%s12362_s30 + $0x178c] ss:$16 sps:$4 sm:$0xff]  }
 0x3fa   : > { %7630 = vmatpush1.bf16.msra.mxu0 %v12054_v25  ;;  %7712 = vmatpush1.bf16.msra.mxu1 %v12057_v60  ;;  %v13776_v25 = vrot.slane %v13768_v49, %v12869_v42  ;;  %v12121_v60 = vld [vmem:[%s12362_s30 + $0x1780] ss:$16 sps:$4 sm:$0xff]  }
 0x3fb   : > { %7631 = vmatprep.subr.bf16.mxu0 %v12062_v63  ;;  %7713 = vmatprep.subr.bf16.mxu1 %v12065_v55  ;;  %v12124_v63 = vld [vmem:[%s12362_s30 + $0x1788] ss:$16 sps:$4 sm:$0xff]   ;;  %v12129_v55 = vld [vmem:[%s12362_s30 + $0x17a4] ss:$16 sps:$4 sm:$0xff]  }
 0x3fe   : > { %7632 = vmatpush1.bf16.msra.mxu0 %v12060_v61  ;;  %7714 = vmatpush1.bf16.msra.mxu1 %v12063_v62  ;;  %v12132_v61 = vld [vmem:[%s12362_s30 + $0x17ac] ss:$16 sps:$4 sm:$0xff]   ;;  %v7819_v62 = vcombine.high %v13776_v25, %v13776_v25 }
 0x3ff   : > { %7633 = vmatprep.subr.bf16.mxu0 %v12068_v8  ;;  %7715 = vmatprep.subr.bf16.mxu1 %v12071_v0  ;;  %v7102_v8 = vpack.c.bf16 %v7095_v14, %v7095_v14  ;;  %v12127_v0 = vld [vmem:[%s12362_s30 + $0x17a0] ss:$16 sps:$4 sm:$0xff]  }
 0x400   : > { %v5517_v9 = vpop.f32.mrb[20].mxu0  ;;  %v5599_v20 = vpop.f32.mrb[20].mxu1 }
 0x401   : > { %v5519_v10 = vpop.f32.mrb[21].mxu0  ;;  %v5601_v30 = vpop.f32.mrb[21].mxu1 }
 0x402   : > { %v5610_v12 = vcombine.low %v5517_v9, %v5519_v10  ;;  %v5611_v24 = vcombine.low %v5599_v20, %v5601_v30  ;;  %v5521_v27 = vpop.f32.mrb[22].mxu0  ;;  %v5603_v13 = vpop.f32.mrb[22].mxu1  ;;  %7634 = vmatpush1.bf16.msra.mxu0 %v12066_v1  ;;  %7716 = vmatpush1.bf16.msra.mxu1 %v12069_v2  ;;  %v12130_v1 = vld [vmem:[%s12362_s30 + $0x17a8] ss:$16 sps:$4 sm:$0xff]   ;;  %v12135_v2 = vld [vmem:[%s12362_s30 + $0x17c4] ss:$16 sps:$4 sm:$0xff]  }
 0x403   : > { %v5522_v18 = vpop.f32.mrb[23].mxu0  ;;  %v5604_v3 = vpop.f32.mrb[23].mxu1  ;;  %7635 = vmatprep.subr.bf16.mxu0 %v12074_v4  ;;  %7717 = vmatprep.subr.bf16.mxu1 %v12077_v6  ;;  %v12138_v4 = vld [vmem:[%s12362_s30 + $0x17cc] ss:$16 sps:$4 sm:$0xff]   ;;  %v7824_v6 = vpack.c.bf16 %v7819_v62, %v7819_v62  ;;  %v12133_v9 = vld [vmem:[%s12362_s30 + $0x17c0] ss:$16 sps:$4 sm:$0xff]  }
 0x404   : > { %v5618_v21 = vrot.slane %v5610_v12, %v12869_v42  ;;  %v5625_v22 = vrot.slane %v5611_v24, %v12869_v42  ;;  %v12136_v20 = vld [vmem:[%s12362_s30 + $0x17c8] ss:$16 sps:$4 sm:$0xff]   ;;  %v12141_v10 = vld [vmem:[%s12362_s30 + $0x17e4] ss:$16 sps:$4 sm:$0xff]   ;;  %v12144_v30 = vld [vmem:[%s12362_s30 + $0x17ec] ss:$16 sps:$4 sm:$0xff]  }
 0x405   : > { %v12139_v12 = vld [vmem:[%s12362_s30 + $0x17e0] ss:$16 sps:$4 sm:$0xff]   ;;  %v12142_v24 = vld [vmem:[%s12362_s30 + $0x17e8] ss:$16 sps:$4 sm:$0xff]   ;;  %v12147_v27 = vld [vmem:[%s12362_s30 + $0x1804] ss:$16 sps:$4 sm:$0xff]  }
 0x406   : > { %v5626_v23 = vcombine.low %v5618_v21, %v5625_v22  ;;  %7636 = vmatpush1.bf16.msra.mxu0 %v12072_v15  ;;  %7718 = vmatpush1.bf16.msra.mxu1 %v12075_v17  ;;  %v12150_v13 = vld [vmem:[%s12362_s30 + $0x180c] ss:$16 sps:$4 sm:$0xff]   ;;  %v12145_v15 = vld [vmem:[%s12362_s30 + $0x1800] ss:$16 sps:$4 sm:$0xff]   ;;  %v12148_v17 = vld [vmem:[%s12362_s30 + $0x1808] ss:$16 sps:$4 sm:$0xff]  }
 0x407   : > { %7637 = vmatprep.subr.bf16.mxu0 %v12080_v5  ;;  %7719 = vmatprep.subr.bf16.mxu1 %v12083_v19  ;;  %v12153_v18 = vld [vmem:[%s12362_s30 + $0x1824] ss:$16 sps:$4 sm:$0xff]   ;;  %v12156_v3 = vld [vmem:[%s12362_s30 + $0x182c] ss:$16 sps:$4 sm:$0xff]   ;;  %v12151_v5 = vld [vmem:[%s12362_s30 + $0x1820] ss:$16 sps:$4 sm:$0xff]  }
 0x408   : > { %v13739_v59 = vadd.f32 %v5626_v23, %v13632_v7  ;;  %v12099_v7 = vld [vmem:[%s12362_s30 + $0x1704] ss:$16 sps:$4 sm:$0xff]   ;;  %v12154_v19 = vld [vmem:[%s12362_s30 + $0x1828] ss:$16 sps:$4 sm:$0xff]   ;;  %v12162_v22 = vld [vmem:[%s12362_s30 + $0x184c] ss:$16 sps:$4 sm:$0xff]  }
 0x409   : > { %v12159_v21 = vld [vmem:[%s12362_s30 + $0x1844] ss:$16 sps:$4 sm:$0xff]   ;;  %v12157_v23 = vld [vmem:[%s12362_s30 + $0x1840] ss:$16 sps:$4 sm:$0xff]  }
 0x40a   : > { %7638 = vmatpush1.bf16.msra.mxu0 %v12078_v26  ;;  %7720 = vmatpush1.bf16.msra.mxu1 %v12081_v34  ;;  %v12160_v26 = vld [vmem:[%s12362_s30 + $0x1848] ss:$16 sps:$4 sm:$0xff]   ;;  %v12165_v34 = vld [vmem:[%s12362_s30 + $0x1864] ss:$16 sps:$4 sm:$0xff]   ;;  %v12199_v62 = vld [vmem:[%s12362_s30 + $0x1920] ss:$16 sps:$4 sm:$0xff]  }
 0x40b   : > { %7639 = vmatprep.subr.bf16.mxu0 %v12086_v46  ;;  %7721 = vmatprep.subr.bf16.mxu1 %v12089_v28  ;;  %v12168_v46 = vld [vmem:[%s12362_s30 + $0x186c] ss:$16 sps:$4 sm:$0xff]   ;;  %v12163_v28 = vld [vmem:[%s12362_s30 + $0x1860] ss:$16 sps:$4 sm:$0xff]  }
 0x40e   : > { %7640 = vmatpush1.bf16.msra.mxu0 %v12084_v29  ;;  %7722 = vmatpush1.bf16.msra.mxu1 %v12087_v35  ;;  %v12166_v29 = vld [vmem:[%s12362_s30 + $0x1868] ss:$16 sps:$4 sm:$0xff]   ;;  %v12171_v35 = vld [vmem:[%s12362_s30 + $0x1884] ss:$16 sps:$4 sm:$0xff]  }
 0x40f   : > { %7641 = vmatprep.subr.bf16.mxu0 %v12092_v36  ;;  %7723 = vmatprep.subr.bf16.mxu1 %v12095_v37  ;;  %v12174_v36 = vld [vmem:[%s12362_s30 + $0x188c] ss:$16 sps:$4 sm:$0xff]   ;;  %v12169_v37 = vld [vmem:[%s12362_s30 + $0x1880] ss:$16 sps:$4 sm:$0xff]  }
 0x412   : > { %7642 = vmatpush1.bf16.msra.mxu0 %v12090_v31  ;;  %7724 = vmatpush1.bf16.msra.mxu1 %v12093_v32  ;;  %v12172_v31 = vld [vmem:[%s12362_s30 + $0x1888] ss:$16 sps:$4 sm:$0xff]   ;;  %v12177_v32 = vld [vmem:[%s12362_s30 + $0x18a4] ss:$16 sps:$4 sm:$0xff]  }
 0x413   : > { %7652 = vmatprep.subr.bf16.mxu0 %v12099_v7  ;;  %7734 = vmatprep.subr.bf16.mxu1 %v12102_v33  ;;  %v12180_v7 = vld [vmem:[%s12362_s30 + $0x18ac] ss:$16 sps:$4 sm:$0xff]   ;;  %v12175_v33 = vld [vmem:[%s12362_s30 + $0x18a0] ss:$16 sps:$4 sm:$0xff]  }
 0x415   : > { %7644 = vmatmul.mubr.bf16.vlgmr.msra.gmra.mrb[32].mxu0 %v7100_v38  ;;  %7726 = vmatmul.mubr.bf16.vlgmr.msra.gmra.mrb[32].mxu1 %v7100_v38  ;;  %v12178_v38 = vld [vmem:[%s12362_s30 + $0x18a8] ss:$16 sps:$4 sm:$0xff]  }
 0x416   : > { %7653 = vmatpush1.bf16.msra.mxu0 %v12097_v39  ;;  %7735 = vmatpush1.bf16.msra.mxu1 %v12100_v40  ;;  %v12183_v39 = vld [vmem:[%s12362_s30 + $0x18c4] ss:$16 sps:$4 sm:$0xff]   ;;  %v12186_v40 = vld [vmem:[%s12362_s30 + $0x18cc] ss:$16 sps:$4 sm:$0xff]  }
 0x417   : > { %7654 = vmatprep.subr.bf16.mxu0 %v12105_v41  ;;  %7736 = vmatprep.subr.bf16.mxu1 %v12108_v54  ;;  %v12181_v41 = vld [vmem:[%s12362_s30 + $0x18c0] ss:$16 sps:$4 sm:$0xff]   ;;  %v12184_v54 = vld [vmem:[%s12362_s30 + $0x18c8] ss:$16 sps:$4 sm:$0xff]  }
 0x418   : > { %7684 = vmatprep.mubr.bf16.mxu0 %v12304_v16  ;;  %7766 = vmatprep.mubr.bf16.mxu1 %v12304_v16 }
 0x41a   : > { %7655 = vmatpush1.bf16.msra.mxu0 %v12103_v43  ;;  %7737 = vmatpush1.bf16.msra.mxu1 %v12106_v11  ;;  %v12189_v43 = vld [vmem:[%s12362_s30 + $0x18e4] ss:$16 sps:$4 sm:$0xff]   ;;  %v12192_v11 = vld [vmem:[%s12362_s30 + $0x18ec] ss:$16 sps:$4 sm:$0xff]  }
 0x41b   : > { %7656 = vmatprep.subr.bf16.mxu0 %v12111_v44  ;;  %7738 = vmatprep.subr.bf16.mxu1 %v12114_v45  ;;  %v12187_v44 = vld [vmem:[%s12362_s30 + $0x18e0] ss:$16 sps:$4 sm:$0xff]   ;;  %v12190_v45 = vld [vmem:[%s12362_s30 + $0x18e8] ss:$16 sps:$4 sm:$0xff]  }
 0x41e   : > { %7657 = vmatpush1.bf16.msra.mxu0 %v12109_v47  ;;  %7739 = vmatpush1.bf16.msra.mxu1 %v12112_v50  ;;  %v12195_v47 = vld [vmem:[%s12362_s30 + $0x1904] ss:$16 sps:$4 sm:$0xff]   ;;  %v12198_v50 = vld [vmem:[%s12362_s30 + $0x190c] ss:$16 sps:$4 sm:$0xff]  }
 0x41f   : > { %7658 = vmatprep.subr.bf16.mxu0 %v12117_v51  ;;  %7740 = vmatprep.subr.bf16.mxu1 %v12120_v52  ;;  %v12193_v51 = vld [vmem:[%s12362_s30 + $0x1900] ss:$16 sps:$4 sm:$0xff]   ;;  %v12196_v52 = vld [vmem:[%s12362_s30 + $0x1908] ss:$16 sps:$4 sm:$0xff]  }
 0x422   : > { %7659 = vmatpush1.bf16.msra.mxu0 %v12115_v56  ;;  %7741 = vmatpush1.bf16.msra.mxu1 %v12118_v57  ;;  %v12204_v56 = vld [vmem:[%s12362_s30 + $0x192c] ss:$16 sps:$4 sm:$0xff]  }
 0x423   : > { %7660 = vmatprep.subr.bf16.mxu0 %v12123_v58  ;;  %7742 = vmatprep.subr.bf16.mxu1 %v12126_v48 }
 0x426   : > { %7661 = vmatpush1.bf16.msra.mxu0 %v12121_v60  ;;  %7743 = vmatpush1.bf16.msra.mxu1 %v12124_v63 }
 0x427   : > { %8334 = vmatprep.subr.bf16.mxu0 %v12129_v55  ;;  %8416 = vmatprep.subr.bf16.mxu1 %v12132_v61 }
 0x429   : > { %10394 = vmatmul.mubr.msk.bf16.vlgmr.msra.gmra.mrb[32].mxu0 %vm1823_vm12, %v7102_v8  ;;  %10395 = vmatmul.mubr.msk.bf16.vlgmr.msra.gmra.mrb[32].mxu1 %vm1823_vm12, %v7102_v8  ;;  %v12202_v8 = vld [vmem:[%s12362_s30 + $0x1928] ss:$16 sps:$4 sm:$0xff]  }
 0x42a   : > { %8335 = vmatpush1.bf16.msra.mxu0 %v12127_v0  ;;  %8417 = vmatpush1.bf16.msra.mxu1 %v12130_v1 }
 0x42b   : > { %8336 = vmatprep.subr.bf16.mxu0 %v12135_v2  ;;  %8418 = vmatprep.subr.bf16.mxu1 %v12138_v4  ;;  %v12207_v2 = vld [vmem:[%s12362_s30 + $0x1944] ss:$16 sps:$4 sm:$0xff]   ;;  %v12210_v4 = vld [vmem:[%s12362_s30 + $0x194c] ss:$16 sps:$4 sm:$0xff]  }
 0x42c   : > { %8366 = vmatprep.mubr.bf16.mxu0 %v7824_v6  ;;  %8448 = vmatprep.mubr.bf16.mxu1 %v7824_v6 }
 0x42e   : > { %8337 = vmatpush1.bf16.msra.mxu0 %v12133_v9  ;;  %8419 = vmatpush1.bf16.msra.mxu1 %v12136_v20 }
 0x42f   : > { %8338 = vmatprep.subr.bf16.mxu0 %v12141_v10  ;;  %8420 = vmatprep.subr.bf16.mxu1 %v12144_v30  ;;  %v12205_v10 = vld [vmem:[%s12362_s30 + $0x1940] ss:$16 sps:$4 sm:$0xff]   ;;  %v12208_v30 = vld [vmem:[%s12362_s30 + $0x1948] ss:$16 sps:$4 sm:$0xff]  }
 0x432   : > { %8339 = vmatpush1.bf16.msra.mxu0 %v12139_v12  ;;  %8421 = vmatpush1.bf16.msra.mxu1 %v12142_v24  ;;  %v12213_v12 = vld [vmem:[%s12362_s30 + $0x1964] ss:$16 sps:$4 sm:$0xff]   ;;  %v12216_v24 = vld [vmem:[%s12362_s30 + $0x196c] ss:$16 sps:$4 sm:$0xff]  }
 0x433   : > { %8340 = vmatprep.subr.bf16.mxu0 %v12147_v27  ;;  %8422 = vmatprep.subr.bf16.mxu1 %v12150_v13  ;;  %v12211_v13 = vld [vmem:[%s12362_s30 + $0x1960] ss:$16 sps:$4 sm:$0xff]  }
 0x436   : > { %8341 = vmatpush1.bf16.msra.mxu0 %v12145_v15  ;;  %8423 = vmatpush1.bf16.msra.mxu1 %v12148_v17  ;;  %v12214_v15 = vld [vmem:[%s12362_s30 + $0x1968] ss:$16 sps:$4 sm:$0xff]   ;;  %v12219_v17 = vld [vmem:[%s12362_s30 + $0x1984] ss:$16 sps:$4 sm:$0xff]  }
 0x437   : > { %8342 = vmatprep.subr.bf16.mxu0 %v12153_v18  ;;  %8424 = vmatprep.subr.bf16.mxu1 %v12156_v3  ;;  %v12222_v18 = vld [vmem:[%s12362_s30 + $0x198c] ss:$16 sps:$4 sm:$0xff]   ;;  %v12217_v3 = vld [vmem:[%s12362_s30 + $0x1980] ss:$16 sps:$4 sm:$0xff]  }
 0x43a   : > { %8343 = vmatpush1.bf16.msra.mxu0 %v12151_v5  ;;  %8425 = vmatpush1.bf16.msra.mxu1 %v12154_v19  ;;  %v12220_v5 = vld [vmem:[%s12362_s30 + $0x1988] ss:$16 sps:$4 sm:$0xff]   ;;  %v12229_v19 = vld [vmem:[%s12362_s30 + $0x19ac] ss:$16 sps:$4 sm:$0xff]  }
 0x43b   : > { %8344 = vmatprep.subr.bf16.mxu0 %v12159_v21  ;;  %8426 = vmatprep.subr.bf16.mxu1 %v12162_v22  ;;  %v7823_v21 = vpack.c.bf16 %v13776_v25, %v13776_v25  ;;  %v12224_v22 = vld [vmem:[%s12362_s30 + $0x19a0] ss:$16 sps:$4 sm:$0xff]   ;;  %v12233_v25 = vld [vmem:[%s12362_s30 + $0x19c8] ss:$16 sps:$4 sm:$0xff]  }
 0x43e   : > { %8345 = vmatpush1.bf16.msra.mxu0 %v12157_v23  ;;  %8427 = vmatpush1.bf16.msra.mxu1 %v12160_v26  ;;  %v12227_v23 = vld [vmem:[%s12362_s30 + $0x19a8] ss:$16 sps:$4 sm:$0xff]   ;;  %v12232_v26 = vld [vmem:[%s12362_s30 + $0x19c4] ss:$16 sps:$4 sm:$0xff]  }
 0x43f   : > { %8346 = vmatprep.subr.bf16.mxu0 %v12165_v34  ;;  %8428 = vmatprep.subr.bf16.mxu1 %v12168_v46  ;;  %v12235_v34 = vld [vmem:[%s12362_s30 + $0x19cc] ss:$16 sps:$4 sm:$0xff]   ;;  %v12230_v46 = vld [vmem:[%s12362_s30 + $0x19c0] ss:$16 sps:$4 sm:$0xff]  }
 0x442   : > { %8347 = vmatpush1.bf16.msra.mxu0 %v12163_v28  ;;  %8429 = vmatpush1.bf16.msra.mxu1 %v12166_v29  ;;  %v12238_v28 = vld [vmem:[%s12362_s30 + $0x19e4] ss:$16 sps:$4 sm:$0xff]   ;;  %v12241_v29 = vld [vmem:[%s12362_s30 + $0x19ec] ss:$16 sps:$4 sm:$0xff]  }
 0x443   : > { %8348 = vmatprep.subr.bf16.mxu0 %v12171_v35  ;;  %8430 = vmatprep.subr.bf16.mxu1 %v12174_v36  ;;  %v12236_v35 = vld [vmem:[%s12362_s30 + $0x19e0] ss:$16 sps:$4 sm:$0xff]   ;;  %v12239_v36 = vld [vmem:[%s12362_s30 + $0x19e8] ss:$16 sps:$4 sm:$0xff]  }
 0x446   : > { %8349 = vmatpush1.bf16.msra.mxu0 %v12169_v37  ;;  %8431 = vmatpush1.bf16.msra.mxu1 %v12172_v31  ;;  %v12244_v37 = vld [vmem:[%s12362_s30 + $0x1a04] ss:$16 sps:$4 sm:$0xff]   ;;  %v12247_v31 = vld [vmem:[%s12362_s30 + $0x1a0c] ss:$16 sps:$4 sm:$0xff]  }
 0x447   : > { %8350 = vmatprep.subr.bf16.mxu0 %v12177_v32  ;;  %8432 = vmatprep.subr.bf16.mxu1 %v12180_v7  ;;  %v7804_v32 = vcombine.high %v13768_v49, %v13768_v49  ;;  %v12242_v7 = vld [vmem:[%s12362_s30 + $0x1a00] ss:$16 sps:$4 sm:$0xff]  }
 0x44a   : > { %8351 = vmatpush1.bf16.msra.mxu0 %v12175_v33  ;;  %8433 = vmatpush1.bf16.msra.mxu1 %v12178_v38  ;;  %v12245_v33 = vld [vmem:[%s12362_s30 + $0x1a08] ss:$16 sps:$4 sm:$0xff]   ;;  %v12253_v38 = vld [vmem:[%s12362_s30 + $0x1a2c] ss:$16 sps:$4 sm:$0xff]  }
 0x44b   : > { %8352 = vmatprep.subr.bf16.mxu0 %v12183_v39  ;;  %8434 = vmatprep.subr.bf16.mxu1 %v12186_v40  ;;  %v7818_v39 = vrot.slane %v7804_v32, %v12869_v42  ;;  %v12248_v40 = vld [vmem:[%s12362_s30 + $0x1a20] ss:$16 sps:$4 sm:$0xff]  }
 0x44e   : > { %8353 = vmatpush1.bf16.msra.mxu0 %v12181_v41  ;;  %8435 = vmatpush1.bf16.msra.mxu1 %v12184_v54  ;;  %v12251_v41 = vld [vmem:[%s12362_s30 + $0x1a28] ss:$16 sps:$4 sm:$0xff]   ;;  %v7825_v54 = vpack.c.bf16 %v7818_v39, %v7818_v39  ;;  %v8537_v39 = vld [vmem:[%s14134_s5 + $0x10] sm:$0xff] (!%p10568_p5) }
 0x44f   : > { %8354 = vmatprep.subr.bf16.mxu0 %v12189_v43  ;;  %8436 = vmatprep.subr.bf16.mxu1 %v12192_v11 }
 0x452   : > { %8355 = vmatpush1.bf16.msra.mxu0 %v12187_v44  ;;  %8437 = vmatpush1.bf16.msra.mxu1 %v12190_v45 }
 0x453   : > { %8356 = vmatprep.subr.bf16.mxu0 %v12195_v47  ;;  %8438 = vmatprep.subr.bf16.mxu1 %v12198_v50 }
 0x454   : > { %v6240_v57 = vpop.f32.mrb[24].mxu0  ;;  %v6322_v58 = vpop.f32.mrb[24].mxu1 }
 0x455   : > { %v6242_v48 = vpop.f32.mrb[25].mxu0  ;;  %v6324_v14 = vpop.f32.mrb[25].mxu1 }
 0x456   : > { %v6333_v60 = vcombine.low %v6240_v57, %v6242_v48  ;;  %v6334_v63 = vcombine.low %v6322_v58, %v6324_v14  ;;  %v6244_v55 = vpop.f32.mrb[26].mxu0  ;;  %v6326_v61 = vpop.f32.mrb[26].mxu1  ;;  %8357 = vmatpush1.bf16.msra.mxu0 %v12193_v51  ;;  %8439 = vmatpush1.bf16.msra.mxu1 %v12196_v52 }
 0x457   : > { %v6245_v0 = vpop.f32.mrb[27].mxu0  ;;  %v6327_v1 = vpop.f32.mrb[27].mxu1  ;;  %8358 = vmatprep.subr.bf16.mxu0 %v12201_v53  ;;  %8440 = vmatprep.subr.bf16.mxu1 %v12204_v56 }
 0x458   : > { %v6341_v6 = vrot.slane %v6333_v60, %v12869_v42  ;;  %v6348_v9 = vrot.slane %v6334_v63, %v12869_v42 }
 0x45a   : > { %v6349_v20 = vcombine.low %v6341_v6, %v6348_v9  ;;  %8359 = vmatpush1.bf16.msra.mxu0 %v12199_v62  ;;  %8441 = vmatpush1.bf16.msra.mxu1 %v12202_v8 }
 0x45b   : > { %8360 = vmatprep.subr.bf16.mxu0 %v12207_v2  ;;  %8442 = vmatprep.subr.bf16.mxu1 %v12210_v4 }
 0x45c   : > { %v13846_v27 = vadd.f32 %v6349_v20, %v13739_v59  ;;  %v12226_v59 = vld [vmem:[%s12362_s30 + $0x19a4] ss:$16 sps:$4 sm:$0xff]  }
 0x45e   : > { %8361 = vmatpush1.bf16.msra.mxu0 %v12205_v10  ;;  %8443 = vmatpush1.bf16.msra.mxu1 %v12208_v30 }
 0x45f   : > { %8362 = vmatprep.subr.bf16.mxu0 %v12213_v12  ;;  %8444 = vmatprep.subr.bf16.mxu1 %v12216_v24 }
 0x462   : > { %8363 = vmatpush1.bf16.msra.mxu0 %v12211_v13  ;;  %8445 = vmatpush1.bf16.msra.mxu1 %v12214_v15 }
 0x463   : > { %8364 = vmatprep.subr.bf16.mxu0 %v12219_v17  ;;  %8446 = vmatprep.subr.bf16.mxu1 %v12222_v18 }
 0x466   : > { %8365 = vmatpush1.bf16.msra.mxu0 %v12217_v3  ;;  %8447 = vmatpush1.bf16.msra.mxu1 %v12220_v5 }
 0x467   : > { %8375 = vmatprep.subr.bf16.mxu0 %v12226_v59  ;;  %8457 = vmatprep.subr.bf16.mxu1 %v12229_v19 }
 0x469   : > { %8367 = vmatmul.mubr.bf16.vlgmr.msra.gmra.mrb[36].mxu0 %v7823_v21  ;;  %8449 = vmatmul.mubr.bf16.vlgmr.msra.gmra.mrb[36].mxu1 %v7823_v21 }
 0x46a   : > { %8376 = vmatpush1.bf16.msra.mxu0 %v12224_v22  ;;  %8458 = vmatpush1.bf16.msra.mxu1 %v12227_v23  ;;  %v8567_v22 = vld [vmem:[%s14134_s5 + $0x100] sm:$0xff] (!%p10568_p5)  ;;  %v8568_v23 = vld [vmem:[%s14134_s5 + $0x108] sm:$0xff] (!%p10568_p5) }
 0x46b   : > { %8377 = vmatprep.subr.bf16.mxu0 %v12232_v26  ;;  %8459 = vmatprep.subr.bf16.mxu1 %v12235_v34  ;;  %v8569_v26 = vld [vmem:[%s14134_s5 + $0x110] sm:$0xff] (!%p10568_p5)  ;;  %v12305_v34 = vmov (!%p10568_p5), 0.0|0.0  }
 0x46c   : > { %8407 = vmatprep.mubr.bf16.mxu0 %v12304_v16  ;;  %8489 = vmatprep.mubr.bf16.mxu1 %v12304_v16  ;;  %v12250_v16 = vld [vmem:[%s12362_s30 + $0x1a24] ss:$16 sps:$4 sm:$0xff]  }
 0x46e   : > { %8378 = vmatpush1.bf16.msra.mxu0 %v12230_v46  ;;  %8460 = vmatpush1.bf16.msra.mxu1 %v12233_v25  ;;  %v10831_v46 = vpack.c.bf16 (!%p10568_p5), %v8568_v23, %v8567_v22  ;;  %v8570_v25 = vld [vmem:[%s14134_s5 + $0x118] sm:$0xff] (!%p10568_p5)  ;;  %v8581_v22 = vld [vmem:[%s14134_s5 + $0x170] sm:$0xff] (!%p10568_p5) }
 0x46f   : > { %8379 = vmatprep.subr.bf16.mxu0 %v12238_v28  ;;  %8461 = vmatprep.subr.bf16.mxu1 %v12241_v29  ;;  %v10834_v28 = vpack.c.bf16 (!%p10568_p5), %v8570_v25, %v8569_v26  ;;  %v8571_v29 = vld [vmem:[%s14134_s5 + $0x120] sm:$0xff] (!%p10568_p5)  ;;  %v8582_v23 = vld [vmem:[%s14134_s5 + $0x178] sm:$0xff] (!%p10568_p5) }
 0x470   : > { %v8547_v25 = vld [vmem:[%s14134_s5 + $0x60] sm:$0xff] (!%p10568_p5) }
 0x472   : > { %8380 = vmatpush1.bf16.msra.mxu0 %v12236_v35  ;;  %8462 = vmatpush1.bf16.msra.mxu1 %v12239_v36  ;;  %v8572_v35 = vld [vmem:[%s14134_s5 + $0x128] sm:$0xff] (!%p10568_p5)  ;;  %v8551_v36 = vld [vmem:[%s14134_s5 + $0x80] sm:$0xff] (!%p10568_p5) }
 0x473   : > { %8381 = vmatprep.subr.bf16.mxu0 %v12244_v37  ;;  %8463 = vmatprep.subr.bf16.mxu1 %v12247_v31  ;;  %v8552_v37 = vld [vmem:[%s14134_s5 + $0x88] sm:$0xff] (!%p10568_p5)  ;;  %v8535_v31 = vld [vmem:[%s14134_s5] sm:$0xff] (!%p10568_p5) }
 0x474   : > { %v10798_v32 = vpack.c.bf16 (!%p10568_p5), %v8552_v37, %v8551_v36  ;;  %v8565_v36 = vld [vmem:[%s14134_s5 + $0xf0] sm:$0xff] (!%p10568_p5)  ;;  %v8566_v37 = vld [vmem:[%s14134_s5 + $0xf8] sm:$0xff] (!%p10568_p5) }
 0x476   : > { %8382 = vmatpush1.bf16.msra.mxu0 %v12242_v7  ;;  %8464 = vmatpush1.bf16.msra.mxu1 %v12245_v33  ;;  %v8536_v7 = vld [vmem:[%s14134_s5 + $0x8] sm:$0xff] (!%p10568_p5) }
 0x477   : > { %8383 = vmatprep.subr.bf16.mxu0 %v12250_v16  ;;  %8465 = vmatprep.subr.bf16.mxu1 %v12253_v38  ;;  %v10800_v33 = vpack.c.bf16 (!%p10568_p5), %v8536_v7, %v8535_v31  ;;  %v8553_v16 = vld [vmem:[%s14134_s5 + $0x90] sm:$0xff] (!%p10568_p5)  ;;  %v8554_v38 = vld [vmem:[%s14134_s5 + $0x98] sm:$0xff] (!%p10568_p5)  ;;  %v10852_v31 = vpack.c.bf16 (!%p10568_p5), %v8582_v23, %v8581_v22  ;;  %v8583_v7 = vld [vmem:[%s14134_s5 + $0x180] sm:$0xff] (!%p10568_p5) }
 0x47a   : > { %8384 = vmatpush1.bf16.msra.mxu0 %v12248_v40  ;;  %8466 = vmatpush1.bf16.msra.mxu1 %v12251_v41  ;;  %v10837_v40 = vpack.c.bf16 (!%p10568_p5), %v8572_v35, %v8571_v29  ;;  %v8573_v41 = vld [vmem:[%s14134_s5 + $0x130] sm:$0xff] (!%p10568_p5) }
 0x47b   : > { %10830 = vmatprep.subr.bf16.mxu1 (!%p10568_p5), %v12305_v34  ;;  %10799 = vmatprep.subr.bf16.mxu0 (!%p10568_p5), %v10798_v32 }
 0x47d   : > { %10566 = vmatmul.mubr.msk.bf16.vlgmr.msra.gmra.mrb[36].mxu0 %vm1823_vm12, %v7825_v54  ;;  %10567 = vmatmul.mubr.msk.bf16.vlgmr.msra.gmra.mrb[36].mxu1 %vm1823_vm12, %v7825_v54  ;;  %v10802_v54 = vpack.c.bf16 (!%p10568_p5), %v8554_v38, %v8553_v16  ;;  %v10826_v16 = vpack.c.bf16 (!%p10568_p5), %v8566_v37, %v8565_v36  ;;  %v8549_v38 = vld [vmem:[%s14134_s5 + $0x70] sm:$0xff] (!%p10568_p5) }
 0x47e   : > { %10832 = vmatpush1.bf16.msra.mxu1 (!%p10568_p5), %v10831_v46  ;;  %10801 = vmatpush3.bf16.msra.mxu0 (!%p10568_p5), %v10800_v33 }
 0x47f   : > { %10833 = vmatprep.subr.bf16.mxu1 (!%p10568_p5), %v12305_v34  ;;  %10803 = vmatprep.subr.bf16.mxu0 (!%p10568_p5), %v10802_v54  ;;  %v8586_v54 = vld [vmem:[%s14134_s5 + $0x198] sm:$0xff] (!%p10568_p5) }
 0x482   : > { %10835 = vmatpush1.bf16.msra.mxu1 (!%p10568_p5), %v10834_v28  ;;  %v8548_v28 = vld [vmem:[%s14134_s5 + $0x68] sm:$0xff] (!%p10568_p5) }
 0x483   : > { %10836 = vmatprep.subr.bf16.mxu1 (!%p10568_p5), %v12305_v34  ;;  %v10824_v33 = vpack.c.bf16 (!%p10568_p5), %v8548_v28, %v8547_v25 }
 0x486   : > { %10838 = vmatpush1.bf16.msra.mxu1 (!%p10568_p5), %v10837_v40 }
 0x487   : > { %10839 = vmatprep.subr.bf16.mxu1 (!%p10568_p5), %v12305_v34 }
 0x4a8   : > { %v6963_v49 = vpop.f32.mrb[28].mxu0  ;;  %v7045_v43 = vpop.f32.mrb[28].mxu1 }
 0x4a9   : > { %v6965_v11 = vpop.f32.mrb[29].mxu0  ;;  %v7047_v44 = vpop.f32.mrb[29].mxu1 }
 0x4aa   : > { %v7056_v45 = vcombine.low %v6963_v49, %v6965_v11  ;;  %v7057_v47 = vcombine.low %v7045_v43, %v7047_v44  ;;  %v6967_v50 = vpop.f32.mrb[30].mxu0  ;;  %v7049_v51 = vpop.f32.mrb[30].mxu1  ;;  %v8538_v49 = vld [vmem:[%s14134_s5 + $0x18] sm:$0xff] (!%p10568_p5)  ;;  %v8555_v44 = vld [vmem:[%s14134_s5 + $0xa0] sm:$0xff] (!%p10568_p5) }
 0x4ab   : > { %v6968_v52 = vpop.f32.mrb[31].mxu0  ;;  %v7050_v53 = vpop.f32.mrb[31].mxu1  ;;  %v8574_v43 = vld [vmem:[%s14134_s5 + $0x138] sm:$0xff] (!%p10568_p5)  ;;  %v10804_v11 = vpack.c.bf16 (!%p10568_p5), %v8538_v49, %v8537_v39  ;;  %v8539_v50 = vld [vmem:[%s14134_s5 + $0x20] sm:$0xff] (!%p10568_p5)  ;;  %v8540_v51 = vld [vmem:[%s14134_s5 + $0x28] sm:$0xff] (!%p10568_p5) }
 0x4ac   : > { %v7064_v56 = vrot.slane %v7056_v45, %v12869_v42  ;;  %v7071_v57 = vrot.slane %v7057_v47, %v12869_v42  ;;  %v8556_v45 = vld [vmem:[%s14134_s5 + $0xa8] sm:$0xff] (!%p10568_p5)  ;;  %v8557_v52 = vld [vmem:[%s14134_s5 + $0xb0] sm:$0xff] (!%p10568_p5)  ;;  %v8558_v53 = vld [vmem:[%s14134_s5 + $0xb8] sm:$0xff] (!%p10568_p5) }
 0x4ad   : > { %v10806_v47 = vpack.c.bf16 (!%p10568_p5), %v8556_v45, %v8555_v44  ;;  %10805 = vmatpush3.bf16.msra.mxu0 (!%p10568_p5), %v10804_v11  ;;  %v8550_v39 = vld [vmem:[%s14134_s5 + $0x78] sm:$0xff] (!%p10568_p5)  ;;  %v8587_v11 = vld [vmem:[%s14134_s5 + $0x1a0] sm:$0xff] (!%p10568_p5)  ;;  %v8588_v44 = vld [vmem:[%s14134_s5 + $0x1a8] sm:$0xff] (!%p10568_p5) }
 0x4ae   : > { %v7072_v58 = vcombine.low %v7064_v56, %v7071_v57  ;;  %v10840_v56 = vpack.c.bf16 (!%p10568_p5), %v8574_v43, %v8573_v41  ;;  %v8575_v57 = vld [vmem:[%s14134_s5 + $0x140] sm:$0xff] (!%p10568_p5)  ;;  %v8585_v41 = vld [vmem:[%s14134_s5 + $0x190] sm:$0xff] (!%p10568_p5)  ;;  %v10828_v49 = vpack.c.bf16 (!%p10568_p5), %v8550_v39, %v8549_v38  ;;  %v10861_v45 = vpack.c.bf16 (!%p10568_p5), %v8588_v44, %v8587_v11 }
 0x4af   : > { %10807 = vmatprep.subr.bf16.mxu0 (!%p10568_p5), %v10806_v47  ;;  %v10858_v43 = vpack.c.bf16 (!%p10568_p5), %v8586_v54, %v8585_v41  ;;  %v8589_v47 = vld [vmem:[%s14134_s5 + $0x1b0] sm:$0xff] (!%p10568_p5) }
 0x4b0   : > { %v7074_v48 = vadd.f32 %v7072_v58, %v13846_v27  ;;  %v8576_v58 = vld [vmem:[%s14134_s5 + $0x148] sm:$0xff] (!%p10568_p5)  ;;  %10841 = vmatpush1.bf16.msra.mxu1 (!%p10568_p5), %v10840_v56 }
 0x4b1   : > { %10842 = vmatprep.subr.bf16.mxu1 (!%p10568_p5), %v12305_v34 }
 0x4fc   : > { %v7686_v14 = vpop.f32.mrb[32].mxu0  ;;  %v7768_v60 = vpop.f32.mrb[32].mxu1 }
 0x4fd   : > { %v7688_v63 = vpop.f32.mrb[33].mxu0  ;;  %v7770_v55 = vpop.f32.mrb[33].mxu1 }
 0x4fe   : > { %v7779_v61 = vcombine.low %v7686_v14, %v7688_v63  ;;  %v7780_v62 = vcombine.low %v7768_v60, %v7770_v55  ;;  %v7690_v8 = vpop.f32.mrb[34].mxu0  ;;  %v7772_v0 = vpop.f32.mrb[34].mxu1  ;;  %v10810_v14 = vpack.c.bf16 (!%p10568_p5), %v8558_v53, %v8557_v52  ;;  %v8541_v60 = vld [vmem:[%s14134_s5 + $0x30] sm:$0xff] (!%p10568_p5)  ;;  %v8542_v63 = vld [vmem:[%s14134_s5 + $0x38] sm:$0xff] (!%p10568_p5)  ;;  %v8559_v55 = vld [vmem:[%s14134_s5 + $0xc0] sm:$0xff] (!%p10568_p5) }
 0x4ff   : > { %v7691_v1 = vpop.f32.mrb[35].mxu0  ;;  %v7773_v2 = vpop.f32.mrb[35].mxu1  ;;  %v8577_v8 = vld [vmem:[%s14134_s5 + $0x150] sm:$0xff] (!%p10568_p5)  ;;  %v8578_v0 = vld [vmem:[%s14134_s5 + $0x158] sm:$0xff] (!%p10568_p5)  ;;  %v8591_v52 = vld [vmem:[%s14134_s5 + $0x1c0] sm:$0xff] (!%p10568_p5) }
 0x500   : > { %v7787_v4 = vrot.slane %v7779_v61, %v12869_v42  ;;  %v7794_v6 = vrot.slane %v7780_v62, %v12869_v42  ;;  %v8560_v61 = vld [vmem:[%s14134_s5 + $0xc8] sm:$0xff] (!%p10568_p5)  ;;  %v10843_v62 = vpack.c.bf16 (!%p10568_p5), %v8576_v58, %v8575_v57  ;;  %v10812_v1 = vpack.c.bf16 (!%p10568_p5), %v8542_v63, %v8541_v60  ;;  %v8593_v57 = vld [vmem:[%s14134_s5 + $0x1d0] sm:$0xff] (!%p10568_p5)  ;;  %v8594_v58 = vld [vmem:[%s14134_s5 + $0x1d8] sm:$0xff] (!%p10568_p5) }
 0x501   : > { %v10814_v2 = vpack.c.bf16 (!%p10568_p5), %v8560_v61, %v8559_v55  ;;  %v8592_v53 = vld [vmem:[%s14134_s5 + $0x1c8] sm:$0xff] (!%p10568_p5)  ;;  %v12306_v55 = vmov (!%p10568_p5), 0.0   ;;  %v8597_v61 = vld [vmem:[%s14134_s5 + $0x1f0] sm:$0xf] (!%p10568_p5) }
 0x502   : > { %v7795_v9 = vcombine.low %v7787_v4, %v7794_v6  ;;  %v8543_v4 = vld [vmem:[%s14134_s5 + $0x40] sm:$0xff] (!%p10568_p5)  ;;  %v8544_v6 = vld [vmem:[%s14134_s5 + $0x48] sm:$0xff] (!%p10568_p5)  ;;  %10844 = vmatpush1.bf16.msra.mxu1 (!%p10568_p5), %v10843_v62  ;;  %v10867_v56 = vpack.c.bf16 (!%p10568_p5), %v8592_v53, %v8591_v52 }
 0x503   : > { %10845 = vmatprep.subr.bf16.mxu1 (!%p10568_p5), %v12305_v34  ;;  %v8596_v60 = vld [vmem:[%s14134_s5 + $0x1e8] sm:$0xff] (!%p10568_p5) }
 0x504   : > { %v7797_v20 = vadd.f32 %v7795_v9, %v7074_v48  ;;  %v10808_v48 = vpack.c.bf16 (!%p10568_p5), %v8540_v51, %v8539_v50  ;;  %v8561_v9 = vld [vmem:[%s14134_s5 + $0xd0] sm:$0xff] (!%p10568_p5)  ;;  %v8590_v50 = vld [vmem:[%s14134_s5 + $0x1b8] sm:$0xff] (!%p10568_p5) }
 0x505   : > { %v10864_v51 = vpack.c.bf16 (!%p10568_p5), %v8590_v50, %v8589_v47 }
 0x506   : > { %10809 = vmatpush3.bf16.msra.mxu0 (!%p10568_p5), %v10808_v48  ;;  %v10870_v48 = vpack.c.bf16 (!%p10568_p5), %v8594_v58, %v8593_v57 }
 0x507   : > { %10811 = vmatprep.subr.bf16.mxu0 (!%p10568_p5), %v10810_v14  ;;  %v8595_v14 = vld [vmem:[%s14134_s5 + $0x1e0] sm:$0xff] (!%p10568_p5) }
 0x508   : > { %v10873_v63 = vpack.c.bf16 (!%p10568_p5), %v8596_v60, %v8595_v14 }
 0x50a   : > { %10813 = vmatpush3.bf16.msra.mxu0 (!%p10568_p5), %v10812_v1  ;;  %v10569_v1 = vld [vmem:[%s14135_s6] ss:$0 sm:$0xff] (!%p10568_p5) }
 0x50b   : > { %10815 = vmatprep.subr.bf16.mxu0 (!%p10568_p5), %v10814_v2 }
 0x550   : > { %v8409_v10 = vpop.f32.mrb[36].mxu0  ;;  %v8491_v30 = vpop.f32.mrb[36].mxu1 }
 0x551   : > { %v8411_v12 = vpop.f32.mrb[37].mxu0  ;;  %v8493_v24 = vpop.f32.mrb[37].mxu1 }
 0x552   : > { %v8502_v27 = vcombine.low %v8409_v10, %v8411_v12  ;;  %v8503_v13 = vcombine.low %v8491_v30, %v8493_v24  ;;  %v8413_v15 = vpop.f32.mrb[38].mxu0  ;;  %v8495_v17 = vpop.f32.mrb[38].mxu1  ;;  %v10846_v10 = vpack.c.bf16 (!%p10568_p5), %v8578_v0, %v8577_v8  ;;  %v8579_v30 = vld [vmem:[%s14134_s5 + $0x160] sm:$0xff] (!%p10568_p5)  ;;  %v8580_v12 = vld [vmem:[%s14134_s5 + $0x168] sm:$0xff] (!%p10568_p5)  ;;  %v10816_v24 = vpack.c.bf16 (!%p10568_p5), %v8544_v6, %v8543_v4 }
 0x553   : > { %v8414_v18 = vpop.f32.mrb[39].mxu0  ;;  %v8496_v3 = vpop.f32.mrb[39].mxu1  ;;  %v8545_v15 = vld [vmem:[%s14134_s5 + $0x50] sm:$0xff] (!%p10568_p5)  ;;  %v8546_v17 = vld [vmem:[%s14134_s5 + $0x58] sm:$0xff] (!%p10568_p5) }
 0x554   : > { %v8510_v5 = vrot.slane %v8502_v27, %v12869_v42  ;;  %v8517_v59 = vrot.slane %v8503_v13, %v12869_v42  ;;  %8532 = sbr.rel (%p10568_p5) target bundleno = 1947 (0x79b), region = 56  ;;  %v8563_v3 = vld [vmem:[%s14134_s5 + $0xe0] sm:$0xff] (!%p10568_p5)  ;;  %10847 = vmatpush1.bf16.msra.mxu1 (!%p10568_p5), %v10846_v10  ;;  %10817 = vmatpush3.bf16.msra.mxu0 (!%p10568_p5), %v10816_v24  ;;  %v10820_v26 = vpack.c.bf16 (!%p10568_p5), %v8546_v17, %v8545_v15 }
 0x555   : > { %10848 = vmatprep.subr.bf16.mxu1 (!%p10568_p5), %v12305_v34 }
 0x556   : > { %v8518_v19 = vcombine.low %v8510_v5, %v8517_v59  ;;  %v8564_v5 = vld [vmem:[%s14134_s5 + $0xe8] sm:$0xff] (!%p10568_p5)  ;;  %v10849_v59 = vpack.c.bf16 (!%p10568_p5), %v8580_v12, %v8579_v30 }
 0x557   : > { %v10822_v46 = vpack.c.bf16 (!%p10568_p5), %v8564_v5, %v8563_v3 }
 0x558   : > { %v8520_v21 = vadd.f32 %v8518_v19, %v7797_v20  ;;  %v8562_v20 = vld [vmem:[%s14134_s5 + $0xd8] sm:$0xff] (!%p10568_p5)  ;;  %10850 = vmatpush1.bf16.msra.mxu1 (!%p10568_p5), %v10849_v59 }
 0x559   : > { %v10818_v13 = vpack.c.bf16 (!%p10568_p5), %v8562_v20, %v8561_v9  ;;  %10851 = vmatprep.subr.bf16.mxu1 (!%p10568_p5), %v12305_v34 }
 0x55a   : > { %8528 = vst.msk [vmem:[#allocation3] sm:$0xff] %vm8527_vm3, %v8520_v21 }
 0x55b   : > { %10819 = vmatprep.subr.bf16.mxu0 %v10818_v13 }
 0x55c   : > { %10821 = vmatpush3.bf16.msra.mxu0 %v10820_v26  ;;  %10853 = vmatpush1.bf16.msra.mxu1 %v10852_v31 }
 0x55d   : > { %10823 = vmatprep.subr.bf16.mxu0 %v10822_v46  ;;  %10854 = vmatprep.subr.bf16.mxu1 %v12305_v34 }
 0x560   : > { %10825 = vmatpush3.bf16.msra.mxu0 %v10824_v33 }
 0x561   : > { %v8533_v27 = vld [vmem:[#allocation3] sm:$0xff]  ;;  %10827 = vmatprep.subr.bf16.mxu0 %v10826_v16 }
 0x562   : > { %v8534_v18 = vmax.f32 %v8533_v27, 0.0 }
 0x564   : > { %v8613_v19 = vrot.slane %v8534_v18, %v12869_v42  ;;  %v8606_v21 = vcombine.high %v8534_v18, %v8534_v18  ;;  %10829 = vmatpush3.bf16.msra.mxu0 %v10828_v49 }
 0x566   : > { %v8621_v29 = vcombine.high %v8613_v19, %v8613_v19  ;;  %v8620_v35 = vrot.slane %v8606_v21, %v12869_v42  ;;  %v8584_v42 = vld [vmem:[%s14134_s5 + $0x188] sm:$0xff] }
 0x567   : > { %v10855_v40 = vpack.c.bf16 %v8584_v42, %v8583_v7 }
 0x568   : > { %8697 = vmatprep.mubr.f32.mxu0 %v8621_v29  ;;  %v8622_v32 = vcombine.high %v8620_v35, %v8620_v35 }
 0x569   : > { %10856 = vmatpush1.bf16.msra.mxu1 %v10855_v40  ;;  %8698 = vmatmul.mubr.f32.vlgmr.msra.gmra.mrb[0].mxu0 %v8613_v19 }
 0x56a   : > { %10571 = vmatprep.mubr.msk.f32.mxu1 %vm8626_vm4, %v8622_v32  ;;  %10857 = vmatprep.subr.bf16.mxu1 %v12305_v34 }
 0x56d   : > { %10859 = vmatpush1.bf16.msra.mxu1 %v10858_v43 }
 0x56e   : > { %10860 = vmatprep.subr.bf16.mxu1 %v12305_v34 }
 0x571   : > { %10862 = vmatpush1.bf16.msra.mxu1 %v10861_v45 }
 0x572   : > { %10863 = vmatprep.subr.bf16.mxu1 %v12305_v34 }
 0x575   : > { %10865 = vmatpush1.bf16.msra.mxu1 %v10864_v51 }
 0x576   : > { %10866 = vmatprep.subr.bf16.mxu1 %v12305_v34 }
 0x579   : > { %10868 = vmatpush1.bf16.msra.mxu1 %v10867_v56 }
 0x57a   : > { %10869 = vmatprep.subr.bf16.mxu1 %v12305_v34 }
 0x57d   : > { %10871 = vmatpush1.bf16.msra.mxu1 %v10870_v48 }
 0x57e   : > { %10872 = vmatprep.subr.bf16.mxu1 %v12305_v34 }
 0x581   : > { %10874 = vmatpush1.bf16.msra.mxu1 %v10873_v63 }
 0x582   : > { %8763 = vmatprep.subr.mxu1 %v12306_v55 }
 0x585   : > { %10570 = vmatpush1.msk.msra.mxu1 %vm8629_vm5, %v8597_v61 }
 0x586   : > { %8768 = vmatmul.mubr.f32.vlgmr.msra.gmra.mrb[0].mxu1 %v8620_v35 }
 0x63c   : > { %v10639_v62 = vpop.f32.mrb[0].mxu0 }
 0x63d   : > { %v10640_v8 = vpop.f32.mrb[1].mxu0 }
 0x63e   : > { %v10641_v0 = vadd.f32 %v10640_v8, %v10639_v62 }
 0x640   : > { %v8700_v2 = vadd.f32 %v10641_v0, %v10569_v1 }
 0x659   : > { %v8769_v4 = vpop.f32.mrb[0].mxu1 }
 0x65a   : > { %v8770_v34 = vadd.f32 %v8769_v4, %v8700_v2  ;;  %v8771_v6 = vpop.f32.mrb[1].mxu1 }
 0x65c   : > { %v8774_v9 = vsel %vm8773_vm6, %v8770_v34, -inf }
 0x65d   : > { %8775 = vmax.xlane.f32.xlu0 %v8774_v9 }
 0x6ea   : > { %v8776_v20 = vpop.xlane.xlu0 %8775 }
 0x6eb   : > { %v8777_v10 = vsub.f32 %v8770_v34, %v8776_v20 }
 0x6ed   : > { %v8778_v30 = vmul.f32 1.442695, %v8777_v10 }
 0x6ef   : > { %12254 = vpow2.f32 %v8778_v30 }
 0x6f9   : > { %v12255_v12 = vpop.eup %12254 }
 0x6fa   : > { %v8780_v24 = vsel %vm8773_vm6, %v12255_v12, 0.0 }
 0x6fb   : > { %8781 = vadd.xlane.f32.xlu0 %v8780_v24 }
 0x788   : > { %v8782_v27 = vpop.xlane.xlu0 %8781 }
 0x789   : > { %12256 = vlog2.f32 %v8782_v27 }
 0x793   : > { %v12257_v13 = vpop.eup %12256 }
 0x794   : > { %v8784_v15 = vmul.f32 0.6931472, %v12257_v13 }
 0x796   : > { %v8785_v17 = vadd.f32 %v8784_v15, %v8776_v20 }
 0x798   : > { %v8786_v18 = vsub.f32 %v8770_v34, %v8785_v17 }
 0x79a   : > { %8787 = vst.msk [vmem:[#allocation4] sm:$0x3] %vm8773_vm6, %v8786_v18 }
 0x79b PF: > { %p10960_p6 = scmp.eq.s32.totalorder %s12354_s25, 1  ;;  %s12307_s13 = smov [#allocation4]  }
 0x79c   : > { %s8795_s14 = sshll.u32 %s12307_s13, 4  ;;  %s8796_s14 = int_to_ptr.vmem [resolvable:$true] %s8795_s14 }
 0x79d   : > { %s12258_s15 = scalar_lea.vmem %s8796_s14, 32  ;;  %p12265_p10 = scmp.lt.s32.totalorder %s8796_s14, %s8796_s14 }
 0x79e   : > { %p12259_p7 = scmp.ne.s32.totalorder %s8796_s14, %s12258_s15  ;;  %p12266_p11 = scmp.lt.s32.totalorder %s12258_s15, %s12258_s15 }
 0x7a0   : > { %p12260_p8 = pnand %p12259_p7, %p10960_p6  ;;  %p12267_p12 = por %p12266_p11, %p12265_p10 }
 0x7a2   : > { %p12261_p9 = pneg %p12260_p8 }
 0x7a4   : > { %p12268_p13 = pnand %p12267_p12, %p12261_p9 }
 0x7a6   : > { %12271 = shalt.err (!%p12268_p13)
}
 0x7a7   : > { %s12272_s18 = scalar_lea.hbm %s14136_s7, 32 }
 0x7a8   : > { %p12273_p0 = scmp.ne.s32.totalorder %s14136_s7, %s12272_s18  ;;  %p12278_p3 = scmp.lt.u32.totalorder %s12272_s18, %s14136_s7 }
 0x7aa   : > { %p12274_p1 = pnand %p12273_p0, %p10960_p6 }
 0x7ac   : > { %p12275_p2 = pneg %p12274_p1 }
 0x7ae   : > { %p12280_p4 = pnand %p12278_p3, %p12275_p2 }
 0x7b0   : > { %12283 = shalt.err (!%p12280_p4)
}
 0x7b1   : > { %10957 = dma.vmem_to_hbm [thread:$0]  (%p10960_p6), %s8796_s14, 32, %s14136_s7, [#allocation5]  }
 0x7b2   : > { %12289 = dma.done.wait (%p10960_p6), [#allocation5], 32  }
 0x7b3   : > { %12291 = vsyncadd (%p10960_p6), [#allocation5], 4294967264 }
 0x7b4 PF: > { %s18_s24 = sadd.s32 1, %s12294_s24  }
 0x7b5   : > { %p15_p5 = scmp.ge.s32.totalorder %s18_s24, 4  }
 0x7b7   :  { %17 = sbr.rel (!%p15_p5) target bundleno = 1 (0x1), region = 142 }
 0x7be   :  { %8808 = vsyncpa [#allocation5], 1 }
 0x7bf   :  { %8810 = vsyncpa [#allocation5 + $0x1], 1 }

</bundles_post_ra>
